<compile_context>
chip_gen: v6e
topology: v6e:2x2x1
jax: 0.10.0
libtpu: 0.0.40
codegen_flags: <defaults>
</compile_context>

<pallas_src>
import functools

import jax
import jax.numpy as jnp
from jax import lax
from jax.experimental import pallas as pl
from jax.experimental.pallas import tpu as pltpu


def _layernorm(x, gamma, beta, eps=1e-5):
    mean = jnp.mean(x, axis=-1, keepdims=True)
    var = jnp.mean(jnp.square(x - mean), axis=-1, keepdims=True)
    return (x - mean) * jax.lax.rsqrt(var + eps) * gamma + beta


def _mm(a, b, use_bf16):
    if use_bf16:  # production-only: breaks the 1e-4 check, keep False for tests
        a = a.astype(jnp.bfloat16)
        b = b.astype(jnp.bfloat16)
    return jnp.dot(a, b, preferred_element_type=jnp.float32)


# ---------------------------------------------------------------------------
# Fused kernel: x -> x + attn(norm1(x)) -> + ConvFFN(norm2(.))  (per batch elem)
# ---------------------------------------------------------------------------
def _block_kernel(x_ref, g1_ref, b1_ref, wf_ref, lks_ref, vp_ref, bp_ref,
                  g2_ref, b2_ref, w1_ref, b1f_ref, wdw_ref, bdw_ref, w2_ref,
                  b2f_ref, o_ref, wv_ref, *, heads, H, W, tq, use_bf16):
    N = H * W
    n_qt = N // tq
    x = x_ref[0]                                                     # (N, C)

    # ---------------- attention branch ----------------
    xn = _layernorm(x, g1_ref[...], b1_ref[...])                     # norm1
    # one fused skinny matmul: [Wq@hsel | sum_k cols of Wkv | sum_v cols of Wkv]
    qkv = _mm(xn, wf_ref[...], use_bf16)                             # (N, heads+2)
    coef = qkv[:, :heads] * lks_ref[...]                             # (N, heads) = qh * lksum * scale
    ks_col = qkv[:, heads:heads + 1]                                 # (N, 1)  sum_{h,c} k
    vs_col = qkv[:, heads + 1:heads + 2]                             # (N, 1)  sum_{h,c} v
    ks_row = jnp.transpose(ks_col)                                   # (1, N)
    ks_max = jnp.max(ks_col)
    ks_min = jnp.min(ks_col)
    # hoisted once (JAX does not CSE broadcast_in_dim)
    ks_b = jnp.broadcast_to(ks_row, (tq, N))                         # (tq, N)
    # deferred softmax normalization: one matmul yields sum(e) and sum(e*vs)
    red_mat = jnp.concatenate([jnp.ones((N, 1), jnp.float32), vs_col], axis=1)  # (N, 2)

    def wv_tile(c_blk):                                              # c_blk: (tq, heads)
        # exact rank-1 row max for ALL heads at once: max_k(c*ks[k]) = max(c*max, c*min)
        m_blk = jnp.maximum(c_blk * ks_max, c_blk * ks_min)          # (tq, heads)
        s0_cols, s1_cols = [], []
        for h in range(heads):                                       # small, static (== unroll=True)
            e_h = jnp.exp(c_blk[:, h:h + 1] * ks_b - m_blk[:, h:h + 1])   # (tq, N) dense 2-D
            s_h = _mm(e_h, red_mat, use_bf16)                        # (tq, 2): [sum e | sum e*vs]
            s0_cols.append(s_h[:, 0:1])
            s1_cols.append(s_h[:, 1:2])
        s0 = jnp.concatenate(s0_cols, axis=1)                        # (tq, heads)
        s1 = jnp.concatenate(s1_cols, axis=1)                        # (tq, heads)
        return s1 / s0                                               # batched normalization

    if n_qt == 1:
        wv = wv_tile(coef)                                           # (N, heads)
    else:
        def body(t, carry):
            q0 = pl.multiple_of(t * tq, tq)
            c_blk = lax.dynamic_slice(coef, (q0, 0), (tq, heads))
            wv_ref[pl.ds(q0, tq), :] = wv_tile(c_blk)
            return carry
        lax.fori_loop(0, n_qt, body, 0)
        wv = wv_ref[...]                                             # (N, heads)

    # vpmat = (per-head learnable-v outer product, 'b d n c -> b n (c d)') @ Wp
    x1 = x + _mm(wv, vp_ref[...], use_bf16) + bp_ref[...]            # first residual

    # ---------------- conv-FFN branch ----------------
    # TODO(synk): CONVFFN class is not provided in the source file; a standard
    # PVTv2-style ConvFFN (fc1 -> 3x3 depthwise conv (pad=1) -> GELU(tanh) -> fc2)
    # is implemented here.
    xn2 = _layernorm(x1, g2_ref[...], b2_ref[...])                   # norm2
    h1 = _mm(xn2, w1_ref[...], use_bf16) + b1f_ref[...]              # (N, Hd)

    # 3x3 depthwise conv directly on the flat (N, Hd) layout: tap shifts via
    # pltpu.roll along the token axis, edge/row-wrap handling via iota masks.
    # TODO(synk): band along H rows (1-row halo) for very large N on v7x.
    n_idx = lax.broadcasted_iota(jnp.int32, (N, 1), 0)
    w_idx = n_idx % W
    all_ok = n_idx >= 0
    row_ok = (n_idx >= W, all_ok, n_idx < (H - 1) * W)               # dy = 0, 1, 2
    col_ok = (w_idx >= 1, all_ok, w_idx <= W - 2)                    # dx = 0, 1, 2

    conv = h1 * wdw_ref[4, :][None, :]                               # center tap (dy=1, dx=1)
    for dy in range(3):
        for dx in range(3):
            if dy == 1 and dx == 1:
                continue
            off = (dy - 1) * W + (dx - 1)                            # input index = n + off
            shifted = pltpu.roll(h1, shift=(-off) % N, axis=0)       # XLU rotate, no copies
            mask = jnp.logical_and(row_ok[dy], col_ok[dx])           # zero-pad edges
            conv = conv + jnp.where(mask, shifted, 0.0) * wdw_ref[dy * 3 + dx, :][None, :]
    conv = conv + bdw_ref[...]

    act = jax.nn.gelu(conv, approximate=True)
    out = _mm(act, w2_ref[...], use_bf16) + b2f_ref[...]
    o_ref[0] = x1 + out                                              # second residual


def _full_spec(arr):
    nd = arr.ndim
    return pl.BlockSpec(arr.shape, lambda b, _nd=nd: (0,) * _nd)


def block_forward(x, params, H, W, heads, *, q_tile=512, use_bf16=False):
    B, N, C = x.shape
    assert N == H * W, "token count must equal H*W"
    # folded glue below relies on head-major channel layout ('b n (d c)') and C % heads == 0
    assert C % heads == 0, "channels must be divisible by heads"
    hd = C // heads
    scale = float(hd) ** -0.5
    hidden = params['W1'].shape[1]

    # ---------------- derived glue parameters (pure weight preprocessing) -------
    g1 = params['g1'].reshape(1, C); b1 = params['b1'].reshape(1, C)
    g2 = params['g2'].reshape(1, C); b2 = params['b2'].reshape(1, C)
    bp = params['bp'].reshape(1, C)
    # kv output layout 'b n (d c qk)': even columns are K, odd columns are V.
    wks = params['Wkv'][:, 0::2].sum(axis=1, keepdims=True)          # (C, 1)
    wvs = params['Wkv'][:, 1::2].sum(axis=1, keepdims=True)          # (C, 1)
    # per-head column selector for q ('b n (d c)': sum over c within head d),
    # folded into Wq offline so the kernel does ONE (N,C)x(C,heads+2) matmul.
    hsel = (jnp.arange(C)[:, None] // hd == jnp.arange(heads)[None, :]).astype(jnp.float32)
    w_fused = jnp.concatenate([params['Wq'] @ hsel, wks, wvs], axis=1)       # (C, heads+2)
    lkscale = (params['k_learn'].reshape(heads, hd).sum(axis=1) * scale).reshape(1, heads)
    lv = params['v_learn'].reshape(heads, hd)
    # vmat[d, c*heads + d] = l_v[d, c] -> (* l_v) then 'b d n c -> b n (c d)';
    # folded with the projection: vpmat = vmat @ Wp   (heads, C)
    j = jnp.arange(C)
    vmat = jnp.zeros((heads, C), jnp.float32).at[j % heads, j].set(lv[j % heads, j // heads])
    vpmat = vmat @ params['Wp']                                      # (heads, C)

    bias1 = params['b1f'].reshape(1, hidden)
    bdw = params['bdw'].reshape(1, hidden)
    wdw9 = params['wdw'].reshape(9, hidden)
    bias2 = params['b2f'].reshape(1, C)

    # query tile: largest divisor of N that is <= q_tile (bounds the (tq,N) exp buffer)
    tq = min(N, q_tile)
    if N % tq:
        tq = max(d for d in range(1, tq + 1) if N % d == 0)

    tok_spec = pl.BlockSpec((1, N, C), lambda b: (b, 0, 0))
    weights = (g1, b1, w_fused, lkscale, vpmat, bp,
               g2, b2, params['W1'], bias1, wdw9, bdw, params['W2'], bias2)

    # explicit scoped-VMEM limit: sized from the working set with headroom,
    # capped below the physical VMEM of the current chip generation.
    f32 = 4
    est = f32 * (2 * 2 * N * C                                 # in/out tiles (double-buffered)
                 + 2 * sum(int(w.size) for w in weights)       # weights (double-buffered)
                 + 4 * N * hidden                              # h1 / conv / act / roll temp
                 + 2 * tq * N                                  # exp tile + ks broadcast
                 + 4 * N * C + N * heads)                      # xn / x1 / out / wv scratch
    try:
        phys = int(pltpu.get_tpu_info().vmem_capacity_bytes)
    except Exception:
        phys = 128 * 1024 * 1024
    vmem_limit = int(min(max(2 * est, 32 * 1024 * 1024), int(phys * 0.8)))

    return pl.pallas_call(
        functools.partial(_block_kernel, heads=heads, H=H, W=W, tq=tq,
                          use_bf16=use_bf16),
        out_shape=jax.ShapeDtypeStruct((B, N, C), jnp.float32),
        grid=(B,),
        in_specs=[tok_spec] + [_full_spec(a) for a in weights],
        out_specs=tok_spec,
        scratch_shapes=[pltpu.VMEM((N, heads), jnp.float32)],
        compiler_params=pltpu.CompilerParams(
            dimension_semantics=("parallel",),
            vmem_limit_bytes=vmem_limit),
    )(x, *weights)


# ---------------------------------------------------------------------------
# Pure-JAX reference: literal translation of Block/Attention.forward
# ---------------------------------------------------------------------------
def block_reference(x, params, H, W, heads):
    B, N, C = x.shape
    hd = C // heads
    scale = float(hd) ** -0.5
    hidden = params['W1'].shape[1]

    # --- attention branch ---
    xn = _layernorm(x, params['g1'], params['b1'])
    q = xn @ params['Wq']
    qv = q.reshape(B, N, heads, hd).transpose(0, 2, 1, 3)                 # b d n c
    kv = xn @ params['Wkv']
    kv = kv.reshape(B, N, heads, hd, 2).transpose(4, 0, 2, 1, 3)          # qk b d n c
    k, v = kv[0], kv[1]
    l_k = jnp.broadcast_to(params['k_learn'], (B, C)).reshape(B, heads, hd)
    l_v = jnp.broadcast_to(params['v_learn'], (B, C)).reshape(B, heads, hd)
    k = k.transpose(0, 2, 1, 3)                                           # b n head c
    v = v.transpose(0, 2, 1, 3)
    k = jnp.einsum('bnhc,bpq->bpnq', k, l_k)
    v = jnp.einsum('bnhc,bpq->bpnq', v, l_v)
    attn = jnp.einsum('bijl,bikm->bijk', qv, k) * scale
    attn = jax.nn.softmax(attn, axis=-1)
    attn = jnp.einsum('bdln,bdnj->bdlj', attn, v)
    attn = attn.transpose(0, 2, 3, 1).reshape(B, N, C)                    # b d n c -> b n (c d)
    x = x + (attn @ params['Wp'] + params['bp'])

    # --- conv-mlp branch ---
    xn2 = _layernorm(x, params['g2'], params['b2'])
    h1 = xn2 @ params['W1'] + params['b1f']
    hw = h1.reshape(B, H, W, hidden)
    padded = jnp.pad(hw, ((0, 0), (1, 1), (1, 1), (0, 0)))
    conv = jnp.zeros_like(hw)
    for dy in range(3):
        for dx in range(3):
            conv = conv + padded[:, dy:dy + H, dx:dx + W, :] * params['wdw'][dy, dx]
    conv = conv + params['bdw']
    act = jax.nn.gelu(conv, approximate=True)
    out = act.reshape(B, N, hidden) @ params['W2'] + params['b2f']
    return x + out


if __name__ == "__main__":
    B, H, W, C, heads = 2, 8, 8, 32, 4
    mlp_ratio = 4.0
    N = H * W
    hidden = int(C * mlp_ratio)

    key = jax.random.PRNGKey(0)
    ks = jax.random.split(key, 16)
    x = jax.random.normal(ks[0], (B, N, C), jnp.float32)

    params = dict(
        # norm1 / norm2 (LayerNorm init: weight=1, bias=0)
        g1=jnp.ones((C,), jnp.float32), b1=jnp.zeros((C,), jnp.float32),
        g2=jnp.ones((C,), jnp.float32), b2=jnp.zeros((C,), jnp.float32),
        # Attention: q (no bias), kv (no bias), proj (+bias), learnable k/v
        Wq=0.02 * jax.random.normal(ks[1], (C, C), jnp.float32),
        Wkv=0.02 * jax.random.normal(ks[2], (C, 2 * C), jnp.float32),
        Wp=0.02 * jax.random.normal(ks[3], (C, C), jnp.float32),
        bp=0.02 * jax.random.normal(ks[4], (C,), jnp.float32),
        k_learn=jax.random.normal(ks[5], (C,), jnp.float32),
        v_learn=jax.random.normal(ks[6], (C,), jnp.float32),
        # ConvFFN: fc1, 3x3 depthwise conv, fc2
        W1=0.02 * jax.random.normal(ks[7], (C, hidden), jnp.float32),
        b1f=0.02 * jax.random.normal(ks[8], (hidden,), jnp.float32),
        wdw=0.47 * jax.random.normal(ks[9], (3, 3, hidden), jnp.float32),
        bdw=0.02 * jax.random.normal(ks[10], (hidden,), jnp.float32),
        W2=0.02 * jax.random.normal(ks[11], (hidden, C), jnp.float32),
        b2f=0.02 * jax.random.normal(ks[12], (C,), jnp.float32),
    )

    out = block_forward(x, params, H, W, heads)
    out = jax.block_until_ready(out)

    ref = block_reference(x, params, H, W, heads)
    assert out.shape == (B, N, C)
    if not bool(jnp.allclose(out, ref, atol=1e-4, rtol=1e-3)):
        raise AssertionError("Pallas Block output does not match reference")
    print("KERNEL_OK")
</pallas_src>

<mosaic_0001>
module attributes {stable_mosaic.version = 11 : i64} {
  func.func @_block_kernel(%arg0: i32, %arg1: memref<1x64x32xf32, #tpu.memory_space<vmem>>, %arg2: memref<1x32xf32, #tpu.memory_space<vmem>>, %arg3: memref<1x32xf32, #tpu.memory_space<vmem>>, %arg4: memref<32x6xf32, #tpu.memory_space<vmem>>, %arg5: memref<1x4xf32, #tpu.memory_space<vmem>>, %arg6: memref<4x32xf32, #tpu.memory_space<vmem>>, %arg7: memref<1x32xf32, #tpu.memory_space<vmem>>, %arg8: memref<1x32xf32, #tpu.memory_space<vmem>>, %arg9: memref<1x32xf32, #tpu.memory_space<vmem>>, %arg10: memref<32x128xf32, #tpu.memory_space<vmem>>, %arg11: memref<1x128xf32, #tpu.memory_space<vmem>>, %arg12: memref<9x128xf32, #tpu.memory_space<vmem>>, %arg13: memref<1x128xf32, #tpu.memory_space<vmem>>, %arg14: memref<128x32xf32, #tpu.memory_space<vmem>>, %arg15: memref<1x32xf32, #tpu.memory_space<vmem>>, %arg16: memref<1x64x32xf32, #tpu.memory_space<vmem>>, %arg17: memref<64x4xf32, #tpu.memory_space<vmem>>) attributes {dimension_semantics = [#tpu.dimension_semantics<parallel>], iteration_bounds = array<i64: 2>, scalar_prefetch = 0 : i64, scratch_operands = 1 : i64, tpu.core_type = #tpu.core_type<tc>, window_params = [{transform_indices = @transform_0, window_bounds = array<i64: 1, 64, 32>}, {pipeline_mode = #tpu.pipeline_mode<synchronous>, transform_indices = @transform_1, window_bounds = array<i64: 1, 32>}, {pipeline_mode = #tpu.pipeline_mode<synchronous>, transform_indices = @transform_2, window_bounds = array<i64: 1, 32>}, {pipeline_mode = #tpu.pipeline_mode<synchronous>, transform_indices = @transform_3, window_bounds = array<i64: 32, 6>}, {pipeline_mode = #tpu.pipeline_mode<synchronous>, transform_indices = @transform_4, window_bounds = array<i64: 1, 4>}, {pipeline_mode = #tpu.pipeline_mode<synchronous>, transform_indices = @transform_5, window_bounds = array<i64: 4, 32>}, {pipeline_mode = #tpu.pipeline_mode<synchronous>, transform_indices = @transform_6, window_bounds = array<i64: 1, 32>}, {pipeline_mode = #tpu.pipeline_mode<synchronous>, transform_indices = @transform_7, window_bounds = array<i64: 1, 32>}, {pipeline_mode = #tpu.pipeline_mode<synchronous>, transform_indices = @transform_8, window_bounds = array<i64: 1, 32>}, {pipeline_mode = #tpu.pipeline_mode<synchronous>, transform_indices = @transform_9, window_bounds = array<i64: 32, 128>}, {pipeline_mode = #tpu.pipeline_mode<synchronous>, transform_indices = @transform_10, window_bounds = array<i64: 1, 128>}, {pipeline_mode = #tpu.pipeline_mode<synchronous>, transform_indices = @transform_11, window_bounds = array<i64: 9, 128>}, {pipeline_mode = #tpu.pipeline_mode<synchronous>, transform_indices = @transform_12, window_bounds = array<i64: 1, 128>}, {pipeline_mode = #tpu.pipeline_mode<synchronous>, transform_indices = @transform_13, window_bounds = array<i64: 128, 32>}, {pipeline_mode = #tpu.pipeline_mode<synchronous>, transform_indices = @transform_14, window_bounds = array<i64: 1, 32>}, {transform_indices = @transform_15, window_bounds = array<i64: 1, 64, 32>}]} {
    %c0 = arith.constant 0 : index
    %c0_0 = arith.constant 0 : index
    %c0_1 = arith.constant 0 : index
    %0 = vector.load %arg1[%c0, %c0_0, %c0_1] : memref<1x64x32xf32, #tpu.memory_space<vmem>>, vector<1x64x32xf32>
    %1 = vector.shape_cast %0 : vector<1x64x32xf32> to vector<64x32xf32>
    %c0_2 = arith.constant 0 : index
    %c0_3 = arith.constant 0 : index
    %2 = vector.load %arg2[%c0_2, %c0_3] : memref<1x32xf32, #tpu.memory_space<vmem>>, vector<1x32xf32>
    %c0_4 = arith.constant 0 : index
    %c0_5 = arith.constant 0 : index
    %3 = vector.load %arg3[%c0_4, %c0_5] : memref<1x32xf32, #tpu.memory_space<vmem>>, vector<1x32xf32>
    %cst = arith.constant dense<0.000000e+00> : vector<64xf32>
    %4 = vector.multi_reduction <add>, %1, %cst [1] : vector<64x32xf32> to vector<64xf32>
    %5 = vector.shape_cast %4 : vector<64xf32> to vector<64x1xf32>
    %cst_6 = arith.constant 3.200000e+01 : f32
    %6 = vector.broadcast %cst_6 : f32 to vector<64x1xf32>
    %7 = arith.divf %5, %6 : vector<64x1xf32>
    %8 = vector.broadcast %7 : vector<64x1xf32> to vector<64x32xf32>
    %9 = arith.subf %1, %8 : vector<64x32xf32>
    %10 = arith.mulf %9, %9 : vector<64x32xf32>
    %cst_7 = arith.constant dense<0.000000e+00> : vector<64xf32>
    %11 = vector.multi_reduction <add>, %10, %cst_7 [1] : vector<64x32xf32> to vector<64xf32>
    %12 = vector.shape_cast %11 : vector<64xf32> to vector<64x1xf32>
    %cst_8 = arith.constant 3.200000e+01 : f32
    %13 = vector.broadcast %cst_8 : f32 to vector<64x1xf32>
    %14 = arith.divf %12, %13 : vector<64x1xf32>
    %15 = vector.broadcast %7 : vector<64x1xf32> to vector<64x32xf32>
    %16 = arith.subf %1, %15 : vector<64x32xf32>
    %cst_9 = arith.constant 9.99999974E-6 : f32
    %17 = vector.broadcast %cst_9 : f32 to vector<64x1xf32>
    %18 = arith.addf %14, %17 : vector<64x1xf32>
    %19 = math.rsqrt %18 : vector<64x1xf32>
    %20 = vector.broadcast %19 : vector<64x1xf32> to vector<64x32xf32>
    %21 = arith.mulf %16, %20 : vector<64x32xf32>
    %22 = vector.broadcast %2 : vector<1x32xf32> to vector<64x32xf32>
    %23 = arith.mulf %21, %22 : vector<64x32xf32>
    %24 = vector.broadcast %3 : vector<1x32xf32> to vector<64x32xf32>
    %25 = arith.addf %23, %24 : vector<64x32xf32>
    %c0_10 = arith.constant 0 : index
    %c0_11 = arith.constant 0 : index
    %26 = vector.load %arg4[%c0_10, %c0_11] : memref<32x6xf32, #tpu.memory_space<vmem>>, vector<32x6xf32>
    %cst_12 = arith.constant dense<0.000000e+00> : vector<64x6xf32>
    %27 = tpu.matmul %25, %26, %cst_12 {dimension_numbers = #tpu.dot_dimension_numbers<[1], [0], [0], [1], [0, 0, 1, 1], [], []>} : vector<64x32xf32>, vector<32x6xf32>, vector<64x6xf32> -> vector<64x6xf32>
    %28 = vector.extract_strided_slice %27 {offsets = [0, 0], sizes = [64, 4], strides = [1, 1]} : vector<64x6xf32> to vector<64x4xf32>
    %c0_13 = arith.constant 0 : index
    %c0_14 = arith.constant 0 : index
    %29 = vector.load %arg5[%c0_13, %c0_14] : memref<1x4xf32, #tpu.memory_space<vmem>>, vector<1x4xf32>
    %30 = vector.broadcast %29 : vector<1x4xf32> to vector<64x4xf32>
    %31 = arith.mulf %28, %30 : vector<64x4xf32>
    %32 = vector.extract_strided_slice %27 {offsets = [0, 4], sizes = [64, 1], strides = [1, 1]} : vector<64x6xf32> to vector<64x1xf32>
    %33 = vector.extract_strided_slice %27 {offsets = [0, 5], sizes = [64, 1], strides = [1, 1]} : vector<64x6xf32> to vector<64x1xf32>
    %34 = tpu.transpose %32, [1, 0] : vector<64x1xf32> -> vector<1x64xf32>
    %35 = vector.shape_cast %32 : vector<64x1xf32> to vector<1x64x1xf32>
    %cst_15 = arith.constant dense<0xFF800000> : vector<1xf32>
    %36 = vector.multi_reduction <maximumf>, %35, %cst_15 [1, 2] : vector<1x64x1xf32> to vector<1xf32>
    %37 = vector.shape_cast %36 : vector<1xf32> to vector<1x1x1xf32>
    %38 = vector.extract %37[0, 0, 0] : f32 from vector<1x1x1xf32>
    %39 = vector.shape_cast %32 : vector<64x1xf32> to vector<1x64x1xf32>
    %cst_16 = arith.constant dense<0x7F800000> : vector<1xf32>
    %40 = vector.multi_reduction <minimumf>, %39, %cst_16 [1, 2] : vector<1x64x1xf32> to vector<1xf32>
    %41 = vector.shape_cast %40 : vector<1xf32> to vector<1x1x1xf32>
    %42 = vector.extract %41[0, 0, 0] : f32 from vector<1x1x1xf32>
    %43 = vector.shape_cast %34 : vector<1x64xf32> to vector<1x64xf32>
    %44 = vector.broadcast %43 : vector<1x64xf32> to vector<64x64xf32>
    %cst_17 = arith.constant 1.000000e+00 : f32
    %45 = vector.broadcast %cst_17 : f32 to vector<64x1xf32>
    %46 = tpu.concatenate %45, %33 in 1 : vector<64x1xf32>, vector<64x1xf32> -> vector<64x2xf32>
    %47 = vector.broadcast %38 : f32 to vector<64x4xf32>
    %48 = arith.mulf %31, %47 : vector<64x4xf32>
    %49 = vector.broadcast %42 : f32 to vector<64x4xf32>
    %50 = arith.mulf %31, %49 : vector<64x4xf32>
    %51 = arith.maximumf %48, %50 : vector<64x4xf32>
    %52 = vector.extract_strided_slice %31 {offsets = [0, 0], sizes = [64, 1], strides = [1, 1]} : vector<64x4xf32> to vector<64x1xf32>
    %53 = vector.broadcast %52 : vector<64x1xf32> to vector<64x64xf32>
    %54 = arith.mulf %53, %44 : vector<64x64xf32>
    %55 = vector.extract_strided_slice %51 {offsets = [0, 0], sizes = [64, 1], strides = [1, 1]} : vector<64x4xf32> to vector<64x1xf32>
    %56 = vector.broadcast %55 : vector<64x1xf32> to vector<64x64xf32>
    %57 = arith.subf %54, %56 : vector<64x64xf32>
    %58 = math.exp %57 : vector<64x64xf32>
    %cst_18 = arith.constant dense<0.000000e+00> : vector<64x2xf32>
    %59 = tpu.matmul %58, %46, %cst_18 {dimension_numbers = #tpu.dot_dimension_numbers<[1], [0], [0], [1], [0, 0, 1, 1], [], []>} : vector<64x64xf32>, vector<64x2xf32>, vector<64x2xf32> -> vector<64x2xf32>
    %60 = vector.extract_strided_slice %59 {offsets = [0, 0], sizes = [64, 1], strides = [1, 1]} : vector<64x2xf32> to vector<64x1xf32>
    %61 = vector.extract_strided_slice %59 {offsets = [0, 1], sizes = [64, 1], strides = [1, 1]} : vector<64x2xf32> to vector<64x1xf32>
    %62 = vector.extract_strided_slice %31 {offsets = [0, 1], sizes = [64, 1], strides = [1, 1]} : vector<64x4xf32> to vector<64x1xf32>
    %63 = vector.broadcast %62 : vector<64x1xf32> to vector<64x64xf32>
    %64 = arith.mulf %63, %44 : vector<64x64xf32>
    %65 = vector.extract_strided_slice %51 {offsets = [0, 1], sizes = [64, 1], strides = [1, 1]} : vector<64x4xf32> to vector<64x1xf32>
    %66 = vector.broadcast %65 : vector<64x1xf32> to vector<64x64xf32>
    %67 = arith.subf %64, %66 : vector<64x64xf32>
    %68 = math.exp %67 : vector<64x64xf32>
    %cst_19 = arith.constant dense<0.000000e+00> : vector<64x2xf32>
    %69 = tpu.matmul %68, %46, %cst_19 {dimension_numbers = #tpu.dot_dimension_numbers<[1], [0], [0], [1], [0, 0, 1, 1], [], []>} : vector<64x64xf32>, vector<64x2xf32>, vector<64x2xf32> -> vector<64x2xf32>
    %70 = vector.extract_strided_slice %69 {offsets = [0, 0], sizes = [64, 1], strides = [1, 1]} : vector<64x2xf32> to vector<64x1xf32>
    %71 = vector.extract_strided_slice %69 {offsets = [0, 1], sizes = [64, 1], strides = [1, 1]} : vector<64x2xf32> to vector<64x1xf32>
    %72 = vector.extract_strided_slice %31 {offsets = [0, 2], sizes = [64, 1], strides = [1, 1]} : vector<64x4xf32> to vector<64x1xf32>
    %73 = vector.broadcast %72 : vector<64x1xf32> to vector<64x64xf32>
    %74 = arith.mulf %73, %44 : vector<64x64xf32>
    %75 = vector.extract_strided_slice %51 {offsets = [0, 2], sizes = [64, 1], strides = [1, 1]} : vector<64x4xf32> to vector<64x1xf32>
    %76 = vector.broadcast %75 : vector<64x1xf32> to vector<64x64xf32>
    %77 = arith.subf %74, %76 : vector<64x64xf32>
    %78 = math.exp %77 : vector<64x64xf32>
    %cst_20 = arith.constant dense<0.000000e+00> : vector<64x2xf32>
    %79 = tpu.matmul %78, %46, %cst_20 {dimension_numbers = #tpu.dot_dimension_numbers<[1], [0], [0], [1], [0, 0, 1, 1], [], []>} : vector<64x64xf32>, vector<64x2xf32>, vector<64x2xf32> -> vector<64x2xf32>
    %80 = vector.extract_strided_slice %79 {offsets = [0, 0], sizes = [64, 1], strides = [1, 1]} : vector<64x2xf32> to vector<64x1xf32>
    %81 = vector.extract_strided_slice %79 {offsets = [0, 1], sizes = [64, 1], strides = [1, 1]} : vector<64x2xf32> to vector<64x1xf32>
    %82 = vector.extract_strided_slice %31 {offsets = [0, 3], sizes = [64, 1], strides = [1, 1]} : vector<64x4xf32> to vector<64x1xf32>
    %83 = vector.broadcast %82 : vector<64x1xf32> to vector<64x64xf32>
    %84 = arith.mulf %83, %44 : vector<64x64xf32>
    %85 = vector.extract_strided_slice %51 {offsets = [0, 3], sizes = [64, 1], strides = [1, 1]} : vector<64x4xf32> to vector<64x1xf32>
    %86 = vector.broadcast %85 : vector<64x1xf32> to vector<64x64xf32>
    %87 = arith.subf %84, %86 : vector<64x64xf32>
    %88 = math.exp %87 : vector<64x64xf32>
    %cst_21 = arith.constant dense<0.000000e+00> : vector<64x2xf32>
    %89 = tpu.matmul %88, %46, %cst_21 {dimension_numbers = #tpu.dot_dimension_numbers<[1], [0], [0], [1], [0, 0, 1, 1], [], []>} : vector<64x64xf32>, vector<64x2xf32>, vector<64x2xf32> -> vector<64x2xf32>
    %90 = vector.extract_strided_slice %89 {offsets = [0, 0], sizes = [64, 1], strides = [1, 1]} : vector<64x2xf32> to vector<64x1xf32>
    %91 = vector.extract_strided_slice %89 {offsets = [0, 1], sizes = [64, 1], strides = [1, 1]} : vector<64x2xf32> to vector<64x1xf32>
    %92 = tpu.concatenate %60, %70, %80, %90 in 1 : vector<64x1xf32>, vector<64x1xf32>, vector<64x1xf32>, vector<64x1xf32> -> vector<64x4xf32>
    %93 = tpu.concatenate %61, %71, %81, %91 in 1 : vector<64x1xf32>, vector<64x1xf32>, vector<64x1xf32>, vector<64x1xf32> -> vector<64x4xf32>
    %94 = arith.divf %93, %92 : vector<64x4xf32>
    %c0_22 = arith.constant 0 : index
    %c0_23 = arith.constant 0 : index
    %95 = vector.load %arg6[%c0_22, %c0_23] : memref<4x32xf32, #tpu.memory_space<vmem>>, vector<4x32xf32>
    %cst_24 = arith.constant dense<0.000000e+00> : vector<64x32xf32>
    %96 = tpu.matmul %94, %95, %cst_24 {dimension_numbers = #tpu.dot_dimension_numbers<[1], [0], [0], [1], [0, 0, 1, 1], [], []>} : vector<64x4xf32>, vector<4x32xf32>, vector<64x32xf32> -> vector<64x32xf32>
    %97 = arith.addf %1, %96 : vector<64x32xf32>
    %c0_25 = arith.constant 0 : index
    %c0_26 = arith.constant 0 : index
    %98 = vector.load %arg7[%c0_25, %c0_26] : memref<1x32xf32, #tpu.memory_space<vmem>>, vector<1x32xf32>
    %99 = vector.broadcast %98 : vector<1x32xf32> to vector<64x32xf32>
    %100 = arith.addf %97, %99 : vector<64x32xf32>
    %c0_27 = arith.constant 0 : index
    %c0_28 = arith.constant 0 : index
    %101 = vector.load %arg8[%c0_27, %c0_28] : memref<1x32xf32, #tpu.memory_space<vmem>>, vector<1x32xf32>
    %c0_29 = arith.constant 0 : index
    %c0_30 = arith.constant 0 : index
    %102 = vector.load %arg9[%c0_29, %c0_30] : memref<1x32xf32, #tpu.memory_space<vmem>>, vector<1x32xf32>
    %cst_31 = arith.constant dense<0.000000e+00> : vector<64xf32>
    %103 = vector.multi_reduction <add>, %100, %cst_31 [1] : vector<64x32xf32> to vector<64xf32>
    %104 = vector.shape_cast %103 : vector<64xf32> to vector<64x1xf32>
    %cst_32 = arith.constant 3.200000e+01 : f32
    %105 = vector.broadcast %cst_32 : f32 to vector<64x1xf32>
    %106 = arith.divf %104, %105 : vector<64x1xf32>
    %107 = vector.broadcast %106 : vector<64x1xf32> to vector<64x32xf32>
    %108 = arith.subf %100, %107 : vector<64x32xf32>
    %109 = arith.mulf %108, %108 : vector<64x32xf32>
    %cst_33 = arith.constant dense<0.000000e+00> : vector<64xf32>
    %110 = vector.multi_reduction <add>, %109, %cst_33 [1] : vector<64x32xf32> to vector<64xf32>
    %111 = vector.shape_cast %110 : vector<64xf32> to vector<64x1xf32>
    %cst_34 = arith.constant 3.200000e+01 : f32
    %112 = vector.broadcast %cst_34 : f32 to vector<64x1xf32>
    %113 = arith.divf %111, %112 : vector<64x1xf32>
    %114 = vector.broadcast %106 : vector<64x1xf32> to vector<64x32xf32>
    %115 = arith.subf %100, %114 : vector<64x32xf32>
    %cst_35 = arith.constant 9.99999974E-6 : f32
    %116 = vector.broadcast %cst_35 : f32 to vector<64x1xf32>
    %117 = arith.addf %113, %116 : vector<64x1xf32>
    %118 = math.rsqrt %117 : vector<64x1xf32>
    %119 = vector.broadcast %118 : vector<64x1xf32> to vector<64x32xf32>
    %120 = arith.mulf %115, %119 : vector<64x32xf32>
    %121 = vector.broadcast %101 : vector<1x32xf32> to vector<64x32xf32>
    %122 = arith.mulf %120, %121 : vector<64x32xf32>
    %123 = vector.broadcast %102 : vector<1x32xf32> to vector<64x32xf32>
    %124 = arith.addf %122, %123 : vector<64x32xf32>
    %c0_36 = arith.constant 0 : index
    %c0_37 = arith.constant 0 : index
    %125 = vector.load %arg10[%c0_36, %c0_37] : memref<32x128xf32, #tpu.memory_space<vmem>>, vector<32x128xf32>
    %cst_38 = arith.constant dense<0.000000e+00> : vector<64x128xf32>
    %126 = tpu.matmul %124, %125, %cst_38 {dimension_numbers = #tpu.dot_dimension_numbers<[1], [0], [0], [1], [0, 0, 1, 1], [], []>} : vector<64x32xf32>, vector<32x128xf32>, vector<64x128xf32> -> vector<64x128xf32>
    %c0_39 = arith.constant 0 : index
    %c0_40 = arith.constant 0 : index
    %127 = vector.load %arg11[%c0_39, %c0_40] : memref<1x128xf32, #tpu.memory_space<vmem>>, vector<1x128xf32>
    %128 = vector.broadcast %127 : vector<1x128xf32> to vector<64x128xf32>
    %129 = arith.addf %126, %128 : vector<64x128xf32>
    %130 = tpu.iota {dimensions = array<i32: 0>} : vector<64x1xi32>
    %c8_i32 = arith.constant 8 : i32
    %c0_i32 = arith.constant 0 : i32
    %131 = arith.cmpi eq, %c8_i32, %c0_i32 : i32
    %c1_i32 = arith.constant 1 : i32
    %132 = arith.select %131, %c1_i32, %c8_i32 : i32
    %133 = vector.broadcast %132 : i32 to vector<64x1xi32>
    %134 = arith.remsi %130, %133 : vector<64x1xi32>
    %c0_i32_41 = arith.constant 0 : i32
    %135 = vector.broadcast %c0_i32_41 : i32 to vector<64x1xi32>
    %136 = arith.cmpi ne, %134, %135 : vector<64x1xi32>
    %c0_i32_42 = arith.constant 0 : i32
    %137 = vector.broadcast %c0_i32_42 : i32 to vector<64x1xi32>
    %138 = arith.cmpi slt, %134, %137 : vector<64x1xi32>
    %c0_i32_43 = arith.constant 0 : i32
    %139 = arith.cmpi slt, %132, %c0_i32_43 : i32
    %140 = vector.broadcast %139 : i1 to vector<64x1xi1>
    %141 = vector.broadcast %140 : vector<64x1xi1> to vector<64x1xi1>
    %142 = arith.xori %138, %141 : vector<64x1xi1>
    %143 = arith.andi %142, %136 : vector<64x1xi1>
    %144 = vector.broadcast %132 : i32 to vector<64x1xi32>
    %145 = arith.addi %134, %144 : vector<64x1xi32>
    %146 = arith.select %143, %145, %134 : vector<64x1xi1>, vector<64x1xi32>
    %c0_i32_44 = arith.constant 0 : i32
    %147 = vector.broadcast %c0_i32_44 : i32 to vector<64x1xi32>
    %148 = arith.cmpi sge, %130, %147 : vector<64x1xi32>
    %c8_i32_45 = arith.constant 8 : i32
    %149 = vector.broadcast %c8_i32_45 : i32 to vector<64x1xi32>
    %150 = arith.cmpi sge, %130, %149 : vector<64x1xi32>
    %c56_i32 = arith.constant 56 : i32
    %151 = vector.broadcast %c56_i32 : i32 to vector<64x1xi32>
    %152 = arith.cmpi slt, %130, %151 : vector<64x1xi32>
    %c1_i32_46 = arith.constant 1 : i32
    %153 = vector.broadcast %c1_i32_46 : i32 to vector<64x1xi32>
    %154 = arith.cmpi sge, %146, %153 : vector<64x1xi32>
    %c6_i32 = arith.constant 6 : i32
    %155 = vector.broadcast %c6_i32 : i32 to vector<64x1xi32>
    %156 = arith.cmpi sle, %146, %155 : vector<64x1xi32>
    %c4 = arith.constant 4 : index
    %c0_47 = arith.constant 0 : index
    %157 = vector.load %arg12[%c4, %c0_47] : memref<9x128xf32, #tpu.memory_space<vmem>>, vector<1x128xf32>
    %158 = vector.shape_cast %157 : vector<1x128xf32> to vector<128xf32>
    %159 = vector.shape_cast %158 : vector<128xf32> to vector<1x128xf32>
    %160 = vector.broadcast %159 : vector<1x128xf32> to vector<64x128xf32>
    %161 = arith.mulf %129, %160 : vector<64x128xf32>
    %c9_i32 = arith.constant 9 : i32
    %162 = tpu.dynamic_rotate %129 by %c9_i32 dim 0 : vector<64x128xf32>, i32 -> vector<64x128xf32>
    %163 = arith.andi %150, %154 : vector<64x1xi1>
    %cst_48 = arith.constant 0.000000e+00 : f32
    %164 = vector.shape_cast %163 : vector<64x1xi1> to vector<64x1xi1>
    %165 = vector.broadcast %164 : vector<64x1xi1> to vector<64x128xi1>
    %166 = vector.broadcast %cst_48 : f32 to vector<64x128xf32>
    %167 = arith.select %165, %162, %166 : vector<64x128xi1>, vector<64x128xf32>
    %c0_49 = arith.constant 0 : index
    %c0_50 = arith.constant 0 : index
    %168 = vector.load %arg12[%c0_49, %c0_50] : memref<9x128xf32, #tpu.memory_space<vmem>>, vector<1x128xf32>
    %169 = vector.shape_cast %168 : vector<1x128xf32> to vector<128xf32>
    %170 = vector.shape_cast %169 : vector<128xf32> to vector<1x128xf32>
    %171 = vector.broadcast %170 : vector<1x128xf32> to vector<64x128xf32>
    %172 = arith.mulf %167, %171 : vector<64x128xf32>
    %173 = arith.addf %161, %172 : vector<64x128xf32>
    %c8_i32_51 = arith.constant 8 : i32
    %174 = tpu.dynamic_rotate %129 by %c8_i32_51 dim 0 : vector<64x128xf32>, i32 -> vector<64x128xf32>
    %175 = arith.andi %150, %148 : vector<64x1xi1>
    %cst_52 = arith.constant 0.000000e+00 : f32
    %176 = vector.shape_cast %175 : vector<64x1xi1> to vector<64x1xi1>
    %177 = vector.broadcast %176 : vector<64x1xi1> to vector<64x128xi1>
    %178 = vector.broadcast %cst_52 : f32 to vector<64x128xf32>
    %179 = arith.select %177, %174, %178 : vector<64x128xi1>, vector<64x128xf32>
    %c1 = arith.constant 1 : index
    %c0_53 = arith.constant 0 : index
    %180 = vector.load %arg12[%c1, %c0_53] : memref<9x128xf32, #tpu.memory_space<vmem>>, vector<1x128xf32>
    %181 = vector.shape_cast %180 : vector<1x128xf32> to vector<128xf32>
    %182 = vector.shape_cast %181 : vector<128xf32> to vector<1x128xf32>
    %183 = vector.broadcast %182 : vector<1x128xf32> to vector<64x128xf32>
    %184 = arith.mulf %179, %183 : vector<64x128xf32>
    %185 = arith.addf %173, %184 : vector<64x128xf32>
    %c7_i32 = arith.constant 7 : i32
    %186 = tpu.dynamic_rotate %129 by %c7_i32 dim 0 : vector<64x128xf32>, i32 -> vector<64x128xf32>
    %187 = arith.andi %150, %156 : vector<64x1xi1>
    %cst_54 = arith.constant 0.000000e+00 : f32
    %188 = vector.shape_cast %187 : vector<64x1xi1> to vector<64x1xi1>
    %189 = vector.broadcast %188 : vector<64x1xi1> to vector<64x128xi1>
    %190 = vector.broadcast %cst_54 : f32 to vector<64x128xf32>
    %191 = arith.select %189, %186, %190 : vector<64x128xi1>, vector<64x128xf32>
    %c2 = arith.constant 2 : index
    %c0_55 = arith.constant 0 : index
    %192 = vector.load %arg12[%c2, %c0_55] : memref<9x128xf32, #tpu.memory_space<vmem>>, vector<1x128xf32>
    %193 = vector.shape_cast %192 : vector<1x128xf32> to vector<128xf32>
    %194 = vector.shape_cast %193 : vector<128xf32> to vector<1x128xf32>
    %195 = vector.broadcast %194 : vector<1x128xf32> to vector<64x128xf32>
    %196 = arith.mulf %191, %195 : vector<64x128xf32>
    %197 = arith.addf %185, %196 : vector<64x128xf32>
    %c1_i32_56 = arith.constant 1 : i32
    %198 = tpu.dynamic_rotate %129 by %c1_i32_56 dim 0 : vector<64x128xf32>, i32 -> vector<64x128xf32>
    %199 = arith.andi %148, %154 : vector<64x1xi1>
    %cst_57 = arith.constant 0.000000e+00 : f32
    %200 = vector.shape_cast %199 : vector<64x1xi1> to vector<64x1xi1>
    %201 = vector.broadcast %200 : vector<64x1xi1> to vector<64x128xi1>
    %202 = vector.broadcast %cst_57 : f32 to vector<64x128xf32>
    %203 = arith.select %201, %198, %202 : vector<64x128xi1>, vector<64x128xf32>
    %c3 = arith.constant 3 : index
    %c0_58 = arith.constant 0 : index
    %204 = vector.load %arg12[%c3, %c0_58] : memref<9x128xf32, #tpu.memory_space<vmem>>, vector<1x128xf32>
    %205 = vector.shape_cast %204 : vector<1x128xf32> to vector<128xf32>
    %206 = vector.shape_cast %205 : vector<128xf32> to vector<1x128xf32>
    %207 = vector.broadcast %206 : vector<1x128xf32> to vector<64x128xf32>
    %208 = arith.mulf %203, %207 : vector<64x128xf32>
    %209 = arith.addf %197, %208 : vector<64x128xf32>
    %c63_i32 = arith.constant 63 : i32
    %210 = tpu.dynamic_rotate %129 by %c63_i32 dim 0 : vector<64x128xf32>, i32 -> vector<64x128xf32>
    %211 = arith.andi %148, %156 : vector<64x1xi1>
    %cst_59 = arith.constant 0.000000e+00 : f32
    %212 = vector.shape_cast %211 : vector<64x1xi1> to vector<64x1xi1>
    %213 = vector.broadcast %212 : vector<64x1xi1> to vector<64x128xi1>
    %214 = vector.broadcast %cst_59 : f32 to vector<64x128xf32>
    %215 = arith.select %213, %210, %214 : vector<64x128xi1>, vector<64x128xf32>
    %c5 = arith.constant 5 : index
    %c0_60 = arith.constant 0 : index
    %216 = vector.load %arg12[%c5, %c0_60] : memref<9x128xf32, #tpu.memory_space<vmem>>, vector<1x128xf32>
    %217 = vector.shape_cast %216 : vector<1x128xf32> to vector<128xf32>
    %218 = vector.shape_cast %217 : vector<128xf32> to vector<1x128xf32>
    %219 = vector.broadcast %218 : vector<1x128xf32> to vector<64x128xf32>
    %220 = arith.mulf %215, %219 : vector<64x128xf32>
    %221 = arith.addf %209, %220 : vector<64x128xf32>
    %c57_i32 = arith.constant 57 : i32
    %222 = tpu.dynamic_rotate %129 by %c57_i32 dim 0 : vector<64x128xf32>, i32 -> vector<64x128xf32>
    %223 = arith.andi %152, %154 : vector<64x1xi1>
    %cst_61 = arith.constant 0.000000e+00 : f32
    %224 = vector.shape_cast %223 : vector<64x1xi1> to vector<64x1xi1>
    %225 = vector.broadcast %224 : vector<64x1xi1> to vector<64x128xi1>
    %226 = vector.broadcast %cst_61 : f32 to vector<64x128xf32>
    %227 = arith.select %225, %222, %226 : vector<64x128xi1>, vector<64x128xf32>
    %c6 = arith.constant 6 : index
    %c0_62 = arith.constant 0 : index
    %228 = vector.load %arg12[%c6, %c0_62] : memref<9x128xf32, #tpu.memory_space<vmem>>, vector<1x128xf32>
    %229 = vector.shape_cast %228 : vector<1x128xf32> to vector<128xf32>
    %230 = vector.shape_cast %229 : vector<128xf32> to vector<1x128xf32>
    %231 = vector.broadcast %230 : vector<1x128xf32> to vector<64x128xf32>
    %232 = arith.mulf %227, %231 : vector<64x128xf32>
    %233 = arith.addf %221, %232 : vector<64x128xf32>
    %c56_i32_63 = arith.constant 56 : i32
    %234 = tpu.dynamic_rotate %129 by %c56_i32_63 dim 0 : vector<64x128xf32>, i32 -> vector<64x128xf32>
    %235 = arith.andi %152, %148 : vector<64x1xi1>
    %cst_64 = arith.constant 0.000000e+00 : f32
    %236 = vector.shape_cast %235 : vector<64x1xi1> to vector<64x1xi1>
    %237 = vector.broadcast %236 : vector<64x1xi1> to vector<64x128xi1>
    %238 = vector.broadcast %cst_64 : f32 to vector<64x128xf32>
    %239 = arith.select %237, %234, %238 : vector<64x128xi1>, vector<64x128xf32>
    %c7 = arith.constant 7 : index
    %c0_65 = arith.constant 0 : index
    %240 = vector.load %arg12[%c7, %c0_65] : memref<9x128xf32, #tpu.memory_space<vmem>>, vector<1x128xf32>
    %241 = vector.shape_cast %240 : vector<1x128xf32> to vector<128xf32>
    %242 = vector.shape_cast %241 : vector<128xf32> to vector<1x128xf32>
    %243 = vector.broadcast %242 : vector<1x128xf32> to vector<64x128xf32>
    %244 = arith.mulf %239, %243 : vector<64x128xf32>
    %245 = arith.addf %233, %244 : vector<64x128xf32>
    %c55_i32 = arith.constant 55 : i32
    %246 = tpu.dynamic_rotate %129 by %c55_i32 dim 0 : vector<64x128xf32>, i32 -> vector<64x128xf32>
    %247 = arith.andi %152, %156 : vector<64x1xi1>
    %cst_66 = arith.constant 0.000000e+00 : f32
    %248 = vector.shape_cast %247 : vector<64x1xi1> to vector<64x1xi1>
    %249 = vector.broadcast %248 : vector<64x1xi1> to vector<64x128xi1>
    %250 = vector.broadcast %cst_66 : f32 to vector<64x128xf32>
    %251 = arith.select %249, %246, %250 : vector<64x128xi1>, vector<64x128xf32>
    %c8 = arith.constant 8 : index
    %c0_67 = arith.constant 0 : index
    %252 = vector.load %arg12[%c8, %c0_67] : memref<9x128xf32, #tpu.memory_space<vmem>>, vector<1x128xf32>
    %253 = vector.shape_cast %252 : vector<1x128xf32> to vector<128xf32>
    %254 = vector.shape_cast %253 : vector<128xf32> to vector<1x128xf32>
    %255 = vector.broadcast %254 : vector<1x128xf32> to vector<64x128xf32>
    %256 = arith.mulf %251, %255 : vector<64x128xf32>
    %257 = arith.addf %245, %256 : vector<64x128xf32>
    %c0_68 = arith.constant 0 : index
    %c0_69 = arith.constant 0 : index
    %258 = vector.load %arg13[%c0_68, %c0_69] : memref<1x128xf32, #tpu.memory_space<vmem>>, vector<1x128xf32>
    %259 = vector.broadcast %258 : vector<1x128xf32> to vector<64x128xf32>
    %260 = arith.addf %257, %259 : vector<64x128xf32>
    %261 = arith.mulf %260, %260 : vector<64x128xf32>
    %262 = arith.mulf %260, %261 : vector<64x128xf32>
    %cst_70 = arith.constant 4.471500e-02 : f32
    %263 = vector.broadcast %cst_70 : f32 to vector<64x128xf32>
    %264 = arith.mulf %263, %262 : vector<64x128xf32>
    %265 = arith.addf %260, %264 : vector<64x128xf32>
    %cst_71 = arith.constant 0.797884583 : f32
    %266 = vector.broadcast %cst_71 : f32 to vector<64x128xf32>
    %267 = arith.mulf %266, %265 : vector<64x128xf32>
    %268 = math.tanh %267 : vector<64x128xf32>
    %cst_72 = arith.constant 1.000000e+00 : f32
    %269 = vector.broadcast %cst_72 : f32 to vector<64x128xf32>
    %270 = arith.addf %269, %268 : vector<64x128xf32>
    %cst_73 = arith.constant 5.000000e-01 : f32
    %271 = vector.broadcast %cst_73 : f32 to vector<64x128xf32>
    %272 = arith.mulf %271, %270 : vector<64x128xf32>
    %273 = arith.mulf %260, %272 : vector<64x128xf32>
    %c0_74 = arith.constant 0 : index
    %c0_75 = arith.constant 0 : index
    %274 = vector.load %arg14[%c0_74, %c0_75] : memref<128x32xf32, #tpu.memory_space<vmem>>, vector<128x32xf32>
    %cst_76 = arith.constant dense<0.000000e+00> : vector<64x32xf32>
    %275 = tpu.matmul %273, %274, %cst_76 {dimension_numbers = #tpu.dot_dimension_numbers<[1], [0], [0], [1], [0, 0, 1, 1], [], []>} : vector<64x128xf32>, vector<128x32xf32>, vector<64x32xf32> -> vector<64x32xf32>
    %c0_77 = arith.constant 0 : index
    %c0_78 = arith.constant 0 : index
    %276 = vector.load %arg15[%c0_77, %c0_78] : memref<1x32xf32, #tpu.memory_space<vmem>>, vector<1x32xf32>
    %277 = vector.broadcast %276 : vector<1x32xf32> to vector<64x32xf32>
    %278 = arith.addf %275, %277 : vector<64x32xf32>
    %279 = arith.addf %100, %278 : vector<64x32xf32>
    %c0_79 = arith.constant 0 : index
    %c0_80 = arith.constant 0 : index
    %c0_81 = arith.constant 0 : index
    %280 = vector.load %arg16[%c0_79, %c0_80, %c0_81] : memref<1x64x32xf32, #tpu.memory_space<vmem>>, vector<1x64x32xf32>
    %281 = vector.shape_cast %280 : vector<1x64x32xf32> to vector<64x32xf32>
    %282 = vector.shape_cast %279 : vector<64x32xf32> to vector<1x64x32xf32>
    tpu.vector_store %arg16[%c0_79, %c0_80, %c0_81], %282 {strides = array<i32>} : memref<1x64x32xf32, #tpu.memory_space<vmem>>, vector<1x64x32xf32>,
    return
  }
  func.func @transform_0(%arg0: i32) -> (i32, i32, i32) {
    %c0_i32 = arith.constant 0 : i32
    %c0_i32_0 = arith.constant 0 : i32
    %c0_i32_1 = arith.constant 0 : i32
    return %arg0, %c0_i32, %c0_i32_0 : i32, i32, i32
  }
  func.func @transform_1(%arg0: i32) -> (i32, i32) {
    %c0_i32 = arith.constant 0 : i32
    %c0_i32_0 = arith.constant 0 : i32
    %c0_i32_1 = arith.constant 0 : i32
    return %c0_i32, %c0_i32_0 : i32, i32
  }
  func.func @transform_2(%arg0: i32) -> (i32, i32) {
    %c0_i32 = arith.constant 0 : i32
    %c0_i32_0 = arith.constant 0 : i32
    %c0_i32_1 = arith.constant 0 : i32
    return %c0_i32, %c0_i32_0 : i32, i32
  }
  func.func @transform_3(%arg0: i32) -> (i32, i32) {
    %c0_i32 = arith.constant 0 : i32
    %c0_i32_0 = arith.constant 0 : i32
    %c0_i32_1 = arith.constant 0 : i32
    return %c0_i32, %c0_i32_0 : i32, i32
  }
  func.func @transform_4(%arg0: i32) -> (i32, i32) {
    %c0_i32 = arith.constant 0 : i32
    %c0_i32_0 = arith.constant 0 : i32
    %c0_i32_1 = arith.constant 0 : i32
    return %c0_i32, %c0_i32_0 : i32, i32
  }
  func.func @transform_5(%arg0: i32) -> (i32, i32) {
    %c0_i32 = arith.constant 0 : i32
    %c0_i32_0 = arith.constant 0 : i32
    %c0_i32_1 = arith.constant 0 : i32
    return %c0_i32, %c0_i32_0 : i32, i32
  }
  func.func @transform_6(%arg0: i32) -> (i32, i32) {
    %c0_i32 = arith.constant 0 : i32
    %c0_i32_0 = arith.constant 0 : i32
    %c0_i32_1 = arith.constant 0 : i32
    return %c0_i32, %c0_i32_0 : i32, i32
  }
  func.func @transform_7(%arg0: i32) -> (i32, i32) {
    %c0_i32 = arith.constant 0 : i32
    %c0_i32_0 = arith.constant 0 : i32
    %c0_i32_1 = arith.constant 0 : i32
    return %c0_i32, %c0_i32_0 : i32, i32
  }
  func.func @transform_8(%arg0: i32) -> (i32, i32) {
    %c0_i32 = arith.constant 0 : i32
    %c0_i32_0 = arith.constant 0 : i32
    %c0_i32_1 = arith.constant 0 : i32
    return %c0_i32, %c0_i32_0 : i32, i32
  }
  func.func @transform_9(%arg0: i32) -> (i32, i32) {
    %c0_i32 = arith.constant 0 : i32
    %c0_i32_0 = arith.constant 0 : i32
    %c0_i32_1 = arith.constant 0 : i32
    return %c0_i32, %c0_i32_0 : i32, i32
  }
  func.func @transform_10(%arg0: i32) -> (i32, i32) {
    %c0_i32 = arith.constant 0 : i32
    %c0_i32_0 = arith.constant 0 : i32
    %c0_i32_1 = arith.constant 0 : i32
    return %c0_i32, %c0_i32_0 : i32, i32
  }
  func.func @transform_11(%arg0: i32) -> (i32, i32) {
    %c0_i32 = arith.constant 0 : i32
    %c0_i32_0 = arith.constant 0 : i32
    %c0_i32_1 = arith.constant 0 : i32
    return %c0_i32, %c0_i32_0 : i32, i32
  }
  func.func @transform_12(%arg0: i32) -> (i32, i32) {
    %c0_i32 = arith.constant 0 : i32
    %c0_i32_0 = arith.constant 0 : i32
    %c0_i32_1 = arith.constant 0 : i32
    return %c0_i32, %c0_i32_0 : i32, i32
  }
  func.func @transform_13(%arg0: i32) -> (i32, i32) {
    %c0_i32 = arith.constant 0 : i32
    %c0_i32_0 = arith.constant 0 : i32
    %c0_i32_1 = arith.constant 0 : i32
    return %c0_i32, %c0_i32_0 : i32, i32
  }
  func.func @transform_14(%arg0: i32) -> (i32, i32) {
    %c0_i32 = arith.constant 0 : i32
    %c0_i32_0 = arith.constant 0 : i32
    %c0_i32_1 = arith.constant 0 : i32
    return %c0_i32, %c0_i32_0 : i32, i32
  }
  func.func @transform_15(%arg0: i32) -> (i32, i32, i32) {
    %c0_i32 = arith.constant 0 : i32
    %c0_i32_0 = arith.constant 0 : i32
    %c0_i32_1 = arith.constant 0 : i32
    return %arg0, %c0_i32, %c0_i32_0 : i32, i32, i32
  }
}

</mosaic_0001>

<bundles_post_ra>
// kernel: tpu_custom_call.1
= control target key start
LH: loop header
LB: loop body
LE: loop exit
PB: predicated region body
PF: predicated region fallthrough
CT: control target
= control target key end

     0   :  { %s4160_s18 = smov 0   ;;  %s5672_s0 = inlined_call_operand.vmem [shape: f32[2,64,32], index: 0, kind: input, shape index: {}]   ;;  %s5673_s1 = inlined_call_operand.vmem [shape: f32[1,32], index: 1, kind: input, shape index: {}]   ;;  %s5674_s2 = inlined_call_operand.vmem [shape: f32[1,32], index: 2, kind: input, shape index: {}]   ;;  %s5675_s3 = inlined_call_operand.vmem [shape: f32[32,6], index: 3, kind: input, shape index: {}]   ;;  %s5676_s4 = inlined_call_operand.vmem [shape: f32[1,4], index: 4, kind: input, shape index: {}]   ;;  %s5677_s5 = inlined_call_operand.vmem [shape: f32[4,32], index: 5, kind: input, shape index: {}]   ;;  %s5678_s6 = inlined_call_operand.vmem [shape: f32[1,32], index: 6, kind: input, shape index: {}]   ;;  %s5679_s7 = inlined_call_operand.vmem [shape: f32[1,32], index: 7, kind: input, shape index: {}]   ;;  %s5680_s8 = inlined_call_operand.vmem [shape: f32[1,32], index: 8, kind: input, shape index: {}]   ;;  %s5681_s9 = inlined_call_operand.vmem [shape: f32[32,128], index: 9, kind: input, shape index: {}]   ;;  %s5682_s10 = inlined_call_operand.vmem [shape: f32[1,128], index: 10, kind: input, shape index: {}]   ;;  %s5683_s11 = inlined_call_operand.vmem [shape: f32[9,128], index: 11, kind: input, shape index: {}]   ;;  %s5684_s12 = inlined_call_operand.vmem [shape: f32[1,128], index: 12, kind: input, shape index: {}]   ;;  %s5685_s13 = inlined_call_operand.vmem [shape: f32[128,32], index: 13, kind: input, shape index: {}]   ;;  %s5686_s14 = inlined_call_operand.vmem [shape: f32[1,32], index: 14, kind: input, shape index: {}]   ;;  %s5687_s15 = inlined_call_operand.vmem [shape: f32[2,64,32], index: 15, kind: output, shape index: {}]  }
   0x1 LB: > { %s3432_s19 = sadd.s32 4294967295, %s4069_s18   ;;  %p3436_p0 = scmp.ge.s32.totalorder %s4069_s18, 1  ;;  %s4069_s18 = sphi %s4160_s18, %s25_s18  }
   0x2   : > { %p437_p1 = scmp.lt.s32.totalorder %s4069_s18, 3 }
   0x4   : > { %p438_p2 = pnand %p3436_p0, %p437_p1 }
   0x6   : > { %441 = sbr.rel (%p438_p2) target bundleno = 2407 (0x967), region = 80 }
   0xb   : > { %p485_p3 = scmp.lt.s32.totalorder %s3432_s19, 1  ;;  %vm5701_vm0 = vcmask 261120   ;;  %v642_v56 = vld [vmem:[%s5675_s3 + $0x18] sm:$0xff]  ;;  %v641_v57 = vld [vmem:[%s5675_s3 + $0x10] sm:$0xff]  ;;  %v640_v58 = vld [vmem:[%s5675_s3 + $0x8] sm:$0xff]  ;;  %s4073_s27 = smov 124  }
   0xc   : > { %3641 = vmatprep.subr.mxu0 %v642_v56  ;;  %v639_v59 = vld [vmem:[%s5675_s3] sm:$0xff]  ;;  %vm851_vm1 = vcmask 39968   ;;  %vm904_vm2 = vcmask 7168   ;;  %vm1051_vm3 = vcmask 523264   ;;  %s4076_s30 = smov 2   ;;  %s4077_s16 = smov 127  }
   0xd   : > { %s5801_s19 = smov (!%p485_p3, %s3432_s19), 1  ;;  %3642 = vmatpush3.msra.mxu0 %v642_v56  ;;  %v4072_v56 = vmov 1   ;;  %s4078_s17 = smov 1   ;;  %vm2124_vm4 = vcmask 1043456   ;;  %vm1960_vm5 = vcmask 15360   ;;  %vm1969_vm6 = vcmask 23552  }
   0xe   : > { %s3518_s20 = sshll.u32 %s5801_s19, 6  ;;  %3643 = vmatprep.subr.mxu0 %v641_v57  ;;  %3890 = vset.pattern.permute.xlu0 %v4072_v56  ;;  %s4079_s21 = smov 3   ;;  %vm2099_vm7 = vcmask 31744  }
   0xf   : > { %s4176_s23 = scalar_lea.vmem %s5672_s0, %s3518_s20  ;;  %3644 = vmatpush3.msra.mxu0 %v641_v57  ;;  %s494_s25 = scalar_lea.vmem %s5687_s15, %s3518_s20 }
  0x10   : > { %v495_v0 = vld [vmem:[%s4176_s23] sm:$0xff]  ;;  %v497_v1 = vld [vmem:[%s4176_s23 + $0x10] sm:$0xff]  ;;  %v496_v2 = vld [vmem:[%s4176_s23 + $0x8] sm:$0xff]  ;;  %3645 = vmatprep.subr.mxu0 %v640_v58 }
  0x11   : > { %v506_v3 = vsel %vm5701_vm0, %v495_v0, 0.0  ;;  %v512_v4 = vsel %vm5701_vm0, %v497_v1, 0.0  ;;  %v498_v5 = vld [vmem:[%s4176_s23 + $0x18] sm:$0xff]  ;;  %v509_v6 = vsel %vm5701_vm0, %v496_v2, 0.0  ;;  %v499_v8 = vld [vmem:[%s4176_s23 + $0x20] sm:$0xff]  ;;  %v500_v9 = vld [vmem:[%s4176_s23 + $0x28] sm:$0xff]  ;;  %3646 = vmatpush3.msra.mxu0 %v640_v58 }
  0x12   : > { %507 = vadd.xlane.f32.xlu0 %v506_v3  ;;  %513 = vadd.xlane.f32.xlu1 %v512_v4  ;;  %v515_v7 = vsel %vm5701_vm0, %v498_v5, 0.0  ;;  %v518_v10 = vsel %vm5701_vm0, %v499_v8, 0.0  ;;  %v521_v11 = vsel %vm5701_vm0, %v500_v9, 0.0  ;;  %v501_v12 = vld [vmem:[%s4176_s23 + $0x30] sm:$0xff]  ;;  %v502_v13 = vld [vmem:[%s4176_s23 + $0x38] sm:$0xff] }
  0x13   : > { %v524_v14 = vsel %vm5701_vm0, %v501_v12, 0.0  ;;  %v527_v15 = vsel %vm5701_vm0, %v502_v13, 0.0  ;;  %3647 = vmatprep.subr.mxu0 %v639_v59 }
  0x14   : > { %3648 = vmatpush3.msra.mxu0 %v639_v59 }
  0x16   : > { %510 = vadd.xlane.f32.xlu0 %v509_v6  ;;  %516 = vadd.xlane.f32.xlu1 %v515_v7 }
  0x1a   : > { %519 = vadd.xlane.f32.xlu0 %v518_v10  ;;  %522 = vadd.xlane.f32.xlu1 %v521_v11 }
  0x1e   : > { %525 = vadd.xlane.f32.xlu0 %v524_v14  ;;  %528 = vadd.xlane.f32.xlu1 %v527_v15 }
  0x9b   : > { %v508_v16 = vpop.xlane.xlu0 %507  ;;  %v514_v17 = vpop.xlane.xlu1 %513 }
  0x9c   : > { %v531_v18 = vmul.f32 0.03125, %v508_v16  ;;  %v533_v19 = vmul.f32 0.03125, %v514_v17 }
  0x9e   : > { %v4194_v20 = vsub.f32 %v495_v0, %v531_v18  ;;  %v4196_v21 = vsub.f32 %v497_v1, %v533_v19 }
  0x9f   : > { %v511_v22 = vpop.xlane.xlu0 %510  ;;  %v517_v23 = vpop.xlane.xlu1 %516 }
  0xa0   : > { %v532_v24 = vmul.f32 0.03125, %v511_v22  ;;  %v534_v25 = vmul.f32 0.03125, %v517_v23  ;;  %v547_v26 = vmul.f32 %v4194_v20, %v4194_v20  ;;  %v549_v27 = vmul.f32 %v4196_v21, %v4196_v21  ;;  %v3441_v22 = vld [vmem:[%s5673_s1] ss:$0 sm:$0xff] }
  0xa2   : > { %v4202_v28 = vsub.f32 %v496_v2, %v532_v24  ;;  %v4204_v29 = vsub.f32 %v498_v5, %v534_v25  ;;  %v555_v30 = vsel %vm5701_vm0, %v547_v26, 0.0  ;;  %v561_v33 = vsel %vm5701_vm0, %v549_v27, 0.0  ;;  %v3442_v25 = vld [vmem:[%s5674_s2] ss:$0 sm:$0xff] }
  0xa3   : > { %556 = vadd.xlane.f32.xlu0 %v555_v30  ;;  %v520_v31 = vpop.xlane.xlu0 %519  ;;  %v523_v32 = vpop.xlane.xlu1 %522 }
  0xa4   : > { %v535_v34 = vmul.f32 0.03125, %v520_v31  ;;  %v536_v35 = vmul.f32 0.03125, %v523_v32  ;;  %v548_v36 = vmul.f32 %v4202_v28, %v4202_v28  ;;  %v550_v37 = vmul.f32 %v4204_v29, %v4204_v29 }
  0xa6   : > { %v4212_v38 = vsub.f32 %v499_v8, %v535_v34  ;;  %v4214_v39 = vsub.f32 %v500_v9, %v536_v35  ;;  %v558_v40 = vsel %vm5701_vm0, %v548_v36, 0.0  ;;  %v564_v43 = vsel %vm5701_vm0, %v550_v37, 0.0 }
  0xa7   : > { %562 = vadd.xlane.f32.xlu0 %v561_v33  ;;  %559 = vadd.xlane.f32.xlu1 %v558_v40  ;;  %v526_v41 = vpop.xlane.xlu0 %525  ;;  %v529_v42 = vpop.xlane.xlu1 %528 }
  0xa8   : > { %v537_v44 = vmul.f32 0.03125, %v526_v41  ;;  %v538_v45 = vmul.f32 0.03125, %v529_v42  ;;  %v551_v46 = vmul.f32 %v4212_v38, %v4212_v38  ;;  %v552_v47 = vmul.f32 %v4214_v39, %v4214_v39 }
  0xaa   : > { %v4222_v48 = vsub.f32 %v501_v12, %v537_v44  ;;  %v4224_v49 = vsub.f32 %v502_v13, %v538_v45  ;;  %v567_v50 = vsel %vm5701_vm0, %v551_v46, 0.0  ;;  %v570_v51 = vsel %vm5701_vm0, %v552_v47, 0.0 }
  0xab   : > { %565 = vadd.xlane.f32.xlu1 %v564_v43  ;;  %568 = vadd.xlane.f32.xlu0 %v567_v50 }
  0xac   : > { %v553_v52 = vmul.f32 %v4222_v48, %v4222_v48  ;;  %v554_v53 = vmul.f32 %v4224_v49, %v4224_v49 }
  0xae   : > { %v573_v54 = vsel %vm5701_vm0, %v553_v52, 0.0  ;;  %v576_v55 = vsel %vm5701_vm0, %v554_v53, 0.0 }
  0xaf   : > { %571 = vadd.xlane.f32.xlu1 %v570_v51  ;;  %574 = vadd.xlane.f32.xlu0 %v573_v54 }
  0xb3   : > { %577 = vadd.xlane.f32.xlu1 %v576_v55 }
 0x12c   : > { %v557_v60 = vpop.xlane.xlu0 %556 }
 0x12d   : > { %v579_v61 = vmul.f32 0.03125, %v557_v60 }
 0x12f   : > { %v587_v62 = vadd.f32 1e-05, %v579_v61 }
 0x130   : > { %v560_v63 = vpop.xlane.xlu1 %559  ;;  %v563_v0 = vpop.xlane.xlu0 %562 }
 0x131   : > { %3927 = vrsqrt.f32 %v587_v62  ;;  %v580_v1 = vmul.f32 0.03125, %v560_v63  ;;  %v581_v2 = vmul.f32 0.03125, %v563_v0 }
 0x133   : > { %v588_v3 = vadd.f32 1e-05, %v580_v1  ;;  %v589_v4 = vadd.f32 1e-05, %v581_v2 }
 0x134   : > { %v566_v5 = vpop.xlane.xlu1 %565  ;;  %v569_v6 = vpop.xlane.xlu0 %568 }
 0x135   : > { %3929 = vrsqrt.f32 %v588_v3  ;;  %v582_v7 = vmul.f32 0.03125, %v566_v5  ;;  %v583_v8 = vmul.f32 0.03125, %v569_v6 }
 0x136   : > { %3931 = vrsqrt.f32 %v589_v4 }
 0x137   : > { %v590_v9 = vadd.f32 1e-05, %v582_v7  ;;  %v591_v10 = vadd.f32 1e-05, %v583_v8 }
 0x138   : > { %v572_v11 = vpop.xlane.xlu1 %571  ;;  %v575_v12 = vpop.xlane.xlu0 %574 }
 0x139   : > { %3933 = vrsqrt.f32 %v590_v9  ;;  %v584_v13 = vmul.f32 0.03125, %v572_v11  ;;  %v585_v14 = vmul.f32 0.03125, %v575_v12 }
 0x13a   : > { %3935 = vrsqrt.f32 %v591_v10 }
 0x13b   : > { %v592_v15 = vadd.f32 1e-05, %v584_v13  ;;  %v593_v16 = vadd.f32 1e-05, %v585_v14 }
 0x13c   : > { %v578_v17 = vpop.xlane.xlu1 %577 }
 0x13d   : > { %3937 = vrsqrt.f32 %v592_v15  ;;  %v586_v18 = vmul.f32 0.03125, %v578_v17 }
 0x13e   : > { %v3928_v19 = vpop.eup %3927  ;;  %3939 = vrsqrt.f32 %v593_v16 }
 0x13f   : > { %v594_v23 = vadd.f32 1e-05, %v586_v18  ;;  %v603_v24 = vmul.f32 %v3928_v19, %v4194_v20 }
 0x141   : > { %3941 = vrsqrt.f32 %v594_v23  ;;  %v617_v26 = vmul.f32 %v3441_v22, %v603_v24 }
 0x142   : > { %v3930_v27 = vpop.eup %3929 }
 0x143   : > { %v3932_v30 = vpop.eup %3931  ;;  %v631_v31 = vadd.f32 %v3442_v25, %v617_v26  ;;  %v604_v32 = vmul.f32 %v3930_v27, %v4202_v28  ;;  %v4074_v26 = vmov 2  }
 0x144   : > { %v605_v33 = vmul.f32 %v3932_v30, %v4196_v21 }
 0x145   : > { %3649 = vmatprep.mubr.msk.f32.mxu0 %vm5701_vm0, %v631_v31  ;;  %v618_v34 = vmul.f32 %v3441_v22, %v604_v32 }
 0x146   : > { %v3934_v35 = vpop.eup %3933  ;;  %v619_v36 = vmul.f32 %v3441_v22, %v605_v33 }
 0x147   : > { %v3936_v37 = vpop.eup %3935  ;;  %v632_v20 = vadd.f32 %v3442_v25, %v618_v34  ;;  %v606_v40 = vmul.f32 %v3934_v35, %v4204_v29 }
 0x148   : > { %v633_v41 = vadd.f32 %v3442_v25, %v619_v36  ;;  %v607_v42 = vmul.f32 %v3936_v37, %v4212_v38 }
 0x149   : > { %3650 = vmatmul.mubr.msk.f32.vlgmr.msra.gmra.mxu0 %vm5701_vm0, %v632_v20  ;;  %v620_v43 = vmul.f32 %v3441_v22, %v606_v40 }
 0x14a   : > { %v3938_v44 = vpop.eup %3937  ;;  %3652 = vmatprep.mubr.msk.f32.mxu0 %vm5701_vm0, %v633_v41  ;;  %v621_v28 = vmul.f32 %v3441_v22, %v607_v42 }
 0x14b   : > { %v3940_v21 = vpop.eup %3939  ;;  %v634_v45 = vadd.f32 %v3442_v25, %v620_v43  ;;  %v608_v46 = vmul.f32 %v3938_v44, %v4214_v39 }
 0x14c   : > { %v635_v47 = vadd.f32 %v3442_v25, %v621_v28  ;;  %v609_v50 = vmul.f32 %v3940_v21, %v4222_v48  ;;  %v4071_v48 = vmov 0   ;;  %v4075_v28 = vmov 3  }
 0x14d   : > { %3653 = vmatmul.mubr.msk.f32.gmra.mxu0 %vm5701_vm0, %v634_v45  ;;  %v622_v29 = vmul.f32 %v3441_v22, %v608_v46  ;;  %3889 = vset.pattern.permute.xlu1 %v4071_v48 }
 0x14e   : > { %v3942_v51 = vpop.eup %3941  ;;  %3655 = vmatprep.mubr.msk.f32.mxu0 %vm5701_vm0, %v635_v47  ;;  %v623_v38 = vmul.f32 %v3441_v22, %v609_v50 }
 0x14f   : > { %v636_v52 = vadd.f32 %v3442_v25, %v622_v29  ;;  %v610_v53 = vmul.f32 %v3942_v51, %v4224_v49  ;;  %v3451_v49 = vld [vmem:[%s5676_s4] ss:$0 sm:$0xff] }
 0x150   : > { %v637_v54 = vadd.f32 %v3442_v25, %v623_v38 }
 0x151   : > { %3656 = vmatmul.mubr.msk.f32.gmra.mxu0 %vm5701_vm0, %v636_v52  ;;  %v624_v55 = vmul.f32 %v3441_v22, %v610_v53 }
 0x152   : > { %3658 = vmatprep.mubr.msk.f32.mxu0 %vm5701_vm0, %v637_v54 }
 0x153   : > { %v638_v39 = vadd.f32 %v3442_v25, %v624_v55 }
 0x155   : > { %3659 = vmatmul.mubr.msk.f32.gmra.mxu0 %vm5701_vm0, %v638_v39 }
 0x209   : > { %v4270_v57 = vpop.f32.mrf.mxu0 }
 0x20a   : > { %797 = vrot.lane.b32.xlu1 %v4270_v57, %s4073_s27  ;;  %v4280_v59 = vmul.f32 %v4270_v57, %v3451_v49  ;;  %v877_v2 = vsel %vm851_vm1, %v4270_v57, inf  ;;  %v853_v40 = vsel %vm851_vm1, %v4270_v57, -inf }
 0x20b   : > { %v4277_v58 = vpop.f32.mrf.mxu0 }
 0x20c   : > { %795 = vrot.lane.b32.xlu0 %v4277_v58, %s4073_s27  ;;  %v4292_v0 = vmul.f32 %v3451_v49, %v4277_v58  ;;  %v876_v3 = vsel %vm851_vm1, %v4277_v58, inf  ;;  %v852_v34 = vsel %vm851_vm1, %v4277_v58, -inf }
 0x20d   : > { %v4284_v60 = vpop.f32.mrf.mxu0 }
 0x20e   : > { %946 = vperm.xlu1 %3889, %v4280_v59   ;;  %v4305_v9 = vmul.f32 %v4284_v60, %v3451_v49  ;;  %v879_v12 = vsel %vm851_vm1, %v4284_v60, inf  ;;  %v855_v35 = vsel %vm851_vm1, %v4284_v60, -inf }
 0x20f   : > { %v743_v61 = vpop.f32.mrf.mxu0 }
 0x210   : > { %1186 = vperm.xlu0 %3890, %v4280_v59   ;;  %v878_v13 = vsel %vm851_vm1, %v743_v61, inf  ;;  %v4313_v18 = vmul.f32 %v3451_v49, %v743_v61  ;;  %v854_v30 = vsel %vm851_vm1, %v743_v61, -inf }
 0x211   : > { %v3657_v62 = vpop.f32.mrf.mxu0 }
 0x212   : > { %v882_v63 = vsel %vm851_vm1, %v3657_v62, inf  ;;  %801 = vrot.lane.b32.xlu1 %v4284_v60, %s4073_s27  ;;  %v4322_v22 = vmul.f32 %v3657_v62, %v3451_v49  ;;  %v858_v36 = vsel %vm851_vm1, %v3657_v62, -inf }
 0x213   : > { %v753_v1 = vpop.f32.mrf.mxu0  ;;  %3892 = vset.pattern.permute.xlu1 %v4072_v56  ;;  %v883_v7 = vmin.f32 %v877_v2, %v882_v63  ;;  %v859_v41 = vmax.f32 %v853_v40, %v858_v36  ;;  %v900_v36 = vlaneseq }
 0x214   : > { %v880_v4 = vsel %vm851_vm1, %v753_v1, inf  ;;  %3891 = vset.pattern.permute.xlu0 %v4071_v48  ;;  %v4328_v23 = vmul.f32 %v3451_v49, %v753_v1  ;;  %v856_v31 = vsel %vm851_vm1, %v753_v1, -inf }
 0x215   : > { %941 = vperm.xlu0 %3891, %v4292_v0   ;;  %v3660_v5 = vpop.f32.mrf.mxu0  ;;  %v881_v6 = vmin.f32 %v876_v3, %v880_v4  ;;  %v857_v37 = vmax.f32 %v852_v34, %v856_v31 }
 0x216   : > { %v886_v8 = vsel %vm851_vm1, %v3660_v5, inf  ;;  %1182 = vperm.xlu1 %3892, %v4292_v0   ;;  %v4330_v24 = vmul.f32 %v3660_v5, %v3451_v49  ;;  %v862_v32 = vsel %vm851_vm1, %v3660_v5, -inf }
 0x217   : > { %v763_v10 = vpop.f32.mrf.mxu0  ;;  %v888_v11 = vmin.f32 %v881_v6, %v883_v7  ;;  %v887_v16 = vmin.f32 %v879_v12, %v886_v8  ;;  %v863_v20 = vmax.f32 %v855_v35, %v862_v32  ;;  %v864_v43 = vmax.f32 %v857_v37, %v859_v41 }
 0x218   : > { %v884_v14 = vsel %vm851_vm1, %v763_v10, inf  ;;  %v4334_v25 = vmul.f32 %v3451_v49, %v763_v10  ;;  %v860_v27 = vsel %vm851_vm1, %v763_v10, -inf  ;;  %v4481_v37 = vshrl.u32 %v900_v36, 7 }
 0x219   : > { %956 = vperm.xlu0 %3891, %v4305_v9   ;;  %v885_v15 = vmin.f32 %v878_v13, %v884_v14  ;;  %v861_v33 = vmax.f32 %v854_v30, %v860_v27 }
 0x21a   : > { %799 = vrot.lane.b32.xlu1 %v743_v61, %s4073_s27  ;;  %v902_v40 = vsub.s32 0, %v4481_v37  ;;  %vm2696_vm8 = vcmp.lt.s32.totalorder %v4481_v37, 1  ;;  %vm5705_vm9 = vcmp.lt.s32.totalorder %v4481_v37, 7 }
 0x21b   : > { %v889_v17 = vmin.f32 %v885_v15, %v887_v16  ;;  %v865_v42 = vmax.f32 %v861_v33, %v863_v20 }
 0x21d   : > { %3894 = vset.pattern.permute.xlu0 %v4072_v56  ;;  %v890_v19 = vmin.f32 %v888_v11, %v889_v17  ;;  %v866_v44 = vmax.f32 %v864_v43, %v865_v42 }
 0x21e   : > { %1194 = vperm.xlu1 %3892, %v4305_v9   ;;  %1190 = vperm.xlu0 %3894, %v4313_v18  }
 0x222   : > { %805 = vrot.lane.b32.xlu1 %v3657_v62, %s4073_s27  ;;  %803 = vrot.lane.b32.xlu0 %v753_v1, %s4073_s27 }
 0x223   : > { %3893 = vset.pattern.permute.xlu1 %v4071_v48  ;;  %3895 = vset.pattern.permute.xlu0 %v4071_v48 }
 0x226   : > { %951 = vperm.xlu1 %3893, %v4313_v18   ;;  %966 = vperm.xlu0 %3895, %v4322_v22  }
 0x22a   : > { %809 = vrot.lane.b32.xlu1 %v3660_v5, %s4073_s27  ;;  %807 = vrot.lane.b32.xlu0 %v763_v10, %s4073_s27 }
 0x22e   : > { %961 = vperm.xlu1 %3893, %v4328_v23   ;;  %976 = vperm.xlu0 %3895, %v4330_v24  }
 0x232   : > { %971 = vperm.xlu1 %3893, %v4334_v25   ;;  %3896 = vset.pattern.permute.xlu0 %v4072_v56 }
 0x236   : > { %3897 = vset.pattern.permute.xlu1 %v4072_v56 }
 0x237   : > { %1202 = vperm.xlu1 %3897, %v4322_v22  }
 0x23b   : > { %1206 = vperm.xlu1 %3897, %v4334_v25  }
 0x23f   : > { %3898 = vset.pattern.permute.xlu1 %v4074_v26 }
 0x24d   : > { %867 = vmax.xlane.f32.xlu0 %v866_v44 }
 0x25f   : > { %891 = vmin.xlane.f32.xlu1 %v890_v19 }
 0x263   : > { %1198 = vperm.xlu0 %3896, %v4328_v23  }
 0x267   : > { %3909 = vset.pattern.permute.xlu0 %v4075_v28 }
 0x268   : > { %1648 = vperm.xlu0 %3909, %v4328_v23  }
 0x270   : > { %1407 = vperm.xlu1 %3898, %v4292_v0  }
 0x274   : > { %3899 = vset.pattern.permute.xlu1 %v4072_v56 }
 0x275   : > { %1210 = vperm.xlu1 %3899, %v4330_v24  }
 0x279   : > { %3900 = vset.pattern.permute.xlu1 %v4074_v26 }
 0x27a   : > { %1411 = vperm.xlu1 %3900, %v4280_v59  }
 0x27c   : > { %v4364_v21 = vpop.permute.xlu1 %797 }
 0x27d   : > { %v4447_v4 = vsel %vm904_vm2, 1.0, %v4364_v21 }
 0x27e   : > { %1415 = vperm.xlu1 %3900, %v4313_v18   ;;  %v4366_v45 = vpop.permute.xlu0 %795 }
 0x27f   : > { %v4455_v5 = vsel %vm904_vm2, 1.0, %v4366_v45 }
 0x282   : > { %3901 = vset.pattern.permute.xlu1 %v4075_v28 }
 0x283   : > { %1632 = vperm.xlu1 %3901, %v4292_v0  }
 0x286   : > { %819 = vxpose.xlu0.b32.start [1/8] (short) (narrow) %v4366_v45, 8 }
 0x287   : > { %3902 = vset.pattern.permute.xlu1 %v4074_v26 }
 0x288   : > { %1419 = vperm.xlu1 %3902, %v4305_v9  }
 0x289   : > { %v4371_v46 = vpop.permute.xlu1 %946 }
 0x28a   : > { %820 = vxpose.xlu0.b32.cont [2/8] (short) (narrow) %v4364_v21, 8 }
 0x28b   : > { %v4374_v47 = vpop.permute.xlu0 %1186 }
 0x28c   : > { %3903 = vset.pattern.permute.xlu1 %v4075_v28 }
 0x28d   : > { %v802_v50 = vpop.permute.xlu1 %801  ;;  %1636 = vperm.xlu1 %3903, %v4280_v59  }
 0x28e   : > { %v4432_v2 = vsel %vm904_vm2, 1.0, %v802_v50 }
 0x290   : > { %v4378_v29 = vpop.permute.xlu0 %941 }
 0x291   : > { %v4380_v51 = vpop.permute.xlu1 %1182  ;;  %3904 = vset.pattern.permute.xlu1 %v4074_v26 }
 0x292   : > { %1423 = vperm.xlu1 %3904, %v4328_v23  }
 0x294   : > { %v4384_v38 = vpop.permute.xlu0 %956 }
 0x295   : > { %v800_v52 = vpop.permute.xlu1 %799 }
 0x296   : > { %3905 = vset.pattern.permute.xlu1 %v4075_v28  ;;  %821 = vxpose.xlu0.b32.cont [3/8] (short) (narrow) %v800_v52, 8  ;;  %v4439_v3 = vsel %vm904_vm2, 1.0, %v800_v52 }
 0x297   : > { %1640 = vperm.xlu1 %3905, %v4313_v18  }
 0x299   : > { %v4388_v53 = vpop.permute.xlu1 %1194  ;;  %v4390_v54 = vpop.permute.xlu0 %1190 }
 0x29a   : > { %822 = vxpose.xlu0.b32.cont [4/8] (short) (narrow) %v802_v50, 8 }
 0x29b   : > { %3906 = vset.pattern.permute.xlu1 %v4074_v26 }
 0x29c   : > { %1427 = vperm.xlu1 %3906, %v4322_v22  }
 0x29d   : > { %v806_v55 = vpop.permute.xlu1 %805  ;;  %v804_v39 = vpop.permute.xlu0 %803 }
 0x29e   : > { %823 = vxpose.xlu0.b32.cont [5/8] (short) (narrow) %v804_v39, 8  ;;  %v4417_v63 = vsel %vm904_vm2, 1.0, %v806_v55  ;;  %v4423_v1 = vsel %vm904_vm2, 1.0, %v804_v39 }
 0x2a0   : > { %3907 = vset.pattern.permute.xlu1 %v4075_v28 }
 0x2a1   : > { %v4395_v57 = vpop.permute.xlu1 %951  ;;  %1644 = vperm.xlu1 %3907, %v4305_v9   ;;  %v4398_v49 = vpop.permute.xlu0 %966 }
 0x2a2   : > { %824 = vxpose.xlu0.b32.cont [6/8] (short) (narrow) %v806_v55, 8 }
 0x2a5   : > { %v810_v58 = vpop.permute.xlu1 %809  ;;  %3908 = vset.pattern.permute.xlu1 %v4074_v26  ;;  %v808_v60 = vpop.permute.xlu0 %807 }
 0x2a6   : > { %v4402_v61 = vsel %vm904_vm2, 1.0, %v810_v58  ;;  %1431 = vperm.xlu1 %3908, %v4334_v25   ;;  %825 = vxpose.xlu0.b32.cont [7/8] (short) (narrow) %v808_v60, 8  ;;  %v4408_v62 = vsel %vm904_vm2, 1.0, %v808_v60 }
 0x2a7   : > { %3661 = vmatprep.subr.mxu0 %v4402_v61  ;;  %3717 = vmatprep.subr.mxu1 %v4402_v61 }
 0x2a8   : > { %3662 = vmatpush3.msra.mxu0 %v4402_v61  ;;  %3718 = vmatpush3.msra.mxu1 %v4402_v61 }
 0x2a9   : > { %3663 = vmatprep.subr.mxu0 %v4408_v62  ;;  %3719 = vmatprep.subr.mxu1 %v4408_v62  ;;  %v4468_v6 = vpop.permute.xlu1 %961  ;;  %v4470_v7 = vpop.permute.xlu0 %976 }
 0x2aa   : > { %1435 = vperm.xlu1 %3908, %v4330_v24   ;;  %3664 = vmatpush3.msra.mxu0 %v4408_v62 }
 0x2ab   : > { %3720 = vmatpush3.msra.mxu1 %v4408_v62  ;;  %826 = vxpose.xlu0.b32.end [8/8] (short) (narrow) %v810_v58, 8 }
 0x2ac   : > { %3665 = vmatprep.subr.mxu0 %v4417_v63  ;;  %3721 = vmatprep.subr.mxu1 %v4417_v63 }
 0x2ad   : > { %3666 = vmatpush3.msra.mxu0 %v4417_v63  ;;  %3722 = vmatpush3.msra.mxu1 %v4417_v63  ;;  %v4473_v11 = vpop.permute.xlu1 %971 }
 0x2ae   : > { %3667 = vmatprep.subr.mxu0 %v4423_v1  ;;  %3723 = vmatprep.subr.mxu1 %v4423_v1 }
 0x2af   : > { %3910 = vset.pattern.permute.xlu1 %v4075_v28  ;;  %3668 = vmatpush3.msra.mxu0 %v4423_v1 }
 0x2b0   : > { %3724 = vmatpush3.msra.mxu1 %v4423_v1  ;;  %1652 = vperm.xlu1 %3910, %v4322_v22  }
 0x2b1   : > { %3669 = vmatprep.subr.mxu0 %v4432_v2  ;;  %3725 = vmatprep.subr.mxu1 %v4432_v2 }
 0x2b2   : > { %3670 = vmatpush3.msra.mxu0 %v4432_v2  ;;  %3726 = vmatpush3.msra.mxu1 %v4432_v2  ;;  %v4475_v15 = vpop.permute.xlu1 %1202 }
 0x2b3   : > { %3671 = vmatprep.subr.mxu0 %v4439_v3  ;;  %3727 = vmatprep.subr.mxu1 %v4439_v3 }
 0x2b4   : > { %3672 = vmatpush3.msra.mxu0 %v4439_v3  ;;  %3728 = vmatpush3.msra.mxu1 %v4439_v3 }
 0x2b5   : > { %1656 = vperm.xlu1 %3910, %v4334_v25   ;;  %3673 = vmatprep.subr.mxu0 %v4447_v4 }
 0x2b6   : > { %3729 = vmatprep.subr.mxu1 %v4447_v4  ;;  %3674 = vmatpush3.msra.mxu0 %v4447_v4  ;;  %v4477_v19 = vpop.permute.xlu1 %1206 }
 0x2b7   : > { %3730 = vmatpush3.msra.mxu1 %v4447_v4  ;;  %3675 = vmatprep.subr.mxu0 %v4455_v5 }
 0x2b8   : > { %3731 = vmatprep.subr.mxu1 %v4455_v5  ;;  %3676 = vmatpush3.msra.mxu0 %v4455_v5 }
 0x2b9   : > { %3732 = vmatpush3.msra.mxu1 %v4455_v5  ;;  %1660 = vperm.xlu1 %3910, %v4330_v24  }
 0x2ba   : > { %3689 = vmatprep.subr.mxu0 %v4402_v61  ;;  %3851 = vmatprep.subr.mxu1 %v4402_v61 }
 0x2bd   : > { %3911 = vset.pattern.permute.xlu1 %v4071_v48 }
 0x2d4   : > { %3912 = vset.pattern.permute.xlu0 %v4071_v48 }
 0x2d6   : > { %v868_v8 = vpop.xlane.xlu0 %867 }
 0x2d7   : > { %v869_v10 = vrot.slane %v868_v8, 4 }
 0x2d9   : > { %v870_v12 = vmax.f32 %v868_v8, %v869_v10 }
 0x2db   : > { %v871_v13 = vrot.slane %v870_v12, 2 }
 0x2dd   : > { %v872_v14 = vmax.f32 %v870_v12, %v871_v13 }
 0x2de   : > { %v4479_v35 = vpop.permute.xlu0 %1198 }
 0x2df   : > { %v873_v16 = vrot.slane %v872_v14, 1 }
 0x2e1   : > { %v874_v17 = vmax.f32 %v872_v14, %v873_v16 }
 0x2e3   : > { %3867 = vpush %v874_v17  ;;  %v1649_v20 = vpop.permute.xlu0 %1648 }
 0x2e8   : > { %v892_v27 = vpop.xlane.xlu1 %891 }
 0x2e9   : > { %v893_v30 = vrot.slane %v892_v27, 4 }
 0x2eb   : > { %v894_v31 = vmin.f32 %v892_v27, %v893_v30 }
 0x2ed   : > { %v895_v32 = vrot.slane %v894_v31, 2 }
 0x2ef   : > { %v896_v33 = vmin.f32 %v894_v31, %v895_v32 }
 0x2f1   : > { %v897_v48 = vrot.slane %v896_v33, 1 }
 0x2f3   : > { %v898_v34 = vmin.f32 %v896_v33, %v897_v48 }
 0x2f5   : > { %3869 = vpush %v898_v34 }
 0x30b   : > { %v835_v41 = vpop.trf.xlu0 }
 0x30c   : > { %v4484_v42 = vrot.slane %v835_v41, %v902_v40 }
 0x30e   : > { %v4487_v43 = vmul.f32 %v1649_v20, %v4484_v42 }
 0x314   : > { %s3868_s28 = spop %3867 }
 0x315   : > { %v913_v44 = vstv %s3868_s28 }
 0x316   : > { %v915_v45 = vmul.f32 %v913_v44, %v4280_v59  ;;  %v914_v52 = vmul.f32 %v913_v44, %v4292_v0  ;;  %v917_v10 = vmul.f32 %v913_v44, %v4305_v9  ;;  %v916_v12 = vmul.f32 %v913_v44, %v4313_v18 }
 0x317   : > { %v918_v17 = vmul.f32 %v913_v44, %v4328_v23  ;;  %v920_v32 = vmul.f32 %v913_v44, %v4334_v25 }
 0x326   : > { %s3870_s29 = spop %3869 }
 0x327   : > { %v922_v21 = vstv %s3870_s29 }
 0x328   : > { %v924_v50 = vmul.f32 %v922_v21, %v4280_v59  ;;  %v923_v55 = vmul.f32 %v922_v21, %v4292_v0  ;;  %v926_v60 = vmul.f32 %v922_v21, %v4305_v9  ;;  %v925_v8 = vmul.f32 %v922_v21, %v4313_v18 }
 0x329   : > { %v928_v59 = vmul.f32 %v922_v21, %v4322_v22  ;;  %v927_v16 = vmul.f32 %v922_v21, %v4328_v23  ;;  %v919_v0 = vmul.f32 %v913_v44, %v4322_v22  ;;  %v930_v31 = vmul.f32 %v922_v21, %v4330_v24  ;;  %v4508_v22 = vpop.permute.xlu1 %1407 }
 0x32a   : > { %v932_v39 = vmax.f32 %v915_v45, %v924_v50  ;;  %v931_v58 = vmax.f32 %v914_v52, %v923_v55  ;;  %v934_v13 = vmax.f32 %v917_v10, %v926_v60  ;;  %v933_v14 = vmax.f32 %v916_v12, %v925_v8 }
 0x32b   : > { %v936_v27 = vmax.f32 %v919_v0, %v928_v59  ;;  %v935_v30 = vmax.f32 %v918_v17, %v927_v16  ;;  %v929_v9 = vmul.f32 %v922_v21, %v4334_v25  ;;  %v921_v18 = vmul.f32 %v913_v44, %v4330_v24 }
 0x32c   : > { %994 = vperm.xlu0 %3912, %v932_v39   ;;  %989 = vperm.xlu1 %3911, %v931_v58   ;;  %v981_v10 = vmul.f32 %v4395_v57, %v4484_v42  ;;  %v982_v12 = vmul.f32 %v4384_v38, %v4484_v42  ;;  %v984_v17 = vmul.f32 %v4398_v49, %v4484_v42 }
 0x32d   : > { %v938_v33 = vmax.f32 %v921_v18, %v930_v31  ;;  %v937_v48 = vmax.f32 %v920_v32, %v929_v9  ;;  %v4511_v23 = vpop.permute.xlu1 %1210  ;;  %v985_v18 = vmul.f32 %v4473_v11, %v4484_v42  ;;  %v986_v32 = vmul.f32 %v4470_v7, %v4484_v42 }
 0x32e   : > { %v1215_v11 = vmul.f32 %v4390_v54, %v4484_v42 }
 0x330   : > { %1004 = vperm.xlu0 %3912, %v934_v13   ;;  %999 = vperm.xlu1 %3911, %v933_v14  }
 0x331   : > { %v4514_v24 = vpop.permute.xlu1 %1411 }
 0x334   : > { %1014 = vperm.xlu0 %3912, %v936_v27   ;;  %1009 = vperm.xlu1 %3911, %v935_v30  }
 0x335   : > { %v4517_v25 = vpop.permute.xlu1 %1415 }
 0x338   : > { %1024 = vperm.xlu0 %3912, %v938_v33   ;;  %1019 = vperm.xlu1 %3911, %v937_v48  }
 0x339   : > { %v4520_v34 = vpop.permute.xlu1 %1632 }
 0x33c   : > { %3914 = vset.pattern.permute.xlu0 %v4072_v56  ;;  %3913 = vset.pattern.permute.xlu1 %v4072_v56 }
 0x33d   : > { %1230 = vperm.xlu0 %3914, %v933_v14   ;;  %1222 = vperm.xlu1 %3913, %v931_v58   ;;  %v4523_v36 = vpop.permute.xlu1 %1419 }
 0x341   : > { %1238 = vperm.xlu0 %3914, %v935_v30   ;;  %1226 = vperm.xlu1 %3913, %v932_v39   ;;  %v4525_v20 = vpop.permute.xlu1 %1636 }
 0x345   : > { %3919 = vset.pattern.permute.xlu0 %v4074_v26  ;;  %1234 = vperm.xlu1 %3913, %v934_v13  }
 0x346   : > { %1459 = vperm.xlu0 %3919, %v934_v13  }
 0x349   : > { %1242 = vperm.xlu1 %3913, %v936_v27  }
 0x34a   : > { %1471 = vperm.xlu0 %3919, %v937_v48  }
 0x34d   : > { %1246 = vperm.xlu1 %3913, %v937_v48  }
 0x34e   : > { %3925 = vset.pattern.permute.xlu0 %v4075_v28 }
 0x34f   : > { %1692 = vperm.xlu0 %3925, %v936_v27  }
 0x351   : > { %3915 = vset.pattern.permute.xlu1 %v4074_v26 }
 0x352   : > { %1447 = vperm.xlu1 %3915, %v931_v58  }
 0x353   : > { %1696 = vperm.xlu0 %3925, %v937_v48  }
 0x356   : > { %3916 = vset.pattern.permute.xlu1 %v4072_v56  ;;  %v4529_v56 = vpop.permute.xlu1 %1423 }
 0x357   : > { %1250 = vperm.xlu1 %3916, %v938_v33  }
 0x35a   : > { %v4532_v40 = vpop.permute.xlu1 %1640 }
 0x35b   : > { %3917 = vset.pattern.permute.xlu1 %v4074_v26 }
 0x35c   : > { %1451 = vperm.xlu1 %3917, %v932_v39  }
 0x35e   : > { %v4535_v41 = vpop.permute.xlu1 %1427 }
 0x360   : > { %1455 = vperm.xlu1 %3917, %v933_v14  }
 0x362   : > { %v4537_v44 = vpop.permute.xlu1 %1644 }
 0x364   : > { %3918 = vset.pattern.permute.xlu1 %v4075_v28 }
 0x365   : > { %1672 = vperm.xlu1 %3918, %v931_v58  }
 0x366   : > { %v4541_v21 = vpop.permute.xlu1 %1431 }
 0x369   : > { %1676 = vperm.xlu1 %3918, %v932_v39   ;;  %v979_v39 = vmul.f32 %v4378_v29, %v4484_v42 }
 0x36a   : > { %v4543_v45 = vpop.permute.xlu1 %1435 }
 0x36d   : > { %3920 = vset.pattern.permute.xlu1 %v4074_v26 }
 0x36e   : > { %1463 = vperm.xlu1 %3920, %v935_v30   ;;  %v4545_v50 = vpop.permute.xlu1 %1652 }
 0x372   : > { %3921 = vset.pattern.permute.xlu1 %v4075_v28  ;;  %v4547_v52 = vpop.permute.xlu1 %1656 }
 0x373   : > { %1680 = vperm.xlu1 %3921, %v933_v14  }
 0x376   : > { %v4549_v55 = vpop.permute.xlu1 %1660 }
 0x377   : > { %3922 = vset.pattern.permute.xlu1 %v4074_v26 }
 0x378   : > { %1467 = vperm.xlu1 %3922, %v936_v27  }
 0x37c   : > { %3923 = vset.pattern.permute.xlu1 %v4075_v28 }
 0x37d   : > { %1684 = vperm.xlu1 %3923, %v934_v13  }
 0x381   : > { %1688 = vperm.xlu1 %3923, %v935_v30  }
 0x385   : > { %3924 = vset.pattern.permute.xlu1 %v4074_v26  ;;  %v980_v26 = vmul.f32 %v4371_v46, %v4484_v42  ;;  %v983_v46 = vmul.f32 %v4468_v6, %v4484_v42 }
 0x386   : > { %1475 = vperm.xlu1 %3924, %v938_v33  }
 0x38a   : > { %3926 = vset.pattern.permute.xlu1 %v4075_v28 }
 0x38b   : > { %1700 = vperm.xlu1 %3926, %v938_v33  }
 0x3a7   : > { %v990_v58 = vpop.permute.xlu1 %989  ;;  %v995_v60 = vpop.permute.xlu0 %994 }
 0x3a8   : > { %v1027_v28 = vsub.f32 %v979_v39, %v990_v58  ;;  %v1028_v8 = vsub.f32 %v980_v26, %v995_v60 }
 0x3aa   : > { %v1035_v13 = vmul.f32 1.442695, %v1027_v28  ;;  %v1037_v14 = vmul.f32 1.442695, %v1028_v8  ;;  %v1213_v28 = vmul.f32 %v4380_v51, %v4484_v42  ;;  %v1217_v51 = vmul.f32 %v4479_v35, %v4484_v42 }
 0x3ab   : > { %v1000_v59 = vpop.permute.xlu1 %999  ;;  %v1005_v16 = vpop.permute.xlu0 %1004 }
 0x3ac   : > { %3943 = vpow2.f32 %v1035_v13  ;;  %v1029_v0 = vsub.f32 %v981_v10, %v1000_v59  ;;  %v1030_v29 = vsub.f32 %v982_v12, %v1005_v16  ;;  %v1214_v59 = vmul.f32 %v4374_v47, %v4484_v42 }
 0x3ad   : > { %3945 = vpow2.f32 %v1037_v14  ;;  %v1216_v47 = vmul.f32 %v4388_v53, %v4484_v42  ;;  %v1218_v53 = vmul.f32 %v4475_v15, %v4484_v42  ;;  %v1219_v15 = vmul.f32 %v4477_v19, %v4484_v42 }
 0x3ae   : > { %v1039_v27 = vmul.f32 1.442695, %v1029_v0  ;;  %v1041_v30 = vmul.f32 1.442695, %v1030_v29  ;;  %v1438_v19 = vmul.f32 %v4508_v22, %v4484_v42 }
 0x3af   : > { %v1010_v57 = vpop.permute.xlu1 %1009  ;;  %v1015_v31 = vpop.permute.xlu0 %1014 }
 0x3b0   : > { %3947 = vpow2.f32 %v1039_v27  ;;  %v1031_v38 = vsub.f32 %v983_v46, %v1010_v57  ;;  %v1032_v9 = vsub.f32 %v984_v17, %v1015_v31 }
 0x3b1   : > { %3949 = vpow2.f32 %v1041_v30 }
 0x3b2   : > { %v1043_v33 = vmul.f32 1.442695, %v1031_v38  ;;  %v1045_v48 = vmul.f32 1.442695, %v1032_v9 }
 0x3b3   : > { %v1020_v6 = vpop.permute.xlu1 %1019  ;;  %v1025_v39 = vpop.permute.xlu0 %1024 }
 0x3b4   : > { %3951 = vpow2.f32 %v1043_v33  ;;  %v1033_v49 = vsub.f32 %v985_v18, %v1020_v6  ;;  %v1034_v26 = vsub.f32 %v986_v32, %v1025_v39 }
 0x3b5   : > { %3953 = vpow2.f32 %v1045_v48 }
 0x3b6   : > { %v1047_v58 = vmul.f32 1.442695, %v1033_v49  ;;  %v1049_v60 = vmul.f32 1.442695, %v1034_v26 }
 0x3b8   : > { %3955 = vpow2.f32 %v1047_v58  ;;  %v1223_v8 = vpop.permute.xlu1 %1222  ;;  %v1231_v7 = vpop.permute.xlu0 %1230 }
 0x3b9   : > { %v3944_v10 = vpop.eup %3943  ;;  %3957 = vpow2.f32 %v1049_v60  ;;  %v1253_v12 = vsub.f32 %v1213_v28, %v1223_v8  ;;  %v1255_v14 = vsub.f32 %v1215_v11, %v1231_v7 }
 0x3ba   : > { %v3946_v13 = vpop.eup %3945  ;;  %3677 = vmatprep.mubr.msk.f32.mxu0 %vm1051_vm3, %v3944_v10 }
 0x3bb   : > { %v1261_v16 = vmul.f32 1.442695, %v1253_v12  ;;  %3678 = vmatmul.mubr.msk.f32.vlgmr.msra.gmra.mxu0 %vm1051_vm3, %v3946_v13  ;;  %v1265_v27 = vmul.f32 1.442695, %v1255_v14  ;;  %v1220_v13 = vmul.f32 %v4511_v23, %v4484_v42 }
 0x3bc   : > { %3690 = vmatpush3.msra.mxu0 %v4402_v61  ;;  %v1227_v54 = vpop.permute.xlu1 %1226  ;;  %v1239_v0 = vpop.permute.xlu0 %1238 }
 0x3bd   : > { %v3948_v29 = vpop.eup %3947  ;;  %3959 = vpow2.f32 %v1261_v16  ;;  %v1254_v46 = vsub.f32 %v1214_v59, %v1227_v54  ;;  %3691 = vmatprep.subr.mxu0 %v4408_v62  ;;  %v1257_v30 = vsub.f32 %v1217_v51, %v1239_v0  ;;  %v1439_v54 = vmul.f32 %v4514_v24, %v4484_v42 }
 0x3be   : > { %v3950_v17 = vpop.eup %3949  ;;  %3692 = vmatpush3.msra.mxu0 %v4408_v62  ;;  %3680 = vmatprep.mubr.msk.f32.mxu0 %vm1051_vm3, %v3948_v29  ;;  %v1440_v24 = vmul.f32 %v4517_v25, %v4484_v42 }
 0x3bf   : > { %v1263_v35 = vmul.f32 1.442695, %v1254_v46  ;;  %3693 = vmatprep.subr.mxu0 %v4417_v63  ;;  %3681 = vmatmul.mubr.msk.f32.gmra.mxu0 %vm1051_vm3, %v3950_v17  ;;  %v1269_v18 = vmul.f32 1.442695, %v1257_v30  ;;  %v1441_v46 = vmul.f32 %v4523_v36, %v4484_v42 }
 0x3c0   : > { %3694 = vmatpush3.msra.mxu0 %v4417_v63  ;;  %v1235_v57 = vpop.permute.xlu1 %1234 }
 0x3c1   : > { %v3952_v31 = vpop.eup %3951  ;;  %3961 = vpow2.f32 %v1263_v35  ;;  %v1256_v38 = vsub.f32 %v1216_v47, %v1235_v57  ;;  %3695 = vmatprep.subr.mxu0 %v4423_v1  ;;  %v1460_v0 = vpop.permute.xlu0 %1459 }
 0x3c2   : > { %v3954_v9 = vpop.eup %3953  ;;  %3963 = vpow2.f32 %v1265_v27  ;;  %3696 = vmatpush3.msra.mxu0 %v4423_v1  ;;  %3683 = vmatprep.mubr.msk.f32.mxu0 %vm1051_vm3, %v3952_v31  ;;  %v1481_v30 = vsub.f32 %v1441_v46, %v1460_v0 }
 0x3c3   : > { %v1267_v32 = vmul.f32 1.442695, %v1256_v38  ;;  %3697 = vmatprep.subr.mxu0 %v4432_v2  ;;  %3684 = vmatmul.mubr.msk.f32.gmra.mxu0 %vm1051_vm3, %v3954_v9  ;;  %v1663_v38 = vmul.f32 %v4520_v34, %v4484_v42  ;;  %v1442_v34 = vmul.f32 %v4529_v56, %v4484_v42 }
 0x3c4   : > { %3698 = vmatpush3.msra.mxu0 %v4432_v2  ;;  %v1243_v33 = vpop.permute.xlu1 %1242  ;;  %v1492_v57 = vmul.f32 1.442695, %v1481_v30 }
 0x3c5   : > { %v3956_v48 = vpop.eup %3955  ;;  %3965 = vpow2.f32 %v1267_v32  ;;  %v1258_v6 = vsub.f32 %v1218_v53, %v1243_v33  ;;  %3699 = vmatprep.subr.mxu0 %v4439_v3  ;;  %v1664_v53 = vmul.f32 %v4525_v20, %v4484_v42 }
 0x3c6   : > { %v3958_v39 = vpop.eup %3957  ;;  %3967 = vpow2.f32 %v1269_v18  ;;  %3700 = vmatpush3.msra.mxu0 %v4439_v3  ;;  %3686 = vmatprep.mubr.msk.f32.mxu0 %vm1051_vm3, %v3956_v48 }
 0x3c7   : > { %v1271_v49 = vmul.f32 1.442695, %v1258_v6  ;;  %3701 = vmatprep.subr.mxu0 %v4447_v4  ;;  %3687 = vmatmul.mubr.msk.f32.gmra.mxu0 %vm1051_vm3, %v3958_v39 }
 0x3c8   : > { %3702 = vmatpush3.msra.mxu0 %v4447_v4  ;;  %v1247_v26 = vpop.permute.xlu1 %1246 }
 0x3c9   : > { %3969 = vpow2.f32 %v1271_v49  ;;  %v1259_v58 = vsub.f32 %v1219_v15, %v1247_v26  ;;  %3703 = vmatprep.subr.mxu0 %v4455_v5 }
 0x3ca   : > { %v3960_v60 = vpop.eup %3959  ;;  %3704 = vmatpush3.msra.mxu0 %v4455_v5 }
 0x3cb   : > { %v1273_v28 = vmul.f32 1.442695, %v1259_v58  ;;  %3745 = vmatprep.subr.mxu0 %v4402_v61  ;;  %3705 = vmatprep.mubr.msk.f32.mxu0 %vm1051_vm3, %v3960_v60  ;;  %v1665_v60 = vmul.f32 %v4532_v40, %v4484_v42 }
 0x3cd   : > { %3971 = vpow2.f32 %v1273_v28  ;;  %v1448_v11 = vpop.permute.xlu1 %1447  ;;  %v1472_v28 = vpop.permute.xlu0 %1471 }
 0x3ce   : > { %v3962_v8 = vpop.eup %3961  ;;  %v1478_v7 = vsub.f32 %v1438_v19, %v1448_v11 }
 0x3cf   : > { %v3964_v10 = vpop.eup %3963  ;;  %3706 = vmatmul.mubr.msk.f32.vlgmr.msra.gmra.mxu0 %vm1051_vm3, %v3962_v8 }
 0x3d0   : > { %v1486_v12 = vmul.f32 1.442695, %v1478_v7  ;;  %3746 = vmatpush3.msra.mxu0 %v4402_v61  ;;  %3708 = vmatprep.mubr.msk.f32.mxu0 %vm1051_vm3, %v3964_v10  ;;  %v1443_v7 = vmul.f32 %v4535_v41, %v4484_v42  ;;  %v1666_v41 = vmul.f32 %v4537_v44, %v4484_v42 }
 0x3d1   : > { %3747 = vmatprep.subr.mxu0 %v4408_v62 }
 0x3d2   : > { %v3966_v14 = vpop.eup %3965  ;;  %3973 = vpow2.f32 %v1486_v12  ;;  %3748 = vmatpush3.msra.mxu0 %v4408_v62  ;;  %v1251_v22 = vpop.permute.xlu1 %1250 }
 0x3d3   : > { %v3968_v59 = vpop.eup %3967  ;;  %v1260_v16 = vsub.f32 %v1220_v13, %v1251_v22  ;;  %3749 = vmatprep.subr.mxu0 %v4417_v63  ;;  %3709 = vmatmul.mubr.msk.f32.gmra.mxu0 %vm1051_vm3, %v3966_v14 }
 0x3d4   : > { %3750 = vmatpush3.msra.mxu0 %v4417_v63  ;;  %3711 = vmatprep.mubr.msk.f32.mxu0 %vm1051_vm3, %v3968_v59 }
 0x3d5   : > { %v1275_v51 = vmul.f32 1.442695, %v1260_v16  ;;  %3751 = vmatprep.subr.mxu0 %v4423_v1 }
 0x3d6   : > { %v3970_v23 = vpop.eup %3969  ;;  %3752 = vmatpush3.msra.mxu0 %v4423_v1 }
 0x3d7   : > { %3975 = vpow2.f32 %v1275_v51  ;;  %3753 = vmatprep.subr.mxu0 %v4432_v2  ;;  %v1452_v29 = vpop.permute.xlu1 %1451  ;;  %3712 = vmatmul.mubr.msk.f32.gmra.mxu0 %vm1051_vm3, %v3970_v23 }
 0x3d8   : > { %v1479_v17 = vsub.f32 %v1439_v54, %v1452_v29  ;;  %3754 = vmatpush3.msra.mxu0 %v4432_v2 }
 0x3d9   : > { %3755 = vmatprep.subr.mxu0 %v4439_v3 }
 0x3da   : > { %v3972_v27 = vpop.eup %3971  ;;  %v1488_v47 = vmul.f32 1.442695, %v1479_v17  ;;  %3756 = vmatpush3.msra.mxu0 %v4439_v3 }
 0x3db   : > { %3757 = vmatprep.subr.mxu0 %v4447_v4  ;;  %v1456_v35 = vpop.permute.xlu1 %1455  ;;  %3714 = vmatprep.mubr.msk.f32.mxu0 %vm1051_vm3, %v3972_v27 }
 0x3dc   : > { %3977 = vpow2.f32 %v1488_v47  ;;  %v1480_v36 = vsub.f32 %v1440_v24, %v1456_v35  ;;  %3758 = vmatpush3.msra.mxu0 %v4447_v4 }
 0x3dd   : > { %3759 = vmatprep.subr.mxu0 %v4455_v5 }
 0x3de   : > { %v1490_v31 = vmul.f32 1.442695, %v1480_v36  ;;  %3760 = vmatpush3.msra.mxu0 %v4455_v5 }
 0x3df   : > { %v3974_v25 = vpop.eup %3973 }
 0x3e0   : > { %3979 = vpow2.f32 %v1490_v31  ;;  %v1673_v9 = vpop.permute.xlu1 %1672  ;;  %3733 = vmatprep.mubr.msk.f32.mxu1 %vm1051_vm3, %v3974_v25 }
 0x3e1   : > { %v1703_v18 = vsub.f32 %v1663_v38, %v1673_v9  ;;  %3981 = vpow2.f32 %v1492_v57 }
 0x3e3   : > { %v1711_v32 = vmul.f32 1.442695, %v1703_v18 }
 0x3e4   : > { %v3976_v33 = vpop.eup %3975  ;;  %v1677_v48 = vpop.permute.xlu1 %1676 }
 0x3e5   : > { %3983 = vpow2.f32 %v1711_v32  ;;  %v1704_v6 = vsub.f32 %v1664_v53, %v1677_v48  ;;  %3715 = vmatmul.mubr.msk.f32.gmra.mxu0 %vm1051_vm3, %v3976_v33 }
 0x3e7   : > { %v1713_v39 = vmul.f32 1.442695, %v1704_v6 }
 0x3e9   : > { %v3978_v15 = vpop.eup %3977  ;;  %3985 = vpow2.f32 %v1713_v39  ;;  %v1464_v49 = vpop.permute.xlu1 %1463 }
 0x3ea   : > { %v1482_v26 = vsub.f32 %v1442_v34, %v1464_v49  ;;  %3734 = vmatmul.mubr.msk.f32.vlgmr.msra.gmra.mxu1 %vm1051_vm3, %v3978_v15 }
 0x3eb   : > { %3859 = vmatpush3.msra.mxu1 %v4402_v61  ;;  %v1444_v61 = vmul.f32 %v4541_v21, %v4484_v42 }
 0x3ec   : > { %v1494_v20 = vmul.f32 1.442695, %v1482_v26  ;;  %3852 = vmatprep.subr.mxu1 %v4408_v62 }
 0x3ed   : > { %v3980_v58 = vpop.eup %3979  ;;  %3860 = vmatpush3.msra.mxu1 %v4408_v62  ;;  %v1484_v40 = vsub.f32 %v1444_v61, %v1472_v28 }
 0x3ee   : > { %3987 = vpow2.f32 %v1494_v20  ;;  %3853 = vmatprep.subr.mxu1 %v4417_v63  ;;  %v1681_v56 = vpop.permute.xlu1 %1680  ;;  %3736 = vmatprep.mubr.msk.f32.mxu1 %vm1051_vm3, %v3980_v58  ;;  %v3982_v19 = vpop.eup %3981 }
 0x3ef   : > { %v1705_v11 = vsub.f32 %v1665_v60, %v1681_v56  ;;  %3861 = vmatpush3.msra.mxu1 %v4417_v63  ;;  %v1498_v10 = vmul.f32 1.442695, %v1484_v40 }
 0x3f0   : > { %3737 = vmatmul.mubr.msk.f32.gmra.mxu1 %vm1051_vm3, %v3982_v19  ;;  %3854 = vmatprep.subr.mxu1 %v4423_v1 }
 0x3f1   : > { %v1715_v62 = vmul.f32 1.442695, %v1705_v11  ;;  %3862 = vmatpush3.msra.mxu1 %v4423_v1  ;;  %v1693_v1 = vpop.permute.xlu0 %1692 }
 0x3f2   : > { %v3984_v8 = vpop.eup %3983  ;;  %3855 = vmatprep.subr.mxu1 %v4432_v2 }
 0x3f3   : > { %3989 = vpow2.f32 %v1715_v62  ;;  %3863 = vmatpush3.msra.mxu1 %v4432_v2  ;;  %v1468_v21 = vpop.permute.xlu1 %1467  ;;  %3761 = vmatprep.mubr.msk.f32.mxu0 %vm1051_vm3, %v3984_v8  ;;  %v1668_v2 = vmul.f32 %v4545_v50, %v4484_v42 }
 0x3f4   : > { %v1483_v63 = vsub.f32 %v1443_v7, %v1468_v21  ;;  %3856 = vmatprep.subr.mxu1 %v4439_v3 }
 0x3f5   : > { %3864 = vmatpush3.msra.mxu1 %v4439_v3  ;;  %v1708_v22 = vsub.f32 %v1668_v2, %v1693_v1  ;;  %v1697_v51 = vpop.permute.xlu0 %1696 }
 0x3f6   : > { %v3986_v12 = vpop.eup %3985  ;;  %v1496_v13 = vmul.f32 1.442695, %v1483_v63  ;;  %3857 = vmatprep.subr.mxu1 %v4447_v4 }
 0x3f7   : > { %3865 = vmatpush3.msra.mxu1 %v4447_v4  ;;  %3762 = vmatmul.mubr.msk.f32.vlgmr.msra.gmra.mxu0 %vm1051_vm3, %v3986_v12  ;;  %v1669_v4 = vmul.f32 %v4547_v52, %v4484_v42  ;;  %v1721_v23 = vmul.f32 1.442695, %v1708_v22  ;;  %v1670_v52 = vmul.f32 %v4549_v55, %v4484_v42 }
 0x3f8   : > { %3991 = vpow2.f32 %v1496_v13  ;;  %3858 = vmatprep.subr.mxu1 %v4455_v5  ;;  %v1685_v14 = vpop.permute.xlu1 %1684 }
 0x3f9   : > { %3993 = vpow2.f32 %v1498_v10  ;;  %v1706_v3 = vsub.f32 %v1666_v41, %v1685_v14  ;;  %3866 = vmatpush3.msra.mxu1 %v4455_v5  ;;  %v1709_v54 = vsub.f32 %v1669_v4, %v1697_v51  ;;  %v1445_v5 = vmul.f32 %v4543_v45, %v4484_v42  ;;  %v2098_v41 = vld [vmem:[%s5677_s5] sm:$0xf] }
 0x3fa   : > { %3773 = vmatprep.subr.msk.mxu1 %vm2124_vm4, %v2098_v41 }
 0x3fb   : > { %v3988_v59 = vpop.eup %3987  ;;  %v1717_v16 = vmul.f32 1.442695, %v1706_v3  ;;  %v1723_v27 = vmul.f32 1.442695, %v1709_v54 }
 0x3fc   : > { %v1689_v44 = vpop.permute.xlu1 %1688  ;;  %3739 = vmatprep.mubr.msk.f32.mxu1 %vm1051_vm3, %v3988_v59 }
 0x3fd   : > { %3995 = vpow2.f32 %v1717_v16  ;;  %v1707_v50 = vsub.f32 %v4487_v43, %v1689_v44 }
 0x3ff   : > { %v1719_v0 = vmul.f32 1.442695, %v1707_v50 }
 0x400   : > { %v3990_v29 = vpop.eup %3989 }
 0x401   : > { %3997 = vpow2.f32 %v1719_v0  ;;  %v1476_v46 = vpop.permute.xlu1 %1475  ;;  %3764 = vmatprep.mubr.msk.f32.mxu0 %vm1051_vm3, %v3990_v29 }
 0x402   : > { %3999 = vpow2.f32 %v1721_v23  ;;  %v1485_v17 = vsub.f32 %v1445_v5, %v1476_v46 }
 0x404   : > { %v1500_v24 = vmul.f32 1.442695, %v1485_v17 }
 0x405   : > { %v3992_v30 = vpop.eup %3991 }
 0x406   : > { %v3994_v43 = vpop.eup %3993  ;;  %4001 = vpow2.f32 %v1500_v24  ;;  %v1701_v47 = vpop.permute.xlu1 %1700  ;;  %3740 = vmatmul.mubr.msk.f32.gmra.mxu1 %vm1051_vm3, %v3992_v30 }
 0x407   : > { %4003 = vpow2.f32 %v1723_v27  ;;  %v1710_v35 = vsub.f32 %v1670_v52, %v1701_v47  ;;  %3742 = vmatprep.mubr.msk.f32.mxu1 %vm1051_vm3, %v3994_v43 }
 0x409   : > { %v1725_v45 = vmul.f32 1.442695, %v1710_v35 }
 0x40a   : > { %v3996_v36 = vpop.eup %3995 }
 0x40b   : > { %4005 = vpow2.f32 %v1725_v45  ;;  %3765 = vmatmul.mubr.msk.f32.gmra.mxu0 %vm1051_vm3, %v3996_v36 }
 0x40e   : > { %v3998_v57 = vpop.eup %3997 }
 0x40f   : > { %v4000_v31 = vpop.eup %3999  ;;  %3767 = vmatprep.mubr.msk.f32.mxu0 %vm1051_vm3, %v3998_v57 }
 0x410   : > { %3768 = vmatmul.mubr.msk.f32.gmra.mxu0 %vm1051_vm3, %v4000_v31 }
 0x413   : > { %v4002_v42 = vpop.eup %4001 }
 0x414   : > { %v4004_v55 = vpop.eup %4003  ;;  %3743 = vmatmul.mubr.msk.f32.gmra.mxu1 %vm1051_vm3, %v4002_v42 }
 0x415   : > { %3770 = vmatprep.mubr.msk.f32.mxu1 %vm1051_vm3, %v4004_v55 }
 0x418   : > { %v4006_v25 = vpop.eup %4005 }
 0x419   : > { %3771 = vmatmul.mubr.msk.f32.vlgmr.msra.gmra.mxu1 %vm1051_vm3, %v4006_v25 }
 0x41a   : > { %3774 = vmatpush3.msk.msra.mxu1 %vm2124_vm4, %v2098_v41 }
 0x47b   : > { %v4693_v9 = vpop.f32.mrf.mxu0 }
 0x47d   : > { %v4698_v53 = vpop.f32.mrf.mxu0 }
 0x47f   : > { %v4702_v33 = vpop.f32.mrf.mxu0 }
 0x481   : > { %v4707_v6 = vpop.f32.mrf.mxu0 }
 0x483   : > { %v4713_v39 = vpop.f32.mrf.mxu0 }
 0x485   : > { %v4717_v34 = vpop.f32.mrf.mxu0 }
 0x487   : > { %v4720_v15 = vpop.f32.mrf.mxu0 }
 0x489   : > { %v4724_v20 = vpop.f32.mrf.mxu0 }
 0x48f   : > { %v4728_v58 = vpop.f32.mrf.mxu0 }
 0x491   : > { %v4732_v60 = vpop.f32.mrf.mxu0 }
 0x493   : > { %v4734_v28 = vpop.f32.mrf.mxu0 }
 0x495   : > { %v4738_v61 = vpop.f32.mrf.mxu0 }
 0x497   : > { %v4743_v40 = vpop.f32.mrf.mxu0 }
 0x499   : > { %v4749_v62 = vpop.f32.mrf.mxu0 }
 0x4a5   : > { %v4753_v8 = vpop.f32.mrf.mxu0 }
 0x4a7   : > { %v4758_v21 = vpop.f32.mrf.mxu0 }
 0x4aa   : > { %v3735_v38 = vpop.f32.mrf.mxu1 }
 0x4ab   : > { %1898 = vrot.lane.b32.xlu1 %v3735_v38, %s4076_s30 }
 0x4ac   : > { %v1592_v18 = vpop.f32.mrf.mxu1 }
 0x4ad   : > { %1896 = vrot.lane.b32.xlu0 %v1592_v18, %s4076_s30 }
 0x4af   : > { %1988 = vrot.lane.b32.xlu1 %v4693_v9, %s4077_s16 }
 0x4b0   : > { %v3738_v32 = vpop.f32.mrf.mxu1 }
 0x4b1   : > { %2010 = vrot.lane.b32.xlu0 %v1592_v18, %s4078_s17 }
 0x4b2   : > { %v1602_v48 = vpop.f32.mrf.mxu1 }
 0x4b3   : > { %2012 = vrot.lane.b32.xlu1 %v3735_v38, %s4078_s17 }
 0x4b5   : > { %1900 = vrot.lane.b32.xlu0 %v1602_v48, %s4076_s30 }
 0x4b7   : > { %1986 = vrot.lane.b32.xlu1 %v4698_v53, %s4077_s16  ;;  %v3763_v63 = vpop.f32.mrf.mxu0 }
 0x4b9   : > { %1990 = vrot.lane.b32.xlu0 %v4707_v6, %s4077_s16  ;;  %v1817_v10 = vpop.f32.mrf.mxu0 }
 0x4bb   : > { %1902 = vrot.lane.b32.xlu1 %v3738_v32, %s4076_s30 }
 0x4bd   : > { %2014 = vrot.lane.b32.xlu0 %v1602_v48, %s4078_s17 }
 0x4bf   : > { %1992 = vrot.lane.b32.xlu1 %v4702_v33, %s4077_s16 }
 0x4c3   : > { %2016 = vrot.lane.b32.xlu1 %v3738_v32, %s4078_s17 }
 0x4c6   : > { %v3741_v49 = vpop.f32.mrf.mxu1 }
 0x4c7   : > { %1906 = vrot.lane.b32.xlu1 %v3741_v49, %s4076_s30 }
 0x4c8   : > { %v1612_v26 = vpop.f32.mrf.mxu1 }
 0x4c9   : > { %1904 = vrot.lane.b32.xlu0 %v1612_v26, %s4076_s30 }
 0x4cb   : > { %1996 = vrot.lane.b32.xlu1 %v4713_v39, %s4077_s16  ;;  %v3766_v12 = vpop.f32.mrf.mxu0 }
 0x4cd   : > { %1994 = vrot.lane.b32.xlu0 %v4717_v34, %s4077_s16  ;;  %v1827_v1 = vpop.f32.mrf.mxu0 }
 0x4d0   : > { %v3769_v13 = vpop.f32.mrf.mxu0 }
 0x4d2   : > { %v1837_v2 = vpop.f32.mrf.mxu0 }
 0x4d4   : > { %v3744_v56 = vpop.f32.mrf.mxu1 }
 0x4d5   : > { %1910 = vrot.lane.b32.xlu1 %v3744_v56, %s4076_s30 }
 0x4d6   : > { %v1622_v19 = vpop.f32.mrf.mxu1 }
 0x4d7   : > { %1908 = vrot.lane.b32.xlu0 %v1622_v19, %s4076_s30 }
 0x4d9   : > { %1866 = vrot.lane.b32.xlu1 %v4728_v58, %s4078_s17  ;;  %v3772_v11 = vpop.f32.mrf.mxu1 }
 0x4db   : > { %1942 = vrot.lane.b32.xlu0 %v3772_v11, %s4079_s21  ;;  %v1847_v7 = vpop.f32.mrf.mxu1 }
 0x4dd   : > { %1870 = vrot.lane.b32.xlu1 %v4734_v28, %s4078_s17 }
 0x4df   : > { %1864 = vrot.lane.b32.xlu0 %v4732_v60, %s4078_s17 }
 0x4e1   : > { %1874 = vrot.lane.b32.xlu1 %v4743_v40, %s4078_s17 }
 0x4e3   : > { %1940 = vrot.lane.b32.xlu0 %v1847_v7, %s4079_s21 }
 0x4e5   : > { %1878 = vrot.lane.b32.xlu1 %v4753_v8, %s4078_s17 }
 0x4e7   : > { %1868 = vrot.lane.b32.xlu0 %v4738_v61, %s4078_s17 }
 0x4e9   : > { %1930 = vrot.lane.b32.xlu1 %v3763_v63, %s4079_s21 }
 0x4eb   : > { %1872 = vrot.lane.b32.xlu0 %v4749_v62, %s4078_s17 }
 0x4ed   : > { %2036 = vrot.lane.b32.xlu1 %v3763_v63, %s4076_s30 }
 0x4ef   : > { %1876 = vrot.lane.b32.xlu0 %v4758_v21, %s4078_s17 }
 0x4f1   : > { %1934 = vrot.lane.b32.xlu1 %v3766_v12, %s4079_s21 }
 0x4f3   : > { %1928 = vrot.lane.b32.xlu0 %v1817_v10, %s4079_s21 }
 0x4f5   : > { %2040 = vrot.lane.b32.xlu1 %v3766_v12, %s4076_s30 }
 0x4f7   : > { %2034 = vrot.lane.b32.xlu0 %v1817_v10, %s4076_s30 }
 0x4f9   : > { %1938 = vrot.lane.b32.xlu1 %v3769_v13, %s4079_s21 }
 0x4fb   : > { %1932 = vrot.lane.b32.xlu0 %v1827_v1, %s4079_s21 }
 0x4fd   : > { %2020 = vrot.lane.b32.xlu1 %v3741_v49, %s4078_s17 }
 0x4ff   : > { %2038 = vrot.lane.b32.xlu0 %v1827_v1, %s4076_s30 }
 0x501   : > { %2044 = vrot.lane.b32.xlu1 %v3769_v13, %s4076_s30 }
 0x503   : > { %1936 = vrot.lane.b32.xlu0 %v1837_v2, %s4079_s21 }
 0x505   : > { %2000 = vrot.lane.b32.xlu1 %v4720_v15, %s4077_s16 }
 0x507   : > { %2018 = vrot.lane.b32.xlu0 %v1612_v26, %s4078_s17 }
 0x509   : > { %2024 = vrot.lane.b32.xlu1 %v3744_v56, %s4078_s17 }
 0x50b   : > { %1998 = vrot.lane.b32.xlu0 %v4724_v20, %s4077_s16 }
 0x50d   : > { %2048 = vrot.lane.b32.xlu1 %v3772_v11, %s4076_s30 }
 0x50f   : > { %2022 = vrot.lane.b32.xlu0 %v1622_v19, %s4078_s17 }
 0x513   : > { %2042 = vrot.lane.b32.xlu0 %v1837_v2, %s4076_s30 }
 0x517   : > { %2046 = vrot.lane.b32.xlu0 %v1847_v7, %s4076_s30 }
 0x51d   : > { %v1899_v14 = vpop.permute.xlu1 %1898 }
 0x51f   : > { %v1897_v22 = vpop.permute.xlu0 %1896 }
 0x521   : > { %v1989_v3 = vpop.permute.xlu1 %1988 }
 0x523   : > { %v2011_v16 = vpop.permute.xlu0 %2010 }
 0x525   : > { %v2013_v59 = vpop.permute.xlu1 %2012 }
 0x527   : > { %v1901_v4 = vpop.permute.xlu0 %1900 }
 0x529   : > { %v1987_v51 = vpop.permute.xlu1 %1986 }
 0x52b   : > { %v4793_v23 = vpop.permute.xlu0 %1990 }
 0x52d   : > { %v1903_v44 = vpop.permute.xlu1 %1902 }
 0x52f   : > { %v4797_v0 = vpop.permute.xlu0 %2014 }
 0x531   : > { %v4791_v50 = vpop.permute.xlu1 %1992 }
 0x535   : > { %v4795_v54 = vpop.permute.xlu1 %2016 }
 0x539   : > { %v1907_v29 = vpop.permute.xlu1 %1906 }
 0x53b   : > { %v1905_v5 = vpop.permute.xlu0 %1904 }
 0x53d   : > { %v4799_v46 = vpop.permute.xlu1 %1996 }
 0x53f   : > { %v4801_v17 = vpop.permute.xlu0 %1994 }
 0x547   : > { %v4803_v27 = vpop.permute.xlu1 %1910 }
 0x549   : > { %v1909_v24 = vpop.permute.xlu0 %1908 }
 0x54b   : > { %v1867_v30 = vpop.permute.xlu1 %1866 }
 0x54c   : > { %v1953_v55 = vsel %vm904_vm2, %v4693_v9, %v1867_v30 }
 0x54d   : > { %v4805_v52 = vpop.permute.xlu0 %1942  ;;  %v1962_v32 = vsel %vm1960_vm5, %v1953_v55, %v1899_v14 }
 0x54f   : > { %v1871_v43 = vpop.permute.xlu1 %1870 }
 0x550   : > { %v1955_v9 = vsel %vm904_vm2, %v4702_v33, %v1871_v43  ;;  %v2058_v33 = vsel %vm904_vm2, %v1987_v51, %v4732_v60 }
 0x551   : > { %v1865_v47 = vpop.permute.xlu0 %1864  ;;  %v1964_v63 = vsel %vm1960_vm5, %v1955_v9, %v1903_v44  ;;  %v2066_v43 = vsel %vm1960_vm5, %v2058_v33, %v2011_v16 }
 0x552   : > { %v1952_v18 = vsel %vm904_vm2, %v4698_v53, %v1865_v47 }
 0x553   : > { %v1875_v35 = vpop.permute.xlu1 %1874  ;;  %v1961_v26 = vsel %vm1960_vm5, %v1952_v18, %v1897_v22  ;;  %v2059_v22 = vsel %vm904_vm2, %v1989_v3, %v4728_v58 }
 0x554   : > { %v1957_v14 = vsel %vm904_vm2, %v4713_v39, %v1875_v35  ;;  %v2067_v30 = vsel %vm1960_vm5, %v2059_v22, %v2013_v59 }
 0x555   : > { %v4807_v45 = vpop.permute.xlu0 %1940  ;;  %v1966_v58 = vsel %vm1960_vm5, %v1957_v14, %v1907_v29  ;;  %v3493_v14 = vld [vmem:[%s5678_s6] ss:$0 sm:$0xff] }
 0x557   : > { %v1879_v36 = vpop.permute.xlu1 %1878 }
 0x558   : > { %v1959_v60 = vsel %vm904_vm2, %v4720_v15, %v1879_v36 }
 0x559   : > { %v1869_v57 = vpop.permute.xlu0 %1868 }
 0x55a   : > { %v1954_v53 = vsel %vm904_vm2, %v4707_v6, %v1869_v57 }
 0x55b   : > { %v1931_v31 = vpop.permute.xlu1 %1930  ;;  %v1963_v1 = vsel %vm1960_vm5, %v1954_v53, %v1901_v4 }
 0x55c   : > { %v1971_v48 = vsel %vm1969_vm6, %v1962_v32, %v1931_v31 }
 0x55d   : > { %v1873_v42 = vpop.permute.xlu0 %1872  ;;  %4007 = vrcp.f32 %v1971_v48 }
 0x55e   : > { %v1956_v44 = vsel %vm904_vm2, %v4717_v34, %v1873_v42 }
 0x55f   : > { %v2037_v25 = vpop.permute.xlu1 %2036  ;;  %v1965_v16 = vsel %vm1960_vm5, %v1956_v44, %v1905_v5  ;;  %v2060_v5 = vsel %vm904_vm2, %v4793_v23, %v4738_v61 }
 0x560   : > { %v2075_v34 = vsel %vm1969_vm6, %v2067_v30, %v2037_v25  ;;  %v4056_v30 = vld [vmem:[%s4176_s23] sm:$0xff] }
 0x561   : > { %v1877_v38 = vpop.permute.xlu0 %1876 }
 0x562   : > { %v1958_v39 = vsel %vm904_vm2, %v4724_v20, %v1877_v38  ;;  %v1968_v20 = vsel %vm1960_vm5, %v1959_v60, %v4803_v27  ;;  %v2061_v27 = vsel %vm904_vm2, %v4791_v50, %v4734_v28  ;;  %v2062_v50 = vsel %vm904_vm2, %v4801_v17, %v4749_v62 }
 0x563   : > { %v1935_v49 = vpop.permute.xlu1 %1934  ;;  %v1967_v15 = vsel %vm1960_vm5, %v1958_v39, %v1909_v24  ;;  %v2068_v24 = vsel %vm1960_vm5, %v2060_v5, %v4797_v0  ;;  %v1977_v38 = vsel %vm1969_vm6, %v1968_v20, %v4805_v52  ;;  %v2069_v32 = vsel %vm1960_vm5, %v2061_v27, %v4795_v54 }
 0x564   : > { %v1973_v10 = vsel %vm1969_vm6, %v1964_v63, %v1935_v49  ;;  %v1976_v36 = vsel %vm1969_vm6, %v1967_v15, %v4807_v45  ;;  %v2063_v52 = vsel %vm904_vm2, %v4799_v46, %v4743_v40  ;;  %v4059_v15 = vld [vmem:[%s4176_s23 + $0x28] sm:$0xff] }
 0x565   : > { %v1929_v56 = vpop.permute.xlu0 %1928 }
 0x566   : > { %v1970_v19 = vsel %vm1969_vm6, %v1961_v26, %v1929_v56 }
 0x567   : > { %4009 = vrcp.f32 %v1970_v19  ;;  %v2041_v11 = vpop.permute.xlu1 %2040 }
 0x568   : > { %4011 = vrcp.f32 %v1973_v10  ;;  %v2077_v23 = vsel %vm1969_vm6, %v2069_v32, %v2041_v11 }
 0x569   : > { %v2035_v7 = vpop.permute.xlu0 %2034 }
 0x56a   : > { %v4008_v4 = vpop.eup %4007  ;;  %v2074_v51 = vsel %vm1969_vm6, %v2066_v43, %v2035_v7 }
 0x56b   : > { %v1939_v12 = vpop.permute.xlu1 %1938  ;;  %v2085_v31 = vmul.f32 %v4008_v4, %v2075_v34 }
 0x56c   : > { %v1975_v59 = vsel %vm1969_vm6, %v1966_v58, %v1939_v12 }
 0x56d   : > { %v1933_v13 = vpop.permute.xlu0 %1932 }
 0x56e   : > { %v1972_v41 = vsel %vm1969_vm6, %v1963_v1, %v1933_v13 }
 0x56f   : > { %4013 = vrcp.f32 %v1972_v41  ;;  %v2021_v2 = vpop.permute.xlu1 %2020 }
 0x570   : > { %4015 = vrcp.f32 %v1975_v59  ;;  %v2071_v9 = vsel %vm1960_vm5, %v2063_v52, %v2021_v2 }
 0x571   : > { %v2039_v6 = vpop.permute.xlu0 %2038 }
 0x572   : > { %v2076_v61 = vsel %vm1969_vm6, %v2068_v24, %v2039_v6  ;;  %v4055_v6 = vld [vmem:[%s4176_s23 + $0x8] sm:$0xff] }
 0x573   : > { %v2045_v3 = vpop.permute.xlu1 %2044 }
 0x574   : > { %v4010_v47 = vpop.eup %4009  ;;  %v2079_v53 = vsel %vm1969_vm6, %v2071_v9, %v2045_v3  ;;  %v4057_v3 = vld [vmem:[%s4176_s23 + $0x18] sm:$0xff] }
 0x575   : > { %v2083_v35 = vmul.f32 %v4010_v47, %v2074_v51  ;;  %v1937_v57 = vpop.permute.xlu0 %1936  ;;  %v4012_v25 = vpop.eup %4011 }
 0x576   : > { %v1974_v42 = vsel %vm1969_vm6, %v1965_v16, %v1937_v57  ;;  %v2089_v0 = vmul.f32 %v4012_v25, %v2077_v23 }
 0x577   : > { %3775 = vmatprep.mubr.msk.f32.mxu1 %vm2099_vm7, %v2083_v35  ;;  %4017 = vrcp.f32 %v1974_v42  ;;  %v2001_v55 = vpop.permute.xlu1 %2000  ;;  %v4058_v35 = vld [vmem:[%s4176_s23 + $0x10] sm:$0xff] }
 0x578   : > { %3776 = vmatmul.mubr.msk.f32.vlgmr.msra.gmra.mxu1 %vm2099_vm7, %v2085_v31  ;;  %4019 = vrcp.f32 %v1976_v36  ;;  %v2065_v63 = vsel %vm904_vm2, %v2001_v55, %v4753_v8  ;;  %v4060_v55 = vld [vmem:[%s4176_s23 + $0x20] sm:$0xff] }
 0x579   : > { %v2019_v29 = vpop.permute.xlu0 %2018  ;;  %4021 = vrcp.f32 %v1977_v38  ;;  %v4061_v38 = vld [vmem:[%s4176_s23 + $0x38] sm:$0xff] }
 0x57a   : > { %v2070_v26 = vsel %vm1960_vm5, %v2062_v50, %v2019_v29 }
 0x57b   : > { %v2025_v49 = vpop.permute.xlu1 %2024 }
 0x57c   : > { %v4014_v18 = vpop.eup %4013  ;;  %v2073_v10 = vsel %vm1960_vm5, %v2065_v63, %v2025_v49 }
 0x57d   : > { %v2087_v45 = vmul.f32 %v4014_v18, %v2076_v61  ;;  %v1999_v48 = vpop.permute.xlu0 %1998  ;;  %v4016_v54 = vpop.eup %4015 }
 0x57e   : > { %v2093_v17 = vmul.f32 %v4016_v54, %v2079_v53  ;;  %v2064_v40 = vsel %vm904_vm2, %v1999_v48, %v4758_v21 }
 0x57f   : > { %3778 = vmatprep.mubr.msk.f32.mxu1 %vm2099_vm7, %v2087_v45  ;;  %v2049_v11 = vpop.permute.xlu1 %2048  ;;  %v4062_v45 = vld [vmem:[%s4176_s23 + $0x30] sm:$0xff] }
 0x580   : > { %3779 = vmatmul.mubr.msk.f32.gmra.mxu1 %vm2099_vm7, %v2089_v0  ;;  %v2081_v46 = vsel %vm1969_vm6, %v2073_v10, %v2049_v11 }
 0x581   : > { %v2023_v28 = vpop.permute.xlu0 %2022 }
 0x582   : > { %v2072_v12 = vsel %vm1960_vm5, %v2064_v40, %v2023_v28 }
 0x584   : > { %v4018_v19 = vpop.eup %4017 }
 0x585   : > { %v2043_v56 = vpop.permute.xlu0 %2042  ;;  %v4020_v13 = vpop.eup %4019 }
 0x586   : > { %v2078_v7 = vsel %vm1969_vm6, %v2070_v26, %v2043_v56  ;;  %v4022_v8 = vpop.eup %4021 }
 0x587   : > { %v2091_v62 = vmul.f32 %v4018_v19, %v2078_v7  ;;  %v2097_v33 = vmul.f32 %v4022_v8, %v2081_v46 }
 0x589   : > { %3781 = vmatprep.mubr.msk.f32.mxu1 %vm2099_vm7, %v2091_v62  ;;  %v2047_v1 = vpop.permute.xlu0 %2046 }
 0x58a   : > { %v2080_v41 = vsel %vm1969_vm6, %v2072_v12, %v2047_v1  ;;  %3782 = vmatmul.mubr.msk.f32.gmra.mxu1 %vm2099_vm7, %v2093_v17 }
 0x58b   : > { %v2095_v2 = vmul.f32 %v4020_v13, %v2080_v41 }
 0x58d   : > { %3784 = vmatprep.mubr.msk.f32.mxu1 %vm2099_vm7, %v2095_v2 }
 0x58e   : > { %3785 = vmatmul.mubr.msk.f32.gmra.mxu1 %vm2099_vm7, %v2097_v33 }
 0x638   : > { %v3777_v21 = vpop.f32.mrf.mxu1 }
 0x639   : > { %v2234_v22 = vadd.f32 %v4055_v6, %v3777_v21 }
 0x63a   : > { %v2194_v44 = vpop.f32.mrf.mxu1 }
 0x63b   : > { %v4894_v4 = vadd.f32 %v3493_v14, %v2234_v22  ;;  %v2233_v43 = vadd.f32 %v4056_v30, %v2194_v44 }
 0x63d   : > { %5706 = vst [vmem:[#allocation3_spill] sm:$0xff] %v4894_v4  ;;  %v4897_v47 = vadd.f32 %v3493_v14, %v2233_v43  ;;  %v2261_v60 = vsel %vm5701_vm0, %v4894_v4, 0.0 }
 0x63e   : > { %2262 = vadd.xlane.f32.xlu1 %v2261_v60 }
 0x63f   : > { %5707 = vst [vmem:[#allocation4_spill] sm:$0xff] %v4897_v47  ;;  %v2258_v39 = vsel %vm5701_vm0, %v4897_v47, 0.0 }
 0x640   : > { %2259 = vadd.xlane.f32.xlu0 %v2258_v39  ;;  %v3780_v51 = vpop.f32.mrf.mxu1 }
 0x641   : > { %v2236_v34 = vadd.f32 %v4057_v3, %v3780_v51 }
 0x642   : > { %v2204_v58 = vpop.f32.mrf.mxu1 }
 0x643   : > { %v2235_v59 = vadd.f32 %v4058_v35, %v2204_v58  ;;  %v4907_v57 = vadd.f32 %v3493_v14, %v2236_v34 }
 0x645   : > { %v4905_v16 = vadd.f32 %v3493_v14, %v2235_v59  ;;  %5709 = vst [vmem:[#allocation6_spill] sm:$0xff] %v4907_v57  ;;  %v2267_v29 = vsel %vm5701_vm0, %v4907_v57, 0.0 }
 0x647   : > { %5708 = vst [vmem:[#allocation5_spill] sm:$0xff] %v4905_v16  ;;  %v2264_v31 = vsel %vm5701_vm0, %v4905_v16, 0.0 }
 0x648   : > { %2265 = vadd.xlane.f32.xlu0 %v2264_v31 }
 0x64a   : > { %v3783_v42 = vpop.f32.mrf.mxu1 }
 0x64b   : > { %v2238_v20 = vadd.f32 %v4059_v15, %v3783_v42 }
 0x64c   : > { %2268 = vadd.xlane.f32.xlu0 %v2267_v29  ;;  %v2214_v5 = vpop.f32.mrf.mxu1  ;;  %v2392_v29 = vld [vmem:[%s5681_s9 + $0x10] sm:$0xff] }
 0x64d   : > { %v4914_v36 = vadd.f32 %v3493_v14, %v2238_v20  ;;  %v2237_v25 = vadd.f32 %v4060_v55, %v2214_v5  ;;  %v2393_v20 = vld [vmem:[%s5681_s9 + $0x18] sm:$0xff]  ;;  %v2391_v5 = vld [vmem:[%s5681_s9 + $0x8] sm:$0xff]  ;;  %v2390_v55 = vld [vmem:[%s5681_s9] sm:$0xff] }
 0x64e   : > { %v3786_v24 = vpop.f32.mrf.mxu1  ;;  %3787 = vmatprep.subr.mxu0 %v2393_v20 }
 0x64f   : > { %5710 = vst [vmem:[#allocation7_spill] sm:$0xff] %v4914_v36  ;;  %v4917_v27 = vadd.f32 %v3493_v14, %v2237_v25  ;;  %v2240_v18 = vadd.f32 %v4061_v38, %v3786_v24  ;;  %v2273_v32 = vsel %vm5701_vm0, %v4914_v36, 0.0  ;;  %3788 = vmatpush3.msra.mxu0 %v2393_v20 }
 0x650   : > { %2274 = vadd.xlane.f32.xlu0 %v2273_v32  ;;  %v2224_v61 = vpop.f32.mrf.mxu1  ;;  %3789 = vmatprep.subr.mxu0 %v2392_v29 }
 0x651   : > { %5711 = vst [vmem:[#allocation8_spill] sm:$0xff] %v4917_v27  ;;  %v4922_v23 = vadd.f32 %v3493_v14, %v2240_v18  ;;  %v2239_v48 = vadd.f32 %v4062_v45, %v2224_v61  ;;  %v2270_v0 = vsel %vm5701_vm0, %v4917_v27, 0.0  ;;  %3790 = vmatpush3.msra.mxu0 %v2392_v29 }
 0x652   : > { %2271 = vadd.xlane.f32.xlu1 %v2270_v0  ;;  %3791 = vmatprep.subr.mxu0 %v2391_v5 }
 0x653   : > { %5712 = vst [vmem:[#allocation9_spill] sm:$0xff] %v4922_v23  ;;  %v4927_v49 = vadd.f32 %v3493_v14, %v2239_v48  ;;  %v2279_v28 = vsel %vm5701_vm0, %v4922_v23, 0.0  ;;  %3792 = vmatpush3.msra.mxu0 %v2391_v5 }
 0x654   : > { %2280 = vadd.xlane.f32.xlu0 %v2279_v28  ;;  %3793 = vmatprep.subr.mxu0 %v2390_v55 }
 0x655   : > { %5713 = vst [vmem:[#allocation10_spill] sm:$0xff] %v4927_v49  ;;  %v2276_v50 = vsel %vm5701_vm0, %v4927_v49, 0.0  ;;  %3794 = vmatpush3.msra.mxu0 %v2390_v55 }
 0x656   : > { %2277 = vadd.xlane.f32.xlu1 %v2276_v50 }
 0x6c7   : > { %v2263_v54 = vpop.xlane.xlu1 %2262 }
 0x6c8   : > { %v2283_v52 = vmul.f32 0.03125, %v2263_v54 }
 0x6c9   : > { %v2260_v26 = vpop.xlane.xlu0 %2259 }
 0x6ca   : > { %v4934_v56 = vsub.f32 %v4894_v4, %v2283_v52  ;;  %v2282_v19 = vmul.f32 0.03125, %v2260_v26 }
 0x6cc   : > { %v4937_v9 = vsub.f32 %v4897_v47, %v2282_v19  ;;  %v2299_v11 = vmul.f32 %v4934_v56, %v4934_v56  ;;  %v3494_v19 = vld [vmem:[%s5679_s7] ss:$0 sm:$0xff] }
 0x6ce   : > { %v2309_v7 = vsel %vm5701_vm0, %v2299_v11, 0.0  ;;  %v2298_v53 = vmul.f32 %v4937_v9, %v4937_v9 }
 0x6cf   : > { %2310 = vadd.xlane.f32.xlu0 %v2309_v7 }
 0x6d0   : > { %v2306_v63 = vsel %vm5701_vm0, %v2298_v53, 0.0 }
 0x6d1   : > { %2307 = vadd.xlane.f32.xlu1 %v2306_v63  ;;  %v2266_v62 = vpop.xlane.xlu0 %2265 }
 0x6d2   : > { %v2284_v17 = vmul.f32 0.03125, %v2266_v62 }
 0x6d4   : > { %v4946_v10 = vsub.f32 %v4905_v16, %v2284_v17 }
 0x6d5   : > { %v2269_v40 = vpop.xlane.xlu0 %2268 }
 0x6d6   : > { %v2285_v46 = vmul.f32 0.03125, %v2269_v40  ;;  %v2300_v12 = vmul.f32 %v4946_v10, %v4946_v10 }
 0x6d8   : > { %v4951_v1 = vsub.f32 %v4907_v57, %v2285_v46  ;;  %v2312_v13 = vsel %vm5701_vm0, %v2300_v12, 0.0 }
 0x6d9   : > { %2313 = vadd.xlane.f32.xlu1 %v2312_v13  ;;  %v2275_v41 = vpop.xlane.xlu0 %2274 }
 0x6da   : > { %v2287_v8 = vmul.f32 0.03125, %v2275_v41  ;;  %v2301_v2 = vmul.f32 %v4951_v1, %v4951_v1 }
 0x6db   : > { %v2272_v33 = vpop.xlane.xlu1 %2271 }
 0x6dc   : > { %v4957_v21 = vsub.f32 %v4914_v36, %v2287_v8  ;;  %v2286_v14 = vmul.f32 0.03125, %v2272_v33  ;;  %v2315_v6 = vsel %vm5701_vm0, %v2301_v2, 0.0  ;;  %v3495_v8 = vld [vmem:[%s5680_s8] ss:$0 sm:$0xff] }
 0x6dd   : > { %2316 = vadd.xlane.f32.xlu0 %v2315_v6  ;;  %v2281_v22 = vpop.xlane.xlu0 %2280 }
 0x6de   : > { %v4961_v44 = vsub.f32 %v4917_v27, %v2286_v14  ;;  %v2289_v30 = vmul.f32 0.03125, %v2281_v22  ;;  %v2303_v43 = vmul.f32 %v4957_v21, %v4957_v21 }
 0x6df   : > { %v2278_v60 = vpop.xlane.xlu1 %2277 }
 0x6e0   : > { %v4966_v39 = vsub.f32 %v4922_v23, %v2289_v30  ;;  %v2288_v51 = vmul.f32 0.03125, %v2278_v60  ;;  %v2321_v58 = vsel %vm5701_vm0, %v2303_v43, 0.0  ;;  %v2302_v3 = vmul.f32 %v4961_v44, %v4961_v44 }
 0x6e1   : > { %2322 = vadd.xlane.f32.xlu0 %v2321_v58 }
 0x6e2   : > { %v4972_v34 = vsub.f32 %v4927_v49, %v2288_v51  ;;  %v2318_v35 = vsel %vm5701_vm0, %v2302_v3, 0.0  ;;  %v2305_v59 = vmul.f32 %v4966_v39, %v4966_v39 }
 0x6e3   : > { %2319 = vadd.xlane.f32.xlu1 %v2318_v35 }
 0x6e4   : > { %v2327_v31 = vsel %vm5701_vm0, %v2305_v59, 0.0  ;;  %v2304_v42 = vmul.f32 %v4972_v34, %v4972_v34 }
 0x6e5   : > { %2328 = vadd.xlane.f32.xlu0 %v2327_v31 }
 0x6e6   : > { %v2324_v15 = vsel %vm5701_vm0, %v2304_v42, 0.0 }
 0x6e7   : > { %2325 = vadd.xlane.f32.xlu1 %v2324_v15 }
 0x758   : > { %v2311_v25 = vpop.xlane.xlu0 %2310 }
 0x759   : > { %v2331_v24 = vmul.f32 0.03125, %v2311_v25 }
 0x75a   : > { %v2308_v38 = vpop.xlane.xlu1 %2307 }
 0x75b   : > { %v2339_v18 = vadd.f32 1e-05, %v2331_v24  ;;  %v2330_v32 = vmul.f32 0.03125, %v2308_v38 }
 0x75d   : > { %4023 = vrsqrt.f32 %v2339_v18  ;;  %v2338_v61 = vadd.f32 1e-05, %v2330_v32 }
 0x75f   : > { %4025 = vrsqrt.f32 %v2338_v61 }
 0x762   : > { %v2314_v45 = vpop.xlane.xlu1 %2313 }
 0x763   : > { %v2332_v48 = vmul.f32 0.03125, %v2314_v45  ;;  %v3245_v45 = vld [vmem:[%s5685_s13 + $0x60] sm:$0xff] }
 0x765   : > { %v2340_v0 = vadd.f32 1e-05, %v2332_v48  ;;  %v3244_v48 = vld [vmem:[%s5685_s13 + $0x58] sm:$0xff] }
 0x766   : > { %v2317_v28 = vpop.xlane.xlu0 %2316 }
 0x767   : > { %4027 = vrsqrt.f32 %v2340_v0  ;;  %v2333_v50 = vmul.f32 0.03125, %v2317_v28  ;;  %v3243_v0 = vld [vmem:[%s5685_s13 + $0x50] sm:$0xff]  ;;  %v3242_v28 = vld [vmem:[%s5685_s13 + $0x48] sm:$0xff] }
 0x769   : > { %v2341_v54 = vadd.f32 1e-05, %v2333_v50  ;;  %v3241_v50 = vld [vmem:[%s5685_s13 + $0x40] sm:$0xff] }
 0x76a   : > { %v4024_v52 = vpop.eup %4023  ;;  %v2323_v26 = vpop.xlane.xlu0 %2322 }
 0x76b   : > { %v2355_v11 = vmul.f32 %v4024_v52, %v4934_v56  ;;  %4029 = vrsqrt.f32 %v2341_v54  ;;  %v2335_v7 = vmul.f32 0.03125, %v2323_v26  ;;  %v3240_v54 = vld [vmem:[%s5685_s13 + $0x38] sm:$0xff]  ;;  %v3239_v52 = vld [vmem:[%s5685_s13 + $0x30] sm:$0xff]  ;;  %v3238_v26 = vld [vmem:[%s5685_s13 + $0x28] sm:$0xff] }
 0x76c   : > { %v4026_v53 = vpop.eup %4025  ;;  %v2320_v63 = vpop.xlane.xlu1 %2319 }
 0x76d   : > { %v2343_v62 = vadd.f32 1e-05, %v2335_v7  ;;  %v2334_v17 = vmul.f32 0.03125, %v2320_v63  ;;  %v2354_v40 = vmul.f32 %v4026_v53, %v4937_v9  ;;  %v2369_v46 = vmul.f32 %v3494_v19, %v2355_v11  ;;  %v3236_v11 = vld [vmem:[%s5685_s13 + $0x18] sm:$0xff]  ;;  %v3235_v7 = vld [vmem:[%s5685_s13 + $0x10] sm:$0xff]  ;;  %v3234_v53 = vld [vmem:[%s5685_s13 + $0x8] sm:$0xff] }
 0x76e   : > { %v2329_v12 = vpop.xlane.xlu0 %2328  ;;  %v3233_v63 = vld [vmem:[%s5685_s13] sm:$0xff] }
 0x76f   : > { %4031 = vrsqrt.f32 %v2343_v62  ;;  %v2342_v13 = vadd.f32 1e-05, %v2334_v17  ;;  %v2337_v41 = vmul.f32 0.03125, %v2329_v12  ;;  %v2368_v2 = vmul.f32 %v3494_v19, %v2354_v40  ;;  %v5066_v62 = vld [vmem:[%s5682_s10] ss:$0 sm:$0xff] }
 0x770   : > { %v2326_v33 = vpop.xlane.xlu1 %2325  ;;  %v2383_v22 = vadd.f32 %v3495_v8, %v2369_v46  ;;  %v2532_v17 = vadd.s32 8, %v4481_v37  ;;  %v2533_v40 = vadd.s32 16, %v4481_v37  ;;  %v2534_v12 = vadd.s32 24, %v4481_v37 }
 0x771   : > { %4033 = vrsqrt.f32 %v2342_v13  ;;  %v2345_v56 = vadd.f32 1e-05, %v2337_v41  ;;  %v2336_v14 = vmul.f32 0.03125, %v2326_v33  ;;  %v2382_v6 = vadd.f32 %v3495_v8, %v2368_v2  ;;  %v5077_v41 = vld [vmem:[%s5683_s11] ss:$0 sm:$0xff] }
 0x772   : > { %v2543_v2 = vand.u32 7, %v4481_v37  ;;  %v2550_v33 = vand.u32 7, %v2532_v17  ;;  %v5206_v17 = vld [vmem:[%s5683_s11 + $0x8] ss:$0 sm:$0xff] }
 0x773   : > { %4035 = vrsqrt.f32 %v2345_v56  ;;  %v2344_v30 = vadd.f32 1e-05, %v2336_v14  ;;  %3795 = vmatprep.mubr.msk.f32.mxu0 %vm5701_vm0, %v2382_v6  ;;  %v2557_v56 = vand.u32 7, %v2533_v40  ;;  %v2742_v6 = vmul.f32 0.0, %v5077_v41 }
 0x774   : > { %v4028_v9 = vpop.eup %4027  ;;  %3796 = vmatmul.mubr.msk.f32.vlgmr.msra.gmra.mxu0 %vm5701_vm0, %v2383_v22  ;;  %v2564_v22 = vand.u32 7, %v2534_v12  ;;  %vm5120_vm11 = vcmp.le.s32.totalorder %v2543_v2, 6  ;;  %vm5124_vm12 = vcmp.le.s32.totalorder %v2550_v33, 6  ;;  %vm5149_vm13 = vcmp.ge.s32.totalorder %v2550_v33, 1 }
 0x775   : > { %4037 = vrsqrt.f32 %v2344_v30  ;;  %v2356_v43 = vmul.f32 %v4028_v9, %v4946_v10  ;;  %v5089_v30 = vld [vmem:[%s5683_s11 + $0x4] ss:$0 sm:$0xff]  ;;  %vm5116_vm10 = vcmp.ge.s32.totalorder %v2557_v56, 1  ;;  %vm5158_vm15 = vcmp.ge.s32.totalorder %v2543_v2, 1 }
 0x776   : > { %vm5154_vm14 = vcmp.ge.s32.totalorder %v2564_v22, 1  ;;  %vm5162_vm1 = vcmp.le.s32.totalorder %v2557_v56, 6  ;;  %vm5166_vm2 = vcmp.le.s32.totalorder %v2564_v22, 6  ;;  %v5218_v2 = vmul.f32 0.0, %v5206_v17 }
 0x777   : > { %v2370_v60 = vmul.f32 %v3494_v19, %v2356_v43  ;;  %v5093_v43 = vadd.s32 32, %v4481_v37 }
 0x778   : > { %v4030_v51 = vpop.eup %4029  ;;  %5734 = vst [vmem:[#allocation15_spill] sm:$0xff] %v5218_v2 }
 0x779   : > { %v2384_v58 = vadd.f32 %v3495_v8, %v2370_v60  ;;  %v2357_v3 = vmul.f32 %v4030_v51, %v4951_v1  ;;  %v5096_v60 = vadd.s32 40, %v4481_v37  ;;  %v5099_v51 = vadd.s32 48, %v4481_v37 }
 0x77b   : > { %3798 = vmatprep.mubr.msk.f32.mxu0 %vm5701_vm0, %v2384_v58  ;;  %v2371_v35 = vmul.f32 %v3494_v19, %v2357_v3 }
 0x77c   : > { %v4032_v59 = vpop.eup %4031 }
 0x77d   : > { %v2385_v31 = vadd.f32 %v3495_v8, %v2371_v35  ;;  %v2359_v42 = vmul.f32 %v4032_v59, %v4957_v21 }
 0x77e   : > { %v4034_v15 = vpop.eup %4033 }
 0x77f   : > { %3799 = vmatmul.mubr.msk.f32.gmra.mxu0 %vm5701_vm0, %v2385_v31  ;;  %v2358_v20 = vmul.f32 %v4034_v15, %v4961_v44  ;;  %v2373_v5 = vmul.f32 %v3494_v19, %v2359_v42  ;;  %v3248_v44 = vld [vmem:[%s5685_s13 + $0x78] sm:$0xff]  ;;  %v5109_v31 = vld [vmem:[%s5683_s11 + $0x2] ss:$0 sm:$0xff]  ;;  %v5114_v42 = vld [vmem:[%s5683_s11 + $0x1] ss:$0 sm:$0xff]  ;;  %v5714_v15 = vmov 0 }
 0x780   : > { %v4036_v29 = vpop.eup %4035  ;;  %3807 = vmatprep.subr.mxu1 %v3248_v44  ;;  %v5715_v15 = vsel %vm5116_vm10, 4294967295, %v5714_v15 }
 0x781   : > { %v2372_v10 = vmul.f32 %v3494_v19, %v2358_v20  ;;  %v2361_v55 = vmul.f32 %v4036_v29, %v4966_v39  ;;  %v2387_v38 = vadd.f32 %v3495_v8, %v2373_v5  ;;  %v3247_v39 = vld [vmem:[%s5685_s13 + $0x70] sm:$0xff]  ;;  %3808 = vmatpush3.msra.mxu1 %v3248_v44  ;;  %5716 = vst [vmem:[#allocation11_spill] sm:$0xff] %v5715_v15  ;;  %v5129_v5 = vadd.s32 56, %v4481_v37  ;;  %v3514_v44 = vld [vmem:[%s5684_s12] ss:$0 sm:$0xff] }
 0x782   : > { %v4038_v25 = vpop.eup %4037  ;;  %3809 = vmatprep.subr.mxu1 %v3247_v39 }
 0x783   : > { %v2386_v24 = vadd.f32 %v3495_v8, %v2372_v10  ;;  %v2360_v1 = vmul.f32 %v4038_v25, %v4972_v34  ;;  %v2375_v18 = vmul.f32 %v3494_v19, %v2361_v55  ;;  %v3246_v34 = vld [vmem:[%s5685_s13 + $0x68] sm:$0xff]  ;;  %3810 = vmatpush3.msra.mxu1 %v3247_v39  ;;  %v2795_v25 = vmul.f32 0.0, %v5114_v42  ;;  %v5173_v39 = vld [vmem:[%s5683_s11 + $0x6] ss:$0 sm:$0xff] }
 0x784   : > { %3811 = vmatprep.subr.mxu1 %v3246_v34  ;;  %v5762_v15 = vand.u32 7, %v5129_v5 }
 0x785   : > { %3801 = vmatprep.mubr.msk.f32.mxu0 %vm5701_vm0, %v2386_v24  ;;  %v2374_v32 = vmul.f32 %v3494_v19, %v2360_v1  ;;  %v2389_v61 = vadd.f32 %v3495_v8, %v2375_v18  ;;  %3812 = vmatpush3.msra.mxu1 %v3246_v34  ;;  %v3237_v19 = vld [vmem:[%s5685_s13 + $0x20] sm:$0xff]  ;;  %v2865_v18 = vmul.f32 0.0, %v5109_v31  ;;  %v2571_v34 = vand.u32 7, %v5093_v43 }
 0x786   : > { %3802 = vmatmul.mubr.msk.f32.gmra.mxu0 %vm5701_vm0, %v2387_v38  ;;  %3813 = vmatprep.subr.mxu1 %v3245_v45  ;;  %v5147_v1 = vld [vmem:[%s5683_s11 + $0x7] ss:$0 sm:$0xff] }
 0x787   : > { %v2388_v21 = vadd.f32 %v3495_v8, %v2374_v32  ;;  %3814 = vmatpush3.msra.mxu1 %v3245_v45  ;;  %v2578_v45 = vand.u32 7, %v5096_v60  ;;  %vm5241_vm3 = vcmp.ge.s32.totalorder %v2571_v34, 1  ;;  %vm5302_vm5 = vcmp.le.s32.totalorder %v2571_v34, 6 }
 0x788   : > { %3815 = vmatprep.subr.mxu1 %v3244_v48 }
 0x789   : > { %3804 = vmatprep.mubr.msk.f32.mxu0 %vm5701_vm0, %v2388_v21  ;;  %3816 = vmatpush3.msra.mxu1 %v3244_v48  ;;  %vm5293_vm4 = vcmp.ge.s32.totalorder %v2578_v45, 1  ;;  %vm5306_vm6 = vcmp.le.s32.totalorder %v2578_v45, 6 }
 0x78a   : > { %3805 = vmatmul.mubr.msk.f32.gmra.mxu0 %vm5701_vm0, %v2389_v61  ;;  %3817 = vmatprep.subr.mxu1 %v3243_v0  ;;  %v5727_v61 = vmov 0 }
 0x78b   : > { %3818 = vmatpush3.msra.mxu1 %v3243_v0  ;;  %v5728_v61 = vsel %vm5162_vm1, 4294967295, %v5727_v61 }
 0x78c   : > { %3819 = vmatprep.subr.mxu1 %v3242_v28  ;;  %5729 = vst [vmem:[#allocation12_spill] sm:$0xff] %v5728_v61 }
 0x78d   : > { %3820 = vmatpush3.msra.mxu1 %v3242_v28 }
 0x78e   : > { %3821 = vmatprep.subr.mxu1 %v3241_v50 }
 0x78f   : > { %3822 = vmatpush3.msra.mxu1 %v3241_v50  ;;  %v5185_v50 = vld [vmem:[%s5683_s11 + $0x3] ss:$0 sm:$0xff] }
 0x790   : > { %3823 = vmatprep.subr.mxu1 %v3240_v54 }
 0x791   : > { %3824 = vmatpush3.msra.mxu1 %v3240_v54 }
 0x792   : > { %3825 = vmatprep.subr.mxu1 %v3239_v52 }
 0x793   : > { %3826 = vmatpush3.msra.mxu1 %v3239_v52 }
 0x794   : > { %3827 = vmatprep.subr.mxu1 %v3238_v26 }
 0x795   : > { %3828 = vmatpush3.msra.mxu1 %v3238_v26  ;;  %v5189_v26 = vmul.f32 0.0, %v5173_v39 }
 0x796   : > { %3829 = vmatprep.subr.mxu1 %v3237_v19 }
 0x797   : > { %3830 = vmatpush3.msra.mxu1 %v3237_v19  ;;  %5732 = vst [vmem:[#allocation13_spill] sm:$0xff] %v5189_v26 }
 0x798   : > { %3831 = vmatprep.subr.mxu1 %v3236_v11 }
 0x799   : > { %3832 = vmatpush3.msra.mxu1 %v3236_v11 }
 0x79a   : > { %3833 = vmatprep.subr.mxu1 %v3235_v7 }
 0x79b   : > { %3834 = vmatpush3.msra.mxu1 %v3235_v7 }
 0x79c   : > { %3835 = vmatprep.subr.mxu1 %v3234_v53 }
 0x79d   : > { %3836 = vmatpush3.msra.mxu1 %v3234_v53  ;;  %v5198_v53 = vld [vmem:[%s5683_s11 + $0x5] ss:$0 sm:$0xff] }
 0x79e   : > { %3837 = vmatprep.subr.mxu1 %v3233_v63 }
 0x79f   : > { %3838 = vmatpush3.msra.mxu1 %v3233_v63 }
 0x834   : > { %v3797_v46 = vpop.f32.mrf.mxu0 }
 0x835   : > { %v5072_v13 = vadd.f32 %v3797_v46, %v5066_v62 }
 0x836   : > { %v2491_v8 = vpop.f32.mrf.mxu0 }
 0x837   : > { %v5082_v14 = vadd.f32 %v5066_v62, %v2491_v8  ;;  %v2689_v9 = vrot.slane %v5072_v13, 7  ;;  %v5690_v58 = vrot.slane %v5072_v13, 1  ;;  %v5210_v40 = vmul.f32 %v5089_v30, %v5072_v13 }
 0x838   : > { %v5215_v8 = vmul.f32 0.0, %v5147_v1  ;;  %v2797_v33 = vmul.f32 %v5114_v42, %v5072_v13  ;;  %v5224_v56 = vmul.f32 %v5147_v1, %v5072_v13  ;;  %v5740_v23 = vrot.slane %v5072_v13, 1 }
 0x839   : > { %v2680_v3 = vmul.f32 %v5089_v30, %v5082_v14  ;;  %v5689_v35 = vrot.slane %v5082_v14, 7  ;;  %v5688_v59 = vrot.slane %v5082_v14, 1  ;;  %v5229_v22 = vmul.f32 %v5114_v42, %v5082_v14 }
 0x83a   : > { %5733 = vst [vmem:[#allocation14_spill] sm:$0xff] %v5215_v8 }
 0x83b   : > { %v2703_v10 = vsel %vm2696_vm8, %v5689_v35, %v2689_v9  ;;  %v2750_v55 = vadd.f32 %v2742_v6, %v2680_v3  ;;  %v2826_v24 = vsel %vm5705_vm9, %v5688_v59, %v5690_v58 }
 0x83c   : > { %v2731_v0 = vsel %vm5116_vm10, %v2703_v10, 0.0  ;;  %v2853_v28 = vsel %vm5124_vm12, %v2826_v24, 0.0  ;;  %v2906_v11 = vsel %vm5149_vm13, %v2703_v10, 0.0  ;;  %v2958_v7 = vsel %vm5120_vm11, %v2826_v24, 0.0 }
 0x83d   : > { %v2803_v19 = vadd.f32 %v2795_v25, %v2750_v55  ;;  %v3011_v12 = vsel %vm5158_vm15, %v2703_v10, 0.0  ;;  %v2744_v6 = vmul.f32 %v5077_v41, %v2731_v0  ;;  %v5232_v43 = vmul.f32 %v5109_v31, %v2853_v28 }
 0x83e   : > { %v5235_v60 = vmul.f32 %v5185_v50, %v2906_v11  ;;  %v5238_v3 = vmul.f32 %v5198_v53, %v2958_v7  ;;  %v5251_v28 = vmul.f32 %v5173_v39, %v3011_v12 }
 0x83f   : > { %v3800_v54 = vpop.f32.mrf.mxu0  ;;  %v5245_v25 = vadd.f32 %v2865_v18, %v2803_v19 }
 0x840   : > { %v5201_v63 = vadd.f32 %v3800_v54, %v5066_v62 }
 0x841   : > { %v2501_v46 = vpop.f32.mrf.mxu0 }
 0x842   : > { %v2502_v10 = vadd.f32 %v5066_v62, %v2501_v46  ;;  %v2683_v24 = vmul.f32 %v5089_v30, %v5201_v63  ;;  %v5693_v0 = vrot.slane %v5201_v63, 7  ;;  %v5695_v54 = vrot.slane %v5201_v63, 1 }
 0x843   : > { %v5257_v59 = vmul.f32 %v5114_v42, %v5201_v63  ;;  %v5261_v18 = vmul.f32 %v5147_v1, %v5201_v63  ;;  %v5753_v26 = vrot.slane %v5201_v63, 7 }
 0x844   : > { %v2682_v11 = vmul.f32 %v5089_v30, %v2502_v10  ;;  %v2690_v7 = vrot.slane %v2502_v10, 7  ;;  %v2813_v46 = vrot.slane %v2502_v10, 1  ;;  %v2798_v19 = vmul.f32 %v5114_v42, %v2502_v10 }
 0x845   : > { %5737 = vst [vmem:[#allocation16_spill] sm:$0xff] %v5261_v18  ;;  %v5265_v35 = vmul.f32 %v5147_v1, %v2502_v10 }
 0x846   : > { %v5271_v12 = vsel %vm2696_vm8, %v2690_v7, %v5693_v0  ;;  %v2702_v52 = vsel %vm2696_vm8, %v2689_v9, %v2690_v7  ;;  %v2752_v48 = vadd.f32 %v2744_v6, %v2682_v11  ;;  %v2824_v58 = vsel %vm5705_vm9, %v2813_v46, %v5695_v54  ;;  %v3803_v49 = vpop.f32.mrf.mxu0 }
 0x847   : > { %5738 = vst [vmem:[#allocation17_spill] sm:$0xff] %v5265_v35  ;;  %5739 = vst [vmem:[#allocation18_spill] sm:$0xff] %v5271_v12  ;;  %v2732_v10 = vsel %vm5154_vm14, %v2702_v52, 0.0  ;;  %v5287_v0 = vsel %vm5705_vm9, %v5740_v23, %v2813_v46  ;;  %v2855_v27 = vsel %vm5166_vm2, %v2824_v58, 0.0  ;;  %v2907_v9 = vsel %vm5116_vm10, %v2702_v52, 0.0 }
 0x848   : > { %v2745_v11 = vmul.f32 %v5077_v41, %v2732_v10  ;;  %v2805_v7 = vadd.f32 %v2797_v33, %v2752_v48  ;;  %v2854_v13 = vsel %vm5162_vm1, %v5287_v0, 0.0  ;;  %v2868_v23 = vmul.f32 %v5109_v31, %v2855_v27 }
 0x849   : > { %v2867_v36 = vmul.f32 %v5109_v31, %v2854_v13  ;;  %v2908_v48 = vsel %vm5154_vm14, %v5271_v12, 0.0  ;;  %v2920_v33 = vmul.f32 %v5185_v50, %v2907_v9  ;;  %v2959_v27 = vsel %vm5124_vm12, %v5287_v0, 0.0  ;;  %v2511_v13 = vpop.f32.mrf.mxu0 }
 0x84a   : > { %v2753_v34 = vadd.f32 %v2745_v11, %v2683_v24  ;;  %v2921_v10 = vmul.f32 %v5185_v50, %v2908_v48  ;;  %v2960_v45 = vsel %vm5162_vm1, %v2824_v58, 0.0  ;;  %v5322_v16 = vmul.f32 %v5198_v53, %v2959_v27 }
 0x84b   : > { %v2875_v57 = vadd.f32 %v2867_v36, %v2805_v7  ;;  %v5325_v47 = vmul.f32 %v5198_v53, %v2960_v45  ;;  %v3012_v9 = vsel %vm5149_vm13, %v2702_v52, 0.0  ;;  %v3118_v27 = vsel %vm5124_vm12, %v2824_v58, 0.0 }
 0x84c   : > { %v2806_v11 = vadd.f32 %v2798_v19, %v2753_v34  ;;  %v5333_v48 = vmul.f32 %v5173_v39, %v3012_v9  ;;  %v5338_v4 = vadd.f32 %v3803_v49, %v5066_v62  ;;  %v5343_v7 = vmul.f32 %v5206_v17, %v3118_v27  ;;  %v5779_v55 = vld [vmem:[#allocation16_spill] sm:$0xff] }
 0x84d   : > { %v5340_v36 = vadd.f32 %v2920_v33, %v2875_v57  ;;  %v2512_v52 = vadd.f32 %v5066_v62, %v2511_v13  ;;  %v2733_v19 = vsel %vm5241_vm3, %v5271_v12, 0.0  ;;  %v3806_v57 = vpop.f32.mrf.mxu0 }
 0x84e   : > { %5747 = vst [vmem:[#allocation19_spill] sm:$0xff] %v5343_v7  ;;  %v2876_v34 = vadd.f32 %v2868_v23, %v2806_v11  ;;  %v2685_v45 = vmul.f32 %v5089_v30, %v5338_v4  ;;  %v5354_v49 = vmul.f32 %v5114_v42, %v5338_v4  ;;  %v5359_v33 = vmul.f32 %v5147_v1, %v5338_v4 }
 0x84f   : > { %v2684_v13 = vmul.f32 %v5089_v30, %v2512_v52  ;;  %v2692_v9 = vrot.slane %v2512_v52, 7  ;;  %v5749_v23 = vand.u32 7, %v5099_v51  ;;  %v2746_v24 = vmul.f32 %v5077_v41, %v2733_v19 }
 0x850   : > { %5748 = vst [vmem:[#allocation20_spill] sm:$0xff] %v5359_v33  ;;  %v2929_v27 = vadd.f32 %v2921_v10, %v2876_v34  ;;  %v2800_v58 = vmul.f32 %v5114_v42, %v2512_v52  ;;  %v2815_v2 = vrot.slane %v2512_v52, 1  ;;  %v5752_v29 = vrot.slane %v5338_v4, 7 }
 0x851   : > { %vm5364_vm7 = vcmp.ge.s32.totalorder %v5749_v23, 1  ;;  %v2700_v23 = vsel %vm2696_vm8, %v5753_v26, %v2692_v9  ;;  %v3080_v33 = vmul.f32 %v5147_v1, %v2512_v52  ;;  %v5382_v10 = vadd.f32 %v3806_v57, %v5066_v62 }
 0x852   : > { %v5374_v8 = vsel %vm2696_vm8, %v2692_v9, %v5752_v29  ;;  %v5754_v19 = vand.u32 7, %v5129_v5  ;;  %v2734_v29 = vsel %vm5293_vm4, %v2700_v23, 0.0  ;;  %v2754_v18 = vadd.f32 %v2746_v24, %v2684_v13 }
 0x853   : > { %v5757_v7 = vrot.slane %v5338_v4, 1  ;;  %v5758_v52 = vrot.slane %v5201_v63, 1  ;;  %v5759_v9 = vand.u32 7, %v5099_v51  ;;  %v2747_v24 = vmul.f32 %v5077_v41, %v2734_v29 }
 0x854   : > { %vm5386_vm12 = vcmp.le.s32.totalorder %v5754_v19, 6  ;;  %v2910_v29 = vsel %vm5293_vm4, %v5374_v8, 0.0  ;;  %v2695_v32 = vrot.slane %v5382_v10, 7  ;;  %v2981_v11 = vadd.f32 %v5325_v47, %v5340_v36 }
 0x855   : > { %v5396_v26 = vsel %vm5705_vm9, %v2815_v2, %v5757_v7  ;;  %v5402_v57 = vsel %vm5705_vm9, %v5758_v52, %v2815_v2  ;;  %vm5406_vm0 = vcmp.le.s32.totalorder %v5759_v9, 6  ;;  %v2909_v2 = vsel %vm5241_vm3, %v2700_v23, 0.0 }
 0x856   : > { %v2856_v13 = vsel %vm5302_vm5, %v5402_v57, 0.0  ;;  %v2857_v63 = vsel %vm5306_vm6, %v5396_v26, 0.0  ;;  %v2807_v7 = vadd.f32 %v5257_v59, %v2754_v18  ;;  %v2755_v9 = vadd.f32 %v2747_v24, %v2685_v45 }
 0x857   : > { %v2869_v51 = vmul.f32 %v5109_v31, %v2856_v13  ;;  %v2870_v52 = vmul.f32 %v5109_v31, %v2857_v63  ;;  %v2922_v35 = vmul.f32 %v5185_v50, %v2909_v2  ;;  %v2923_v61 = vmul.f32 %v5185_v50, %v2910_v29  ;;  %v2521_v63 = vpop.f32.mrf.mxu0  ;;  %v5780_v54 = vld [vmem:[#allocation20_spill] sm:$0xff] }
 0x858   : > { %v2961_v12 = vsel %vm5166_vm2, %v5402_v57, 0.0  ;;  %vm5432_vm9 = vcmp.ge.s32.totalorder %v5762_v15, 1  ;;  %v2962_v13 = vsel %vm5302_vm5, %v5396_v26, 0.0  ;;  %v3014_v24 = vsel %vm5154_vm14, %v2700_v23, 0.0 }
 0x859   : > { %v2877_v18 = vadd.f32 %v2869_v51, %v2807_v7  ;;  %v2974_v45 = vmul.f32 %v5198_v53, %v2961_v12  ;;  %v2808_v2 = vadd.f32 %v2800_v58, %v2755_v9  ;;  %v5443_v29 = vmul.f32 %v5198_v53, %v2962_v13 }
 0x85a   : > { %v3027_v5 = vmul.f32 %v5173_v39, %v3014_v24  ;;  %v2687_v12 = vmul.f32 %v5089_v30, %v5382_v10  ;;  %v2818_v58 = vrot.slane %v5382_v10, 1  ;;  %v5457_v9 = vmul.f32 %v5147_v1, %v5382_v10 }
 0x85b   : > { %v5449_v7 = vadd.f32 %v2922_v35, %v2877_v18  ;;  %v2982_v51 = vadd.f32 %v2974_v45, %v2929_v27  ;;  %v2878_v23 = vadd.f32 %v2870_v52, %v2808_v2  ;;  %v2522_v13 = vadd.f32 %v5066_v62, %v2521_v63 }
 0x85c   : > { %v5765_v24 = vrot.slane %v5082_v14, 7  ;;  %v2735_v27 = vsel %vm5364_vm7, %v5374_v8, 0.0  ;;  %v3117_v52 = vsel %vm5120_vm11, %v5287_v0, 0.0  ;;  %v5766_v62 = vrot.slane %v5082_v14, 1 }
 0x85d   : > { %v3035_v15 = vadd.f32 %v3027_v5, %v2982_v51  ;;  %v2931_v18 = vadd.f32 %v2923_v61, %v2878_v23  ;;  %vm5767_vm14 = vcmp.lt.s32.totalorder %v4481_v37, 7  ;;  %v2686_v61 = vmul.f32 %v5089_v30, %v2522_v13 }
 0x85e   : > { %v2704_v35 = vsel %vm2696_vm8, %v2695_v32, %v5765_v24  ;;  %v2827_v45 = vsel %vm5767_vm14, %v2818_v58, %v5766_v62  ;;  %v2694_v0 = vrot.slane %v2522_v13, 7  ;;  %v2748_v23 = vmul.f32 %v5077_v41, %v2735_v27  ;;  %vm5769_vm11 = vmmov %vm5767_vm14 }
 0x85f   : > { %v2730_v10 = vsel %vm5149_vm13, %v2704_v35, 0.0  ;;  %v2905_v63 = vsel %vm5158_vm15, %v2704_v35, 0.0  ;;  %v5478_v2 = vadd.f32 %v3080_v33, %v3035_v15  ;;  %v2965_v20 = vsel %vm5386_vm12, %v2827_v45, 0.0 }
 0x860   : > { %v2743_v5 = vmul.f32 %v5077_v41, %v2730_v10  ;;  %v2918_v51 = vmul.f32 %v5185_v50, %v2905_v63  ;;  %v5485_v38 = vmul.f32 %v5198_v53, %v2965_v20  ;;  %v3123_v14 = vsel %vm5406_vm0, %v2827_v45, 0.0 }
 0x861   : > { %v5493_v15 = vmul.f32 %v5206_v17, %v3123_v14  ;;  %v2697_v24 = vsel %vm2696_vm8, %v2694_v0, %v2695_v32  ;;  %v5768_v35 = vrot.slane %v5338_v4, 7  ;;  %v2802_v30 = vmul.f32 %v5114_v42, %v2522_v13 }
 0x862   : > { %v2751_v21 = vadd.f32 %v2743_v5, %v5210_v40  ;;  %v2926_v33 = vadd.f32 %v2918_v51, %v5245_v25  ;;  %v2817_v62 = vrot.slane %v2522_v13, 1  ;;  %v2756_v63 = vadd.f32 %v2748_v23, %v2686_v61 }
 0x863   : > { %v2698_v10 = vsel %vm2696_vm8, %v5768_v35, %v2694_v0  ;;  %v5770_v5 = vrot.slane %v5338_v4, 1  ;;  %vm5771_vm8 = vmmov %vm5769_vm11  ;;  %v2912_v37 = vsel %vm5432_vm9, %v2697_v24, 0.0 }
 0x864   : > { %v2804_v40 = vadd.f32 %v5229_v22, %v2751_v21  ;;  %v2979_v25 = vadd.f32 %v5238_v3, %v2926_v33  ;;  %v2736_v45 = vsel %vm5432_vm9, %v2698_v10, 0.0  ;;  %v2820_v32 = vsel %vm5769_vm11, %v2817_v62, %v2818_v58 }
 0x865   : > { %v2749_v27 = vmul.f32 %v5077_v41, %v2736_v45  ;;  %v2821_v51 = vsel %vm5771_vm8, %v5770_v5, %v2817_v62  ;;  %v2911_v42 = vsel %vm5364_vm7, %v2698_v10, 0.0  ;;  %v2809_v3 = vadd.f32 %v5354_v49, %v2756_v63 }
 0x866   : > { %v2874_v22 = vadd.f32 %v5232_v43, %v2804_v40  ;;  %v2858_v20 = vsel %vm5406_vm0, %v2821_v51, 0.0  ;;  %v2859_v41 = vsel %vm5386_vm12, %v2820_v32, 0.0  ;;  %v2924_v43 = vmul.f32 %v5185_v50, %v2911_v42 }
 0x867   : > { %v2757_v14 = vadd.f32 %v2749_v27, %v2687_v12  ;;  %v2871_v58 = vmul.f32 %v5109_v31, %v2858_v20  ;;  %v2872_v4 = vmul.f32 %v5109_v31, %v2859_v41  ;;  %v2925_v49 = vmul.f32 %v5185_v50, %v2912_v37 }
 0x868   : > { %v2927_v61 = vadd.f32 %v5235_v60, %v2874_v22  ;;  %v2963_v0 = vsel %vm5306_vm6, %v2821_v51, 0.0  ;;  %v2964_v12 = vsel %vm5406_vm0, %v2820_v32, 0.0  ;;  %v3016_v60 = vsel %vm5293_vm4, %v2698_v10, 0.0  ;;  %v5773_v10 = vld [vmem:[#allocation18_spill] sm:$0xff] }
 0x869   : > { %v2810_v21 = vadd.f32 %v2802_v30, %v2757_v14  ;;  %v2879_v34 = vadd.f32 %v2871_v58, %v2809_v3  ;;  %v2976_v33 = vmul.f32 %v5198_v53, %v2963_v0  ;;  %v2977_v59 = vmul.f32 %v5198_v53, %v2964_v12 }
 0x86a   : > { %v2980_v31 = vadd.f32 %v5322_v16, %v2927_v61  ;;  %v3017_v50 = vsel %vm5364_vm7, %v2697_v24, 0.0  ;;  %v3029_v30 = vmul.f32 %v5173_v39, %v3016_v60  ;;  %v3082_v40 = vmul.f32 %v5147_v1, %v2522_v13 }
 0x86b   : > { %v2880_v23 = vadd.f32 %v2872_v4, %v2810_v21  ;;  %v2932_v35 = vadd.f32 %v2924_v43, %v2879_v34  ;;  %v2984_v62 = vadd.f32 %v2976_v33, %v2931_v18  ;;  %v3030_v19 = vmul.f32 %v5173_v39, %v3017_v50 }
 0x86c   : > { %v3032_v45 = vadd.f32 %v5251_v28, %v2979_v25  ;;  %v3130_v16 = vmul.f32 %v5206_v17, %v3117_v52  ;;  %v3033_v6 = vadd.f32 %v5333_v48, %v2980_v31  ;;  %v5774_v27 = vsel %vm5116_vm10, %v5773_v10, 0.0  ;;  %v5776_v52 = vld [vmem:[#allocation17_spill] sm:$0xff] }
 0x86d   : > { %v2933_v53 = vadd.f32 %v2925_v49, %v2880_v23  ;;  %v3037_v63 = vadd.f32 %v3029_v30, %v2984_v62  ;;  %v3026_v5 = vmul.f32 %v5173_v39, %v5774_v27  ;;  %v3119_v28 = vsel %vm5162_vm1, %v5402_v57, 0.0  ;;  %v5781_v31 = vld [vmem:[#allocation13_spill] sm:$0xff] }
 0x86e   : > { %v3085_v24 = vadd.f32 %v5224_v56, %v3032_v45  ;;  %v3120_v13 = vsel %vm5166_vm2, %v5396_v26, 0.0  ;;  %v3086_v25 = vadd.f32 %v5776_v52, %v3033_v6  ;;  %v3132_v47 = vmul.f32 %v5206_v17, %v3119_v28  ;;  %v5778_v26 = vld [vmem:[#allocation19_spill] sm:$0xff] }
 0x86f   : > { %v3090_v48 = vadd.f32 %v3082_v40, %v3037_v63  ;;  %v3133_v56 = vmul.f32 %v5206_v17, %v3120_v13  ;;  %v3034_v42 = vadd.f32 %v3026_v5, %v2981_v11  ;;  %v2983_v22 = vadd.f32 %v5443_v29, %v5449_v7 }
 0x870   : > { %v3138_v36 = vadd.f32 %v3130_v16, %v3085_v24  ;;  %v5777_v57 = vsel %vm5241_vm3, %v5374_v8, 0.0  ;;  %v3139_v20 = vadd.f32 %v5778_v26, %v3086_v25  ;;  %v3121_v14 = vsel %vm5302_vm5, %v2821_v51, 0.0  ;;  %v5783_v24 = vld [vmem:[#allocation15_spill] sm:$0xff] }
 0x871   : > { %v3028_v3 = vmul.f32 %v5173_v39, %v5777_v57  ;;  %v3141_v41 = vadd.f32 %v3133_v56, %v5478_v2  ;;  %v3122_v29 = vsel %vm5306_vm6, %v2820_v32, 0.0  ;;  %v3087_v8 = vadd.f32 %v5779_v55, %v3034_v42 }
 0x872   : > { %v5579_v7 = vadd.f32 %v3514_v44, %v3138_v36  ;;  %v3134_v39 = vmul.f32 %v5206_v17, %v3121_v14  ;;  %v5583_v4 = vadd.f32 %v3514_v44, %v3139_v20  ;;  %v3135_v61 = vmul.f32 %v5206_v17, %v3122_v29 }
 0x873   : > { %v3036_v58 = vadd.f32 %v3028_v3, %v2983_v22  ;;  %v5585_v37 = vadd.f32 %v3514_v44, %v3141_v41  ;;  %v2985_v2 = vadd.f32 %v2977_v59, %v2932_v35  ;;  %v3140_v51 = vadd.f32 %v3132_v47, %v3087_v8 }
 0x874   : > { %v3161_v46 = vmul.f32 %v5579_v7, %v5579_v7  ;;  %v2986_v43 = vadd.f32 %v5485_v38, %v2933_v53  ;;  %v3162_v49 = vmul.f32 %v5583_v4, %v5583_v4  ;;  %v3143_v21 = vadd.f32 %v3135_v61, %v3090_v48 }
 0x875   : > { %v3089_v32 = vadd.f32 %v5780_v54, %v3036_v58  ;;  %v3164_v0 = vmul.f32 %v5585_v37, %v5585_v37  ;;  %v3038_v34 = vadd.f32 %v3030_v19, %v2985_v2  ;;  %v5597_v17 = vadd.f32 %v3514_v44, %v3140_v51  ;;  %v5782_v19 = vld [vmem:[#allocation14_spill] sm:$0xff] }
 0x876   : > { %v3169_v12 = vmul.f32 %v3161_v46, %v5579_v7  ;;  %v3039_v59 = vadd.f32 %v5781_v31, %v2986_v43  ;;  %v3170_v60 = vmul.f32 %v3162_v49, %v5583_v4  ;;  %v5602_v38 = vadd.f32 %v3514_v44, %v3143_v21 }
 0x877   : > { %v3142_v33 = vadd.f32 %v3134_v39, %v3089_v32  ;;  %v3172_v50 = vmul.f32 %v3164_v0, %v5585_v37  ;;  %v3091_v23 = vadd.f32 %v5457_v9, %v3038_v34  ;;  %v3163_v62 = vmul.f32 %v5597_v17, %v5597_v17 }
 0x878   : > { %v3177_v35 = vmul.f32 0.044715, %v3169_v12  ;;  %v3092_v40 = vadd.f32 %v5782_v19, %v3039_v59  ;;  %v3178_v45 = vmul.f32 0.044715, %v3170_v60  ;;  %v3166_v53 = vmul.f32 %v5602_v38, %v5602_v38 }
 0x879   : > { %v5607_v30 = vadd.f32 %v3514_v44, %v3142_v33  ;;  %v3180_v16 = vmul.f32 0.044715, %v3172_v50  ;;  %v3144_v63 = vadd.f32 %v5493_v15, %v3091_v23  ;;  %v3171_v11 = vmul.f32 %v3163_v62, %v5597_v17 }
 0x87a   : > { %v3185_v6 = vadd.f32 %v3177_v35, %v5579_v7  ;;  %v3145_v18 = vadd.f32 %v5783_v24, %v3092_v40  ;;  %v3186_v10 = vadd.f32 %v3178_v45, %v5583_v4  ;;  %v3174_v5 = vmul.f32 %v3166_v53, %v5602_v38 }
 0x87b   : > { %v3165_v9 = vmul.f32 %v5607_v30, %v5607_v30  ;;  %v3188_v27 = vadd.f32 %v3180_v16, %v5585_v37  ;;  %v5621_v1 = vadd.f32 %v3514_v44, %v3144_v63  ;;  %v3179_v13 = vmul.f32 0.044715, %v3171_v11 }
 0x87c   : > { %v3193_v28 = vmul.f32 0.7978846, %v3185_v6  ;;  %v5624_v48 = vadd.f32 %v3514_v44, %v3145_v18  ;;  %v3194_v52 = vmul.f32 0.7978846, %v3186_v10  ;;  %v3182_v47 = vmul.f32 0.044715, %v3174_v5 }
 0x87d   : > { %v3173_v15 = vmul.f32 %v3165_v9, %v5607_v30  ;;  %v3196_v25 = vmul.f32 0.7978846, %v3188_v27  ;;  %v3167_v56 = vmul.f32 %v5621_v1, %v5621_v1  ;;  %v3187_v36 = vadd.f32 %v3179_v13, %v5597_v17  ;;  %v5784_v10 = vld [vmem:[#allocation3_spill] sm:$0xff] }
 0x87e   : > { %4039 = vtanh.f32 %v3193_v28  ;;  %v3168_v22 = vmul.f32 %v5624_v48, %v5624_v48  ;;  %v3190_v57 = vadd.f32 %v3182_v47, %v5602_v38  ;;  %vm5785_vm0 = vcmask 261120   ;;  %v5786_v28 = vld [vmem:[#allocation4_spill] sm:$0xff] }
 0x87f   : > { %v3181_v42 = vmul.f32 0.044715, %v3173_v15  ;;  %4041 = vtanh.f32 %v3194_v52  ;;  %v3175_v3 = vmul.f32 %v3167_v56, %v5621_v1  ;;  %v3195_v44 = vmul.f32 0.7978846, %v3187_v36  ;;  %vm5787_vm9 = vmmov %vm5785_vm0  ;;  %v5788_v52 = vld [vmem:[#allocation6_spill] sm:$0xff]  ;;  %v5790_v36 = vld [vmem:[#allocation5_spill] sm:$0xff] }
 0x880   : > { %4043 = vtanh.f32 %v3196_v25  ;;  %v3176_v20 = vmul.f32 %v3168_v22, %v5624_v48  ;;  %v3198_v41 = vmul.f32 0.7978846, %v3190_v57  ;;  %vm5789_vm10 = vmmov %vm5785_vm0 }
 0x881   : > { %v3189_v26 = vadd.f32 %v3181_v42, %v5607_v30  ;;  %v3183_v14 = vmul.f32 0.044715, %v3175_v3  ;;  %4045 = vtanh.f32 %v3195_v44  ;;  %vm5791_vm13 = vmmov %vm5785_vm0  ;;  %v5792_v3 = vld [vmem:[#allocation7_spill] sm:$0xff] }
 0x882   : > { %v3184_v55 = vmul.f32 0.044715, %v3176_v20  ;;  %4047 = vtanh.f32 %v3198_v41  ;;  %vm5793_vm15 = vmmov %vm5785_vm0  ;;  %v5794_v41 = vld [vmem:[#allocation8_spill] sm:$0xff] }
 0x883   : > { %v3197_v29 = vmul.f32 0.7978846, %v3189_v26  ;;  %v3191_v8 = vadd.f32 %v3183_v14, %v5621_v1  ;;  %vm5795_vm1 = vmmov %vm5785_vm0 }
 0x884   : > { %v3192_v58 = vadd.f32 %v3184_v55, %v5624_v48  ;;  %vm5797_vm2 = vmmov %vm5785_vm0 }
 0x885   : > { %4049 = vtanh.f32 %v3197_v29  ;;  %v3199_v39 = vmul.f32 0.7978846, %v3191_v8  ;;  %v5796_v8 = vld [vmem:[#allocation9_spill] sm:$0xff]  ;;  %vm5799_vm3 = vmmov %vm5785_vm0 }
 0x886   : > { %v3200_v61 = vmul.f32 0.7978846, %v3192_v58 }
 0x887   : > { %4051 = vtanh.f32 %v3199_v39 }
 0x888   : > { %4053 = vtanh.f32 %v3200_v61  ;;  %v5798_v61 = vld [vmem:[#allocation10_spill] sm:$0xff] }
 0x88b   : > { %v4040_v2 = vpop.eup %4039 }
 0x88c   : > { %v4042_v46 = vpop.eup %4041  ;;  %v3209_v51 = vadd.f32 1.0, %v4040_v2 }
 0x88d   : > { %v4044_v54 = vpop.eup %4043  ;;  %v3210_v32 = vadd.f32 1.0, %v4042_v46 }
 0x88e   : > { %v3217_v43 = vmul.f32 0.5, %v3209_v51  ;;  %v3212_v49 = vadd.f32 1.0, %v4044_v54  ;;  %v4046_v0 = vpop.eup %4045 }
 0x88f   : > { %v3218_v21 = vmul.f32 0.5, %v3210_v32  ;;  %v4048_v34 = vpop.eup %4047  ;;  %v3211_v33 = vadd.f32 1.0, %v4046_v0 }
 0x890   : > { %v3225_v12 = vmul.f32 %v3217_v43, %v5579_v7  ;;  %v3220_v60 = vmul.f32 0.5, %v3212_v49  ;;  %v3214_v50 = vadd.f32 1.0, %v4048_v34 }
 0x891   : > { %v3226_v59 = vmul.f32 %v3218_v21, %v5583_v4  ;;  %v3219_v23 = vmul.f32 0.5, %v3211_v33 }
 0x892   : > { %v4050_v31 = vpop.eup %4049  ;;  %3839 = vmatprep.mubr.f32.mxu1 %v3225_v12  ;;  %v3228_v16 = vmul.f32 %v3220_v60, %v5585_v37  ;;  %v3222_v53 = vmul.f32 0.5, %v3214_v50  ;;  %v3515_v37 = vld [vmem:[%s5686_s14] ss:$0 sm:$0xff] }
 0x893   : > { %v3213_v35 = vadd.f32 1.0, %v4050_v31  ;;  %3840 = vmatmul.mubr.f32.vlgmr.msra.gmra.mxu1 %v3226_v59  ;;  %v3227_v19 = vmul.f32 %v3219_v23, %v5597_v17 }
 0x894   : > { %v4052_v62 = vpop.eup %4051  ;;  %v3230_v11 = vmul.f32 %v3222_v53, %v5602_v38 }
 0x895   : > { %v3221_v40 = vmul.f32 0.5, %v3213_v35  ;;  %v4054_v45 = vpop.eup %4053  ;;  %v3215_v63 = vadd.f32 1.0, %v4052_v62  ;;  %3842 = vmatprep.mubr.f32.mxu1 %v3227_v19 }
 0x896   : > { %v3216_v4 = vadd.f32 1.0, %v4054_v45 }
 0x897   : > { %v3229_v7 = vmul.f32 %v3221_v40, %v5607_v30  ;;  %3843 = vmatmul.mubr.f32.gmra.mxu1 %v3228_v16  ;;  %v3223_v6 = vmul.f32 0.5, %v3215_v63 }
 0x898   : > { %v3224_v9 = vmul.f32 0.5, %v3216_v4 }
 0x899   : > { %3845 = vmatprep.mubr.f32.mxu1 %v3229_v7  ;;  %v3231_v24 = vmul.f32 %v3223_v6, %v5621_v1 }
 0x89a   : > { %v3232_v17 = vmul.f32 %v3224_v9, %v5624_v48 }
 0x89b   : > { %3846 = vmatmul.mubr.f32.gmra.mxu1 %v3230_v11 }
 0x89c   : > { %3848 = vmatprep.mubr.f32.mxu1 %v3231_v24 }
 0x89f   : > { %3849 = vmatmul.mubr.f32.gmra.mxu1 %v3232_v17 }
 0x953   : > { %v3841_v18 = vpop.f32.mrf.mxu1 }
 0x954   : > { %v3328_v30 = vadd.f32 %v3841_v18, %v3515_v37 }
 0x955   : > { %v3322_v38 = vpop.f32.mrf.mxu1 }
 0x956   : > { %v3362_v27 = vadd.f32 %v3328_v30, %v5784_v10  ;;  %v3323_v5 = vadd.f32 %v3515_v37, %v3322_v38 }
 0x957   : > { %v3844_v1 = vpop.f32.mrf.mxu1 }
 0x958   : > { %3370 = vst.msk [vmem:[%s494_s25 + $0x8] sm:$0xff] %vm5785_vm0, %v3362_v27  ;;  %v3361_v13 = vadd.f32 %v3323_v5, %v5786_v28  ;;  %v3338_v15 = vadd.f32 %v3844_v1, %v3515_v37 }
 0x959   : > { %v3332_v48 = vpop.f32.mrf.mxu1 }
 0x95a   : > { %3369 = vst.msk [vmem:[%s494_s25] sm:$0xff] %vm5787_vm9, %v3361_v13  ;;  %v3364_v25 = vadd.f32 %v3338_v15, %v5788_v52  ;;  %v3333_v47 = vadd.f32 %v3515_v37, %v3332_v48 }
 0x95b   : > { %v3847_v56 = vpop.f32.mrf.mxu1 }
 0x95c   : > { %3372 = vst.msk [vmem:[%s494_s25 + $0x18] sm:$0xff] %vm5789_vm10, %v3364_v25  ;;  %v3363_v42 = vadd.f32 %v3333_v47, %v5790_v36  ;;  %v3348_v22 = vadd.f32 %v3847_v56, %v3515_v37 }
 0x95d   : > { %v3342_v57 = vpop.f32.mrf.mxu1 }
 0x95e   : > { %3371 = vst.msk [vmem:[%s494_s25 + $0x10] sm:$0xff] %vm5791_vm13, %v3363_v42  ;;  %v3366_v44 = vadd.f32 %v3348_v22, %v5792_v3  ;;  %v3343_v26 = vadd.f32 %v3515_v37, %v3342_v57 }
 0x95f   : > { %v3850_v20 = vpop.f32.mrf.mxu1 }
 0x960   : > { %3374 = vst.msk [vmem:[%s494_s25 + $0x28] sm:$0xff] %vm5793_vm15, %v3366_v44  ;;  %v3365_v14 = vadd.f32 %v3343_v26, %v5794_v41  ;;  %v3358_v29 = vadd.f32 %v3850_v20, %v3515_v37 }
 0x961   : > { %v3352_v55 = vpop.f32.mrf.mxu1 }
 0x962   : > { %3373 = vst.msk [vmem:[%s494_s25 + $0x20] sm:$0xff] %vm5795_vm1, %v3365_v14  ;;  %v3368_v58 = vadd.f32 %v3358_v29, %v5796_v8  ;;  %v3353_v39 = vadd.f32 %v3515_v37, %v3352_v55 }
 0x964   : > { %3376 = vst.msk [vmem:[%s494_s25 + $0x38] sm:$0xff] %vm5797_vm2, %v3368_v58  ;;  %v3367_v2 = vadd.f32 %v3353_v39, %v5798_v61 }
 0x966   : > { %3375 = vst.msk [vmem:[%s494_s25 + $0x30] sm:$0xff] %vm5799_vm3, %v3367_v2 }
 0x967 PF: > { %s25_s18 = sadd.s32 1, %s4069_s18  }
 0x968   : > { %p22_p4 = scmp.ge.s32.totalorder %s25_s18, 4  }
 0x96a   :  { %24 = sbr.rel (!%p22_p4) target bundleno = 1 (0x1), region = 110 }

</bundles_post_ra>
